<compile_context>
chip_gen: v5e
topology: v5e:2x2
jax: 0.10.0
libtpu: 0.0.40
codegen_flags: <defaults>
</compile_context>

<pallas_src>
import functools

import jax
import jax.numpy as jnp
from jax.experimental import pallas as pl
from jax.experimental.pallas import tpu as pltpu

N_MFCC = 13          # model.N_MFCC (standard MFCC count)
N_LAYERS = 6
HALO = N_LAYERS      # one halo row per side per conv layer
CIN_PAD = 16         # pad input channels 13 -> 16 (zero channels / zero weight rows)
COUT_PAD = 128       # pad final Cout 1 -> 128 for lane-dense output stores
_ACTS = ("relu", "relu", "relu", "relu", "relu", "tanh")


def _round_up(n, m):
    return ((n + m - 1) // m) * m


# --------------------------------------------------------------------------
# Fused kernel: whole 6-layer stack for one (batch, length-tile) grid step
# --------------------------------------------------------------------------
def _fused_vocoder_kernel(x_ref, w0, w1, w2, w3, w4, w5,
                          b0, b1, b2, b3, b4, b5,
                          o_ref, buf_a, buf_b, *, tile_len, seq_len):
    # x_ref : (R0, CIN_PAD) f32, R0 = tile_len + 2*HALO (halo'd input window)
    # wK    : (3, CinK, CoutK) bf16       bK: (1, CoutK) f32
    # o_ref : (tile_len, COUT_PAD) f32 (lane-dense slab; lane 0 is the output)
    # buf_a : (R0, 512) f32 scratch (outputs of layers 0/2/4)
    # buf_b : (R0, 256) f32 scratch (outputs of layers 1/3)
    t0 = pl.program_id(1) * tile_len

    weights = (w0, w1, w2, w3, w4, w5)
    biases = (b0, b1, b2, b3, b4, b5)
    bufs = (buf_a, buf_b)

    cur_ref = x_ref
    cur_rows = x_ref.shape[0]

    for k in range(N_LAYERS):
        w_ref = weights[k]
        b_ref = biases[k]
        cin = w_ref.shape[1]
        cout = w_ref.shape[2]
        n_out = cur_rows - 2          # valid rows shrink by 1 per side per layer

        # Three taps = three statically shifted ref loads (sublane-offset vld,
        # no value re-layout), cast to bf16, MXU matmul with f32 accumulation.
        acc = jnp.dot(cur_ref[0:n_out, 0:cin].astype(jnp.bfloat16), w_ref[0],
                      preferred_element_type=jnp.float32)
        acc = acc + jnp.dot(cur_ref[1:n_out + 1, 0:cin].astype(jnp.bfloat16), w_ref[1],
                            preferred_element_type=jnp.float32)
        acc = acc + jnp.dot(cur_ref[2:n_out + 2, 0:cin].astype(jnp.bfloat16), w_ref[2],
                            preferred_element_type=jnp.float32)
        acc = acc + b_ref[0][None, :]

        if _ACTS[k] == "relu":
            acc = jnp.maximum(acc, 0.0)
        else:
            acc = jnp.tanh(acc)

        # Zero every row that falls outside the real sequence [0, seq_len) so
        # the NEXT layer sees exactly PyTorch's per-layer padding=1 zeros.
        # Output row i of layer k corresponds to time t = t0 + i + (k+1) - HALO.
        row = jax.lax.broadcasted_iota(jnp.int32, (n_out, 1), 0)
        t = row + (t0 + (k + 1) - HALO)
        acc = jnp.where((t >= 0) & (t < seq_len), acc, 0.0)

        if k == N_LAYERS - 1:
            o_ref[...] = acc.astype(o_ref.dtype)        # (tile_len, COUT_PAD)
        else:
            out_buf = bufs[k % 2]
            out_buf[0:n_out, 0:cout] = acc              # keep in VMEM scratch
            cur_ref = out_buf
            cur_rows = n_out


# --------------------------------------------------------------------------
# Parameter construction (deterministic, PyTorch-shaped, then converted)
# --------------------------------------------------------------------------
def _uniform(key, shape, bound):
    return jax.random.uniform(key, shape, jnp.float32, minval=-bound, maxval=bound)


def init_params(key, input_dim=N_MFCC, output_dim=1):
    """PyTorch-shaped weights (deterministic), converted to (K, In, Out)
    bf16 layout, with layer-0 Cin padded to CIN_PAD and layer-5 Cout padded to
    COUT_PAD (zero rows/cols, so numerics are unchanged)."""
    conv_dims = [(input_dim, 128), (128, 256), (256, 512)]       # encoder Conv1d
    deconv_dims = [(512, 256), (256, 128), (128, output_dim)]    # decoder ConvT1d

    keys = jax.random.split(key, 2 * (len(conv_dims) + len(deconv_dims)))
    ki = 0
    raw = []

    for cin, cout in conv_dims:
        bound = 1.0 / jnp.sqrt(cin * 3.0)                        # PyTorch default bound
        w = _uniform(keys[ki], (cout, cin, 3), bound); ki += 1   # Conv1d: (O, I, K)
        b = _uniform(keys[ki], (cout,), bound); ki += 1
        raw.append((jnp.transpose(w, (2, 1, 0)), b))             # -> (K, I, O)

    for cin, cout in deconv_dims:
        bound = 1.0 / jnp.sqrt(cin * 3.0)
        w = _uniform(keys[ki], (cin, cout, 3), bound); ki += 1   # ConvT1d: (I, O, K)
        b = _uniform(keys[ki], (cout,), bound); ki += 1
        # ConvTranspose1d(k=3, stride=1, pad=1) == Conv1d with flipped kernel:
        # W'[k, i, o] = W[i, o, K-1-k]
        raw.append((jnp.flip(jnp.transpose(w, (2, 0, 1)), axis=0), b))

    # Channel padding for the kernel layout.
    w0, bias0 = raw[0]
    raw[0] = (jnp.pad(w0, ((0, 0), (0, CIN_PAD - w0.shape[1]), (0, 0))), bias0)
    w5, bias5 = raw[-1]
    raw[-1] = (jnp.pad(w5, ((0, 0), (0, 0), (0, COUT_PAD - w5.shape[2]))),
               jnp.pad(bias5, ((0, COUT_PAD - bias5.shape[0]),)))

    return [(w.astype(jnp.bfloat16), b.reshape(1, -1).astype(jnp.float32))
            for w, b in raw]


# --------------------------------------------------------------------------
# Full forward pass (single fused pallas_call)
# --------------------------------------------------------------------------
def vocoder_forward(x_ncw, params, *, tile_len=256):
    """x_ncw: (B, N_MFCC, L) float32 (PyTorch NCW).  Returns (B, 1, L) f32."""
    B, cin, L = x_ncw.shape
    TL = min(_round_up(tile_len, 8), _round_up(L, 8))
    n_tiles = -(-L // TL)
    Lp = n_tiles * TL
    R0 = TL + 2 * HALO

    # NCW -> NLC; pad channels 13->16, time with HALO zeros each side + tail.
    x_blc = jnp.transpose(x_ncw, (0, 2, 1)).astype(jnp.float32)
    xp = jnp.pad(x_blc, ((0, 0), (HALO, HALO + Lp - L), (0, CIN_PAD - cin)))
    # Overlapping halo'd windows (gather on the *small* 16-channel input only).
    win = (jnp.arange(n_tiles) * TL)[:, None] + jnp.arange(R0)[None, :]
    x_win = xp[:, win, :]                          # (B, n_tiles, R0, CIN_PAD)

    ws = [w for w, _ in params]
    bs = [b for _, b in params]

    flops = 2 * B * Lp * sum(3 * w.shape[1] * w.shape[2] for w in ws)
    bytes_accessed = int(x_win.size) * 4 + B * Lp * COUT_PAD * 4 \
        + sum(int(w.size) * 2 for w in ws) + sum(int(b.size) * 4 for b in bs)
    cost = pl.CostEstimate(flops=int(flops),
                           transcendentals=int(B * Lp * COUT_PAD),
                           bytes_accessed=int(bytes_accessed))

    kernel = functools.partial(_fused_vocoder_kernel, tile_len=TL, seq_len=L)

    out = pl.pallas_call(
        kernel,
        out_shape=jax.ShapeDtypeStruct((B, n_tiles, TL, COUT_PAD), jnp.float32),
        grid_spec=pltpu.PrefetchScalarGridSpec(
            num_scalar_prefetch=0,
            grid=(B, n_tiles),
            in_specs=(
                [pl.BlockSpec((None, None, R0, CIN_PAD), lambda b, t: (b, t, 0, 0))]
                + [pl.BlockSpec(w.shape, lambda b, t: (0, 0, 0)) for w in ws]
                + [pl.BlockSpec(bb.shape, lambda b, t: (0, 0)) for bb in bs]
            ),
            out_specs=pl.BlockSpec((None, None, TL, COUT_PAD),
                                   lambda b, t: (b, t, 0, 0)),
            scratch_shapes=[
                pltpu.VMEM((R0, 512), jnp.float32),   # layer 0/2/4 activations
                pltpu.VMEM((R0, 256), jnp.float32),   # layer 1/3 activations
            ],
        ),
        compiler_params=pltpu.CompilerParams(
            dimension_semantics=("parallel", "parallel"),
        ),
        cost_estimate=cost,
    )(x_win, *ws, *bs)

    # Lane 0 of the slab is the real output; drop tail padding; NCW shape.
    y = out[..., 0].reshape(B, Lp)[:, :L]
    return y[:, None, :]


# --------------------------------------------------------------------------
# Plain-JAX f32 reference (same converted weights) for validation
# --------------------------------------------------------------------------
def _reference_forward(x_ncw, params):
    h = jnp.transpose(x_ncw, (0, 2, 1)).astype(jnp.float32)
    h = jnp.pad(h, ((0, 0), (0, 0), (0, CIN_PAD - h.shape[2])))
    for (w, b), act in zip(params, _ACTS):
        wf = w.astype(jnp.float32)
        bf = b.astype(jnp.float32)[0]
        Lh = h.shape[1]
        hp = jnp.pad(h, ((0, 0), (1, 1), (0, 0)))
        y = (jnp.einsum("blc,cd->bld", hp[:, 0:Lh], wf[0])
             + jnp.einsum("blc,cd->bld", hp[:, 1:Lh + 1], wf[1])
             + jnp.einsum("blc,cd->bld", hp[:, 2:Lh + 2], wf[2]) + bf)
        h = jnp.maximum(y, 0.0) if act == "relu" else jnp.tanh(y)
    return jnp.transpose(h[..., :1], (0, 2, 1))


if __name__ == "__main__":
    key = jax.random.PRNGKey(0)
    pkey, xkey = jax.random.split(key)

    B, C, L = 2, N_MFCC, 16
    x = jax.random.normal(xkey, (B, C, L), dtype=jnp.float32)

    params = init_params(pkey, input_dim=N_MFCC, output_dim=1)

    fwd = jax.jit(lambda xx: vocoder_forward(xx, params))
    y = fwd(x)
    jax.block_until_ready(y)

    assert y.shape == (B, 1, L), y.shape
    assert bool(jnp.all(jnp.isfinite(y)))
    assert bool(jnp.all(jnp.abs(y) <= 1.0 + 1e-6))   # tanh output range

    # Numerical check vs. plain-JAX f32 reference (bf16 matmuls in the kernel).
    y_ref = _reference_forward(x, params)
    max_err = float(jnp.max(jnp.abs(y - y_ref)))
    assert max_err < 5e-2, max_err

    print("KERNEL_OK")
</pallas_src>

<mosaic_0001>
module attributes {stable_mosaic.version = 11 : i64} {
  func.func @_fused_vocoder_kernel(%arg0: i32, %arg1: i32, %arg2: memref<1x1x28x16xf32, #tpu.memory_space<vmem>>, %arg3: memref<3x16x128xbf16, #tpu.memory_space<vmem>>, %arg4: memref<3x128x256xbf16, #tpu.memory_space<vmem>>, %arg5: memref<3x256x512xbf16, #tpu.memory_space<vmem>>, %arg6: memref<3x512x256xbf16, #tpu.memory_space<vmem>>, %arg7: memref<3x256x128xbf16, #tpu.memory_space<vmem>>, %arg8: memref<3x128x128xbf16, #tpu.memory_space<vmem>>, %arg9: memref<1x128xf32, #tpu.memory_space<vmem>>, %arg10: memref<1x256xf32, #tpu.memory_space<vmem>>, %arg11: memref<1x512xf32, #tpu.memory_space<vmem>>, %arg12: memref<1x256xf32, #tpu.memory_space<vmem>>, %arg13: memref<1x128xf32, #tpu.memory_space<vmem>>, %arg14: memref<1x128xf32, #tpu.memory_space<vmem>>, %arg15: memref<1x1x16x128xf32, #tpu.memory_space<vmem>>, %arg16: memref<28x512xf32, #tpu.memory_space<vmem>>, %arg17: memref<28x256xf32, #tpu.memory_space<vmem>>) attributes {dimension_semantics = [#tpu.dimension_semantics<parallel>, #tpu.dimension_semantics<parallel>], iteration_bounds = array<i64: 2, 1>, scalar_prefetch = 0 : i64, scratch_operands = 2 : i64, tpu.core_type = #tpu.core_type<tc>, window_params = [{transform_indices = @transform_0, window_bounds = array<i64: 1, 1, 28, 16>}, {pipeline_mode = #tpu.pipeline_mode<synchronous>, transform_indices = @transform_1, window_bounds = array<i64: 3, 16, 128>}, {pipeline_mode = #tpu.pipeline_mode<synchronous>, transform_indices = @transform_2, window_bounds = array<i64: 3, 128, 256>}, {pipeline_mode = #tpu.pipeline_mode<synchronous>, transform_indices = @transform_3, window_bounds = array<i64: 3, 256, 512>}, {pipeline_mode = #tpu.pipeline_mode<synchronous>, transform_indices = @transform_4, window_bounds = array<i64: 3, 512, 256>}, {pipeline_mode = #tpu.pipeline_mode<synchronous>, transform_indices = @transform_5, window_bounds = array<i64: 3, 256, 128>}, {pipeline_mode = #tpu.pipeline_mode<synchronous>, transform_indices = @transform_6, window_bounds = array<i64: 3, 128, 128>}, {pipeline_mode = #tpu.pipeline_mode<synchronous>, transform_indices = @transform_7, window_bounds = array<i64: 1, 128>}, {pipeline_mode = #tpu.pipeline_mode<synchronous>, transform_indices = @transform_8, window_bounds = array<i64: 1, 256>}, {pipeline_mode = #tpu.pipeline_mode<synchronous>, transform_indices = @transform_9, window_bounds = array<i64: 1, 512>}, {pipeline_mode = #tpu.pipeline_mode<synchronous>, transform_indices = @transform_10, window_bounds = array<i64: 1, 256>}, {pipeline_mode = #tpu.pipeline_mode<synchronous>, transform_indices = @transform_11, window_bounds = array<i64: 1, 128>}, {pipeline_mode = #tpu.pipeline_mode<synchronous>, transform_indices = @transform_12, window_bounds = array<i64: 1, 128>}, {transform_indices = @transform_13, window_bounds = array<i64: 1, 1, 16, 128>}]} {
    %c16_i32 = arith.constant 16 : i32
    %0 = arith.muli %arg1, %c16_i32 : i32
    %c0 = arith.constant 0 : index
    %c0_0 = arith.constant 0 : index
    %c0_1 = arith.constant 0 : index
    %c0_2 = arith.constant 0 : index
    %1 = vector.load %arg2[%c0, %c0_0, %c0_1, %c0_2] : memref<1x1x28x16xf32, #tpu.memory_space<vmem>>, vector<1x1x26x16xf32>
    %2 = vector.shape_cast %1 : vector<1x1x26x16xf32> to vector<26x16xf32>
    %3 = arith.truncf %2 : vector<26x16xf32> to vector<26x16xbf16>
    %c0_3 = arith.constant 0 : index
    %c0_4 = arith.constant 0 : index
    %c0_5 = arith.constant 0 : index
    %4 = vector.load %arg3[%c0_3, %c0_4, %c0_5] : memref<3x16x128xbf16, #tpu.memory_space<vmem>>, vector<1x16x128xbf16>
    %5 = vector.shape_cast %4 : vector<1x16x128xbf16> to vector<16x128xbf16>
    %cst = arith.constant dense<0.000000e+00> : vector<26x128xf32>
    %6 = tpu.matmul %3, %5, %cst {dimension_numbers = #tpu.dot_dimension_numbers<[1], [0], [0], [1], [0, 0, 1, 1], [], []>} : vector<26x16xbf16>, vector<16x128xbf16>, vector<26x128xf32> -> vector<26x128xf32>
    %c0_6 = arith.constant 0 : index
    %c0_7 = arith.constant 0 : index
    %c1 = arith.constant 1 : index
    %c0_8 = arith.constant 0 : index
    %7 = vector.load %arg2[%c0_6, %c0_7, %c1, %c0_8] : memref<1x1x28x16xf32, #tpu.memory_space<vmem>>, vector<1x1x26x16xf32>
    %8 = vector.shape_cast %7 : vector<1x1x26x16xf32> to vector<26x16xf32>
    %9 = arith.truncf %8 : vector<26x16xf32> to vector<26x16xbf16>
    %c1_9 = arith.constant 1 : index
    %c0_10 = arith.constant 0 : index
    %c0_11 = arith.constant 0 : index
    %10 = vector.load %arg3[%c1_9, %c0_10, %c0_11] : memref<3x16x128xbf16, #tpu.memory_space<vmem>>, vector<1x16x128xbf16>
    %11 = vector.shape_cast %10 : vector<1x16x128xbf16> to vector<16x128xbf16>
    %cst_12 = arith.constant dense<0.000000e+00> : vector<26x128xf32>
    %12 = tpu.matmul %9, %11, %cst_12 {dimension_numbers = #tpu.dot_dimension_numbers<[1], [0], [0], [1], [0, 0, 1, 1], [], []>} : vector<26x16xbf16>, vector<16x128xbf16>, vector<26x128xf32> -> vector<26x128xf32>
    %13 = arith.addf %6, %12 : vector<26x128xf32>
    %c0_13 = arith.constant 0 : index
    %c0_14 = arith.constant 0 : index
    %c2 = arith.constant 2 : index
    %c0_15 = arith.constant 0 : index
    %14 = vector.load %arg2[%c0_13, %c0_14, %c2, %c0_15] : memref<1x1x28x16xf32, #tpu.memory_space<vmem>>, vector<1x1x26x16xf32>
    %15 = vector.shape_cast %14 : vector<1x1x26x16xf32> to vector<26x16xf32>
    %16 = arith.truncf %15 : vector<26x16xf32> to vector<26x16xbf16>
    %c2_16 = arith.constant 2 : index
    %c0_17 = arith.constant 0 : index
    %c0_18 = arith.constant 0 : index
    %17 = vector.load %arg3[%c2_16, %c0_17, %c0_18] : memref<3x16x128xbf16, #tpu.memory_space<vmem>>, vector<1x16x128xbf16>
    %18 = vector.shape_cast %17 : vector<1x16x128xbf16> to vector<16x128xbf16>
    %cst_19 = arith.constant dense<0.000000e+00> : vector<26x128xf32>
    %19 = tpu.matmul %16, %18, %cst_19 {dimension_numbers = #tpu.dot_dimension_numbers<[1], [0], [0], [1], [0, 0, 1, 1], [], []>} : vector<26x16xbf16>, vector<16x128xbf16>, vector<26x128xf32> -> vector<26x128xf32>
    %20 = arith.addf %13, %19 : vector<26x128xf32>
    %c0_20 = arith.constant 0 : index
    %c0_21 = arith.constant 0 : index
    %21 = vector.load %arg9[%c0_20, %c0_21] : memref<1x128xf32, #tpu.memory_space<vmem>>, vector<1x128xf32>
    %22 = vector.shape_cast %21 : vector<1x128xf32> to vector<128xf32>
    %23 = vector.shape_cast %22 : vector<128xf32> to vector<1x128xf32>
    %24 = vector.broadcast %23 : vector<1x128xf32> to vector<26x128xf32>
    %25 = arith.addf %20, %24 : vector<26x128xf32>
    %cst_22 = arith.constant 0.000000e+00 : f32
    %26 = vector.broadcast %cst_22 : f32 to vector<26x128xf32>
    %27 = arith.maximumf %25, %26 : vector<26x128xf32>
    %28 = tpu.iota {dimensions = array<i32: 0>} : vector<26x1xi32>
    %c1_i32 = arith.constant 1 : i32
    %29 = arith.addi %0, %c1_i32 : i32
    %c6_i32 = arith.constant 6 : i32
    %30 = arith.subi %29, %c6_i32 : i32
    %31 = vector.broadcast %30 : i32 to vector<26x1xi32>
    %32 = arith.addi %28, %31 : vector<26x1xi32>
    %c0_i32 = arith.constant 0 : i32
    %33 = vector.broadcast %c0_i32 : i32 to vector<26x1xi32>
    %34 = arith.cmpi sge, %32, %33 : vector<26x1xi32>
    %c16_i32_23 = arith.constant 16 : i32
    %35 = vector.broadcast %c16_i32_23 : i32 to vector<26x1xi32>
    %36 = arith.cmpi slt, %32, %35 : vector<26x1xi32>
    %37 = arith.andi %34, %36 : vector<26x1xi1>
    %cst_24 = arith.constant 0.000000e+00 : f32
    %38 = vector.shape_cast %37 : vector<26x1xi1> to vector<26x1xi1>
    %39 = vector.broadcast %38 : vector<26x1xi1> to vector<26x128xi1>
    %40 = vector.broadcast %cst_24 : f32 to vector<26x128xf32>
    %41 = arith.select %39, %27, %40 : vector<26x128xi1>, vector<26x128xf32>
    %c0_25 = arith.constant 0 : index
    %c0_26 = arith.constant 0 : index
    %42 = vector.load %arg16[%c0_25, %c0_26] : memref<28x512xf32, #tpu.memory_space<vmem>>, vector<26x128xf32>
    tpu.vector_store %arg16[%c0_25, %c0_26], %41 {strides = array<i32>} : memref<28x512xf32, #tpu.memory_space<vmem>>, vector<26x128xf32>,
    %c0_27 = arith.constant 0 : index
    %c0_28 = arith.constant 0 : index
    %43 = vector.load %arg16[%c0_27, %c0_28] : memref<28x512xf32, #tpu.memory_space<vmem>>, vector<24x128xf32>
    %44 = arith.truncf %43 : vector<24x128xf32> to vector<24x128xbf16>
    %c0_29 = arith.constant 0 : index
    %c0_30 = arith.constant 0 : index
    %c0_31 = arith.constant 0 : index
    %45 = vector.load %arg4[%c0_29, %c0_30, %c0_31] : memref<3x128x256xbf16, #tpu.memory_space<vmem>>, vector<1x128x256xbf16>
    %46 = vector.shape_cast %45 : vector<1x128x256xbf16> to vector<128x256xbf16>
    %cst_32 = arith.constant dense<0.000000e+00> : vector<24x256xf32>
    %47 = tpu.matmul %44, %46, %cst_32 {dimension_numbers = #tpu.dot_dimension_numbers<[1], [0], [0], [1], [0, 0, 1, 1], [], []>} : vector<24x128xbf16>, vector<128x256xbf16>, vector<24x256xf32> -> vector<24x256xf32>
    %c1_33 = arith.constant 1 : index
    %c0_34 = arith.constant 0 : index
    %48 = vector.load %arg16[%c1_33, %c0_34] : memref<28x512xf32, #tpu.memory_space<vmem>>, vector<24x128xf32>
    %49 = arith.truncf %48 : vector<24x128xf32> to vector<24x128xbf16>
    %c1_35 = arith.constant 1 : index
    %c0_36 = arith.constant 0 : index
    %c0_37 = arith.constant 0 : index
    %50 = vector.load %arg4[%c1_35, %c0_36, %c0_37] : memref<3x128x256xbf16, #tpu.memory_space<vmem>>, vector<1x128x256xbf16>
    %51 = vector.shape_cast %50 : vector<1x128x256xbf16> to vector<128x256xbf16>
    %cst_38 = arith.constant dense<0.000000e+00> : vector<24x256xf32>
    %52 = tpu.matmul %49, %51, %cst_38 {dimension_numbers = #tpu.dot_dimension_numbers<[1], [0], [0], [1], [0, 0, 1, 1], [], []>} : vector<24x128xbf16>, vector<128x256xbf16>, vector<24x256xf32> -> vector<24x256xf32>
    %53 = arith.addf %47, %52 : vector<24x256xf32>
    %c2_39 = arith.constant 2 : index
    %c0_40 = arith.constant 0 : index
    %54 = vector.load %arg16[%c2_39, %c0_40] : memref<28x512xf32, #tpu.memory_space<vmem>>, vector<24x128xf32>
    %55 = arith.truncf %54 : vector<24x128xf32> to vector<24x128xbf16>
    %c2_41 = arith.constant 2 : index
    %c0_42 = arith.constant 0 : index
    %c0_43 = arith.constant 0 : index
    %56 = vector.load %arg4[%c2_41, %c0_42, %c0_43] : memref<3x128x256xbf16, #tpu.memory_space<vmem>>, vector<1x128x256xbf16>
    %57 = vector.shape_cast %56 : vector<1x128x256xbf16> to vector<128x256xbf16>
    %cst_44 = arith.constant dense<0.000000e+00> : vector<24x256xf32>
    %58 = tpu.matmul %55, %57, %cst_44 {dimension_numbers = #tpu.dot_dimension_numbers<[1], [0], [0], [1], [0, 0, 1, 1], [], []>} : vector<24x128xbf16>, vector<128x256xbf16>, vector<24x256xf32> -> vector<24x256xf32>
    %59 = arith.addf %53, %58 : vector<24x256xf32>
    %c0_45 = arith.constant 0 : index
    %c0_46 = arith.constant 0 : index
    %60 = vector.load %arg10[%c0_45, %c0_46] : memref<1x256xf32, #tpu.memory_space<vmem>>, vector<1x256xf32>
    %61 = vector.shape_cast %60 : vector<1x256xf32> to vector<256xf32>
    %62 = vector.shape_cast %61 : vector<256xf32> to vector<1x256xf32>
    %63 = vector.broadcast %62 : vector<1x256xf32> to vector<24x256xf32>
    %64 = arith.addf %59, %63 : vector<24x256xf32>
    %cst_47 = arith.constant 0.000000e+00 : f32
    %65 = vector.broadcast %cst_47 : f32 to vector<24x256xf32>
    %66 = arith.maximumf %64, %65 : vector<24x256xf32>
    %67 = tpu.iota {dimensions = array<i32: 0>} : vector<24x1xi32>
    %c2_i32 = arith.constant 2 : i32
    %68 = arith.addi %0, %c2_i32 : i32
    %c6_i32_48 = arith.constant 6 : i32
    %69 = arith.subi %68, %c6_i32_48 : i32
    %70 = vector.broadcast %69 : i32 to vector<24x1xi32>
    %71 = arith.addi %67, %70 : vector<24x1xi32>
    %c0_i32_49 = arith.constant 0 : i32
    %72 = vector.broadcast %c0_i32_49 : i32 to vector<24x1xi32>
    %73 = arith.cmpi sge, %71, %72 : vector<24x1xi32>
    %c16_i32_50 = arith.constant 16 : i32
    %74 = vector.broadcast %c16_i32_50 : i32 to vector<24x1xi32>
    %75 = arith.cmpi slt, %71, %74 : vector<24x1xi32>
    %76 = arith.andi %73, %75 : vector<24x1xi1>
    %cst_51 = arith.constant 0.000000e+00 : f32
    %77 = vector.shape_cast %76 : vector<24x1xi1> to vector<24x1xi1>
    %78 = vector.broadcast %77 : vector<24x1xi1> to vector<24x256xi1>
    %79 = vector.broadcast %cst_51 : f32 to vector<24x256xf32>
    %80 = arith.select %78, %66, %79 : vector<24x256xi1>, vector<24x256xf32>
    %c0_52 = arith.constant 0 : index
    %c0_53 = arith.constant 0 : index
    %81 = vector.load %arg17[%c0_52, %c0_53] : memref<28x256xf32, #tpu.memory_space<vmem>>, vector<24x256xf32>
    tpu.vector_store %arg17[%c0_52, %c0_53], %80 {strides = array<i32>} : memref<28x256xf32, #tpu.memory_space<vmem>>, vector<24x256xf32>,
    %c0_54 = arith.constant 0 : index
    %c0_55 = arith.constant 0 : index
    %82 = vector.load %arg17[%c0_54, %c0_55] : memref<28x256xf32, #tpu.memory_space<vmem>>, vector<22x256xf32>
    %83 = arith.truncf %82 : vector<22x256xf32> to vector<22x256xbf16>
    %c0_56 = arith.constant 0 : index
    %c0_57 = arith.constant 0 : index
    %c0_58 = arith.constant 0 : index
    %84 = vector.load %arg5[%c0_56, %c0_57, %c0_58] : memref<3x256x512xbf16, #tpu.memory_space<vmem>>, vector<1x256x512xbf16>
    %85 = vector.shape_cast %84 : vector<1x256x512xbf16> to vector<256x512xbf16>
    %cst_59 = arith.constant dense<0.000000e+00> : vector<22x512xf32>
    %86 = tpu.matmul %83, %85, %cst_59 {dimension_numbers = #tpu.dot_dimension_numbers<[1], [0], [0], [1], [0, 0, 1, 1], [], []>} : vector<22x256xbf16>, vector<256x512xbf16>, vector<22x512xf32> -> vector<22x512xf32>
    %c1_60 = arith.constant 1 : index
    %c0_61 = arith.constant 0 : index
    %87 = vector.load %arg17[%c1_60, %c0_61] : memref<28x256xf32, #tpu.memory_space<vmem>>, vector<22x256xf32>
    %88 = arith.truncf %87 : vector<22x256xf32> to vector<22x256xbf16>
    %c1_62 = arith.constant 1 : index
    %c0_63 = arith.constant 0 : index
    %c0_64 = arith.constant 0 : index
    %89 = vector.load %arg5[%c1_62, %c0_63, %c0_64] : memref<3x256x512xbf16, #tpu.memory_space<vmem>>, vector<1x256x512xbf16>
    %90 = vector.shape_cast %89 : vector<1x256x512xbf16> to vector<256x512xbf16>
    %cst_65 = arith.constant dense<0.000000e+00> : vector<22x512xf32>
    %91 = tpu.matmul %88, %90, %cst_65 {dimension_numbers = #tpu.dot_dimension_numbers<[1], [0], [0], [1], [0, 0, 1, 1], [], []>} : vector<22x256xbf16>, vector<256x512xbf16>, vector<22x512xf32> -> vector<22x512xf32>
    %92 = arith.addf %86, %91 : vector<22x512xf32>
    %c2_66 = arith.constant 2 : index
    %c0_67 = arith.constant 0 : index
    %93 = vector.load %arg17[%c2_66, %c0_67] : memref<28x256xf32, #tpu.memory_space<vmem>>, vector<22x256xf32>
    %94 = arith.truncf %93 : vector<22x256xf32> to vector<22x256xbf16>
    %c2_68 = arith.constant 2 : index
    %c0_69 = arith.constant 0 : index
    %c0_70 = arith.constant 0 : index
    %95 = vector.load %arg5[%c2_68, %c0_69, %c0_70] : memref<3x256x512xbf16, #tpu.memory_space<vmem>>, vector<1x256x512xbf16>
    %96 = vector.shape_cast %95 : vector<1x256x512xbf16> to vector<256x512xbf16>
    %cst_71 = arith.constant dense<0.000000e+00> : vector<22x512xf32>
    %97 = tpu.matmul %94, %96, %cst_71 {dimension_numbers = #tpu.dot_dimension_numbers<[1], [0], [0], [1], [0, 0, 1, 1], [], []>} : vector<22x256xbf16>, vector<256x512xbf16>, vector<22x512xf32> -> vector<22x512xf32>
    %98 = arith.addf %92, %97 : vector<22x512xf32>
    %c0_72 = arith.constant 0 : index
    %c0_73 = arith.constant 0 : index
    %99 = vector.load %arg11[%c0_72, %c0_73] : memref<1x512xf32, #tpu.memory_space<vmem>>, vector<1x512xf32>
    %100 = vector.shape_cast %99 : vector<1x512xf32> to vector<512xf32>
    %101 = vector.shape_cast %100 : vector<512xf32> to vector<1x512xf32>
    %102 = vector.broadcast %101 : vector<1x512xf32> to vector<22x512xf32>
    %103 = arith.addf %98, %102 : vector<22x512xf32>
    %cst_74 = arith.constant 0.000000e+00 : f32
    %104 = vector.broadcast %cst_74 : f32 to vector<22x512xf32>
    %105 = arith.maximumf %103, %104 : vector<22x512xf32>
    %106 = tpu.iota {dimensions = array<i32: 0>} : vector<22x1xi32>
    %c3_i32 = arith.constant 3 : i32
    %107 = arith.addi %0, %c3_i32 : i32
    %c6_i32_75 = arith.constant 6 : i32
    %108 = arith.subi %107, %c6_i32_75 : i32
    %109 = vector.broadcast %108 : i32 to vector<22x1xi32>
    %110 = arith.addi %106, %109 : vector<22x1xi32>
    %c0_i32_76 = arith.constant 0 : i32
    %111 = vector.broadcast %c0_i32_76 : i32 to vector<22x1xi32>
    %112 = arith.cmpi sge, %110, %111 : vector<22x1xi32>
    %c16_i32_77 = arith.constant 16 : i32
    %113 = vector.broadcast %c16_i32_77 : i32 to vector<22x1xi32>
    %114 = arith.cmpi slt, %110, %113 : vector<22x1xi32>
    %115 = arith.andi %112, %114 : vector<22x1xi1>
    %cst_78 = arith.constant 0.000000e+00 : f32
    %116 = vector.shape_cast %115 : vector<22x1xi1> to vector<22x1xi1>
    %117 = vector.broadcast %116 : vector<22x1xi1> to vector<22x512xi1>
    %118 = vector.broadcast %cst_78 : f32 to vector<22x512xf32>
    %119 = arith.select %117, %105, %118 : vector<22x512xi1>, vector<22x512xf32>
    %c0_79 = arith.constant 0 : index
    %c0_80 = arith.constant 0 : index
    %120 = vector.load %arg16[%c0_79, %c0_80] : memref<28x512xf32, #tpu.memory_space<vmem>>, vector<22x512xf32>
    tpu.vector_store %arg16[%c0_79, %c0_80], %119 {strides = array<i32>} : memref<28x512xf32, #tpu.memory_space<vmem>>, vector<22x512xf32>,
    %c0_81 = arith.constant 0 : index
    %c0_82 = arith.constant 0 : index
    %121 = vector.load %arg16[%c0_81, %c0_82] : memref<28x512xf32, #tpu.memory_space<vmem>>, vector<20x512xf32>
    %122 = arith.truncf %121 : vector<20x512xf32> to vector<20x512xbf16>
    %c0_83 = arith.constant 0 : index
    %c0_84 = arith.constant 0 : index
    %c0_85 = arith.constant 0 : index
    %123 = vector.load %arg6[%c0_83, %c0_84, %c0_85] : memref<3x512x256xbf16, #tpu.memory_space<vmem>>, vector<1x512x256xbf16>
    %124 = vector.shape_cast %123 : vector<1x512x256xbf16> to vector<512x256xbf16>
    %cst_86 = arith.constant dense<0.000000e+00> : vector<20x256xf32>
    %125 = tpu.matmul %122, %124, %cst_86 {dimension_numbers = #tpu.dot_dimension_numbers<[1], [0], [0], [1], [0, 0, 1, 1], [], []>} : vector<20x512xbf16>, vector<512x256xbf16>, vector<20x256xf32> -> vector<20x256xf32>
    %c1_87 = arith.constant 1 : index
    %c0_88 = arith.constant 0 : index
    %126 = vector.load %arg16[%c1_87, %c0_88] : memref<28x512xf32, #tpu.memory_space<vmem>>, vector<20x512xf32>
    %127 = arith.truncf %126 : vector<20x512xf32> to vector<20x512xbf16>
    %c1_89 = arith.constant 1 : index
    %c0_90 = arith.constant 0 : index
    %c0_91 = arith.constant 0 : index
    %128 = vector.load %arg6[%c1_89, %c0_90, %c0_91] : memref<3x512x256xbf16, #tpu.memory_space<vmem>>, vector<1x512x256xbf16>
    %129 = vector.shape_cast %128 : vector<1x512x256xbf16> to vector<512x256xbf16>
    %cst_92 = arith.constant dense<0.000000e+00> : vector<20x256xf32>
    %130 = tpu.matmul %127, %129, %cst_92 {dimension_numbers = #tpu.dot_dimension_numbers<[1], [0], [0], [1], [0, 0, 1, 1], [], []>} : vector<20x512xbf16>, vector<512x256xbf16>, vector<20x256xf32> -> vector<20x256xf32>
    %131 = arith.addf %125, %130 : vector<20x256xf32>
    %c2_93 = arith.constant 2 : index
    %c0_94 = arith.constant 0 : index
    %132 = vector.load %arg16[%c2_93, %c0_94] : memref<28x512xf32, #tpu.memory_space<vmem>>, vector<20x512xf32>
    %133 = arith.truncf %132 : vector<20x512xf32> to vector<20x512xbf16>
    %c2_95 = arith.constant 2 : index
    %c0_96 = arith.constant 0 : index
    %c0_97 = arith.constant 0 : index
    %134 = vector.load %arg6[%c2_95, %c0_96, %c0_97] : memref<3x512x256xbf16, #tpu.memory_space<vmem>>, vector<1x512x256xbf16>
    %135 = vector.shape_cast %134 : vector<1x512x256xbf16> to vector<512x256xbf16>
    %cst_98 = arith.constant dense<0.000000e+00> : vector<20x256xf32>
    %136 = tpu.matmul %133, %135, %cst_98 {dimension_numbers = #tpu.dot_dimension_numbers<[1], [0], [0], [1], [0, 0, 1, 1], [], []>} : vector<20x512xbf16>, vector<512x256xbf16>, vector<20x256xf32> -> vector<20x256xf32>
    %137 = arith.addf %131, %136 : vector<20x256xf32>
    %c0_99 = arith.constant 0 : index
    %c0_100 = arith.constant 0 : index
    %138 = vector.load %arg12[%c0_99, %c0_100] : memref<1x256xf32, #tpu.memory_space<vmem>>, vector<1x256xf32>
    %139 = vector.shape_cast %138 : vector<1x256xf32> to vector<256xf32>
    %140 = vector.shape_cast %139 : vector<256xf32> to vector<1x256xf32>
    %141 = vector.broadcast %140 : vector<1x256xf32> to vector<20x256xf32>
    %142 = arith.addf %137, %141 : vector<20x256xf32>
    %cst_101 = arith.constant 0.000000e+00 : f32
    %143 = vector.broadcast %cst_101 : f32 to vector<20x256xf32>
    %144 = arith.maximumf %142, %143 : vector<20x256xf32>
    %145 = tpu.iota {dimensions = array<i32: 0>} : vector<20x1xi32>
    %c4_i32 = arith.constant 4 : i32
    %146 = arith.addi %0, %c4_i32 : i32
    %c6_i32_102 = arith.constant 6 : i32
    %147 = arith.subi %146, %c6_i32_102 : i32
    %148 = vector.broadcast %147 : i32 to vector<20x1xi32>
    %149 = arith.addi %145, %148 : vector<20x1xi32>
    %c0_i32_103 = arith.constant 0 : i32
    %150 = vector.broadcast %c0_i32_103 : i32 to vector<20x1xi32>
    %151 = arith.cmpi sge, %149, %150 : vector<20x1xi32>
    %c16_i32_104 = arith.constant 16 : i32
    %152 = vector.broadcast %c16_i32_104 : i32 to vector<20x1xi32>
    %153 = arith.cmpi slt, %149, %152 : vector<20x1xi32>
    %154 = arith.andi %151, %153 : vector<20x1xi1>
    %cst_105 = arith.constant 0.000000e+00 : f32
    %155 = vector.shape_cast %154 : vector<20x1xi1> to vector<20x1xi1>
    %156 = vector.broadcast %155 : vector<20x1xi1> to vector<20x256xi1>
    %157 = vector.broadcast %cst_105 : f32 to vector<20x256xf32>
    %158 = arith.select %156, %144, %157 : vector<20x256xi1>, vector<20x256xf32>
    %c0_106 = arith.constant 0 : index
    %c0_107 = arith.constant 0 : index
    %159 = vector.load %arg17[%c0_106, %c0_107] : memref<28x256xf32, #tpu.memory_space<vmem>>, vector<20x256xf32>
    tpu.vector_store %arg17[%c0_106, %c0_107], %158 {strides = array<i32>} : memref<28x256xf32, #tpu.memory_space<vmem>>, vector<20x256xf32>,
    %c0_108 = arith.constant 0 : index
    %c0_109 = arith.constant 0 : index
    %160 = vector.load %arg17[%c0_108, %c0_109] : memref<28x256xf32, #tpu.memory_space<vmem>>, vector<18x256xf32>
    %161 = arith.truncf %160 : vector<18x256xf32> to vector<18x256xbf16>
    %c0_110 = arith.constant 0 : index
    %c0_111 = arith.constant 0 : index
    %c0_112 = arith.constant 0 : index
    %162 = vector.load %arg7[%c0_110, %c0_111, %c0_112] : memref<3x256x128xbf16, #tpu.memory_space<vmem>>, vector<1x256x128xbf16>
    %163 = vector.shape_cast %162 : vector<1x256x128xbf16> to vector<256x128xbf16>
    %cst_113 = arith.constant dense<0.000000e+00> : vector<18x128xf32>
    %164 = tpu.matmul %161, %163, %cst_113 {dimension_numbers = #tpu.dot_dimension_numbers<[1], [0], [0], [1], [0, 0, 1, 1], [], []>} : vector<18x256xbf16>, vector<256x128xbf16>, vector<18x128xf32> -> vector<18x128xf32>
    %c1_114 = arith.constant 1 : index
    %c0_115 = arith.constant 0 : index
    %165 = vector.load %arg17[%c1_114, %c0_115] : memref<28x256xf32, #tpu.memory_space<vmem>>, vector<18x256xf32>
    %166 = arith.truncf %165 : vector<18x256xf32> to vector<18x256xbf16>
    %c1_116 = arith.constant 1 : index
    %c0_117 = arith.constant 0 : index
    %c0_118 = arith.constant 0 : index
    %167 = vector.load %arg7[%c1_116, %c0_117, %c0_118] : memref<3x256x128xbf16, #tpu.memory_space<vmem>>, vector<1x256x128xbf16>
    %168 = vector.shape_cast %167 : vector<1x256x128xbf16> to vector<256x128xbf16>
    %cst_119 = arith.constant dense<0.000000e+00> : vector<18x128xf32>
    %169 = tpu.matmul %166, %168, %cst_119 {dimension_numbers = #tpu.dot_dimension_numbers<[1], [0], [0], [1], [0, 0, 1, 1], [], []>} : vector<18x256xbf16>, vector<256x128xbf16>, vector<18x128xf32> -> vector<18x128xf32>
    %170 = arith.addf %164, %169 : vector<18x128xf32>
    %c2_120 = arith.constant 2 : index
    %c0_121 = arith.constant 0 : index
    %171 = vector.load %arg17[%c2_120, %c0_121] : memref<28x256xf32, #tpu.memory_space<vmem>>, vector<18x256xf32>
    %172 = arith.truncf %171 : vector<18x256xf32> to vector<18x256xbf16>
    %c2_122 = arith.constant 2 : index
    %c0_123 = arith.constant 0 : index
    %c0_124 = arith.constant 0 : index
    %173 = vector.load %arg7[%c2_122, %c0_123, %c0_124] : memref<3x256x128xbf16, #tpu.memory_space<vmem>>, vector<1x256x128xbf16>
    %174 = vector.shape_cast %173 : vector<1x256x128xbf16> to vector<256x128xbf16>
    %cst_125 = arith.constant dense<0.000000e+00> : vector<18x128xf32>
    %175 = tpu.matmul %172, %174, %cst_125 {dimension_numbers = #tpu.dot_dimension_numbers<[1], [0], [0], [1], [0, 0, 1, 1], [], []>} : vector<18x256xbf16>, vector<256x128xbf16>, vector<18x128xf32> -> vector<18x128xf32>
    %176 = arith.addf %170, %175 : vector<18x128xf32>
    %c0_126 = arith.constant 0 : index
    %c0_127 = arith.constant 0 : index
    %177 = vector.load %arg13[%c0_126, %c0_127] : memref<1x128xf32, #tpu.memory_space<vmem>>, vector<1x128xf32>
    %178 = vector.shape_cast %177 : vector<1x128xf32> to vector<128xf32>
    %179 = vector.shape_cast %178 : vector<128xf32> to vector<1x128xf32>
    %180 = vector.broadcast %179 : vector<1x128xf32> to vector<18x128xf32>
    %181 = arith.addf %176, %180 : vector<18x128xf32>
    %cst_128 = arith.constant 0.000000e+00 : f32
    %182 = vector.broadcast %cst_128 : f32 to vector<18x128xf32>
    %183 = arith.maximumf %181, %182 : vector<18x128xf32>
    %184 = tpu.iota {dimensions = array<i32: 0>} : vector<18x1xi32>
    %c5_i32 = arith.constant 5 : i32
    %185 = arith.addi %0, %c5_i32 : i32
    %c6_i32_129 = arith.constant 6 : i32
    %186 = arith.subi %185, %c6_i32_129 : i32
    %187 = vector.broadcast %186 : i32 to vector<18x1xi32>
    %188 = arith.addi %184, %187 : vector<18x1xi32>
    %c0_i32_130 = arith.constant 0 : i32
    %189 = vector.broadcast %c0_i32_130 : i32 to vector<18x1xi32>
    %190 = arith.cmpi sge, %188, %189 : vector<18x1xi32>
    %c16_i32_131 = arith.constant 16 : i32
    %191 = vector.broadcast %c16_i32_131 : i32 to vector<18x1xi32>
    %192 = arith.cmpi slt, %188, %191 : vector<18x1xi32>
    %193 = arith.andi %190, %192 : vector<18x1xi1>
    %cst_132 = arith.constant 0.000000e+00 : f32
    %194 = vector.shape_cast %193 : vector<18x1xi1> to vector<18x1xi1>
    %195 = vector.broadcast %194 : vector<18x1xi1> to vector<18x128xi1>
    %196 = vector.broadcast %cst_132 : f32 to vector<18x128xf32>
    %197 = arith.select %195, %183, %196 : vector<18x128xi1>, vector<18x128xf32>
    %c0_133 = arith.constant 0 : index
    %c0_134 = arith.constant 0 : index
    %198 = vector.load %arg16[%c0_133, %c0_134] : memref<28x512xf32, #tpu.memory_space<vmem>>, vector<18x128xf32>
    tpu.vector_store %arg16[%c0_133, %c0_134], %197 {strides = array<i32>} : memref<28x512xf32, #tpu.memory_space<vmem>>, vector<18x128xf32>,
    %c0_135 = arith.constant 0 : index
    %c0_136 = arith.constant 0 : index
    %199 = vector.load %arg16[%c0_135, %c0_136] : memref<28x512xf32, #tpu.memory_space<vmem>>, vector<16x128xf32>
    %200 = arith.truncf %199 : vector<16x128xf32> to vector<16x128xbf16>
    %c0_137 = arith.constant 0 : index
    %c0_138 = arith.constant 0 : index
    %c0_139 = arith.constant 0 : index
    %201 = vector.load %arg8[%c0_137, %c0_138, %c0_139] : memref<3x128x128xbf16, #tpu.memory_space<vmem>>, vector<1x128x128xbf16>
    %202 = vector.shape_cast %201 : vector<1x128x128xbf16> to vector<128x128xbf16>
    %cst_140 = arith.constant dense<0.000000e+00> : vector<16x128xf32>
    %203 = tpu.matmul %200, %202, %cst_140 {dimension_numbers = #tpu.dot_dimension_numbers<[1], [0], [0], [1], [0, 0, 1, 1], [], []>} : vector<16x128xbf16>, vector<128x128xbf16>, vector<16x128xf32> -> vector<16x128xf32>
    %c1_141 = arith.constant 1 : index
    %c0_142 = arith.constant 0 : index
    %204 = vector.load %arg16[%c1_141, %c0_142] : memref<28x512xf32, #tpu.memory_space<vmem>>, vector<16x128xf32>
    %205 = arith.truncf %204 : vector<16x128xf32> to vector<16x128xbf16>
    %c1_143 = arith.constant 1 : index
    %c0_144 = arith.constant 0 : index
    %c0_145 = arith.constant 0 : index
    %206 = vector.load %arg8[%c1_143, %c0_144, %c0_145] : memref<3x128x128xbf16, #tpu.memory_space<vmem>>, vector<1x128x128xbf16>
    %207 = vector.shape_cast %206 : vector<1x128x128xbf16> to vector<128x128xbf16>
    %cst_146 = arith.constant dense<0.000000e+00> : vector<16x128xf32>
    %208 = tpu.matmul %205, %207, %cst_146 {dimension_numbers = #tpu.dot_dimension_numbers<[1], [0], [0], [1], [0, 0, 1, 1], [], []>} : vector<16x128xbf16>, vector<128x128xbf16>, vector<16x128xf32> -> vector<16x128xf32>
    %209 = arith.addf %203, %208 : vector<16x128xf32>
    %c2_147 = arith.constant 2 : index
    %c0_148 = arith.constant 0 : index
    %210 = vector.load %arg16[%c2_147, %c0_148] : memref<28x512xf32, #tpu.memory_space<vmem>>, vector<16x128xf32>
    %211 = arith.truncf %210 : vector<16x128xf32> to vector<16x128xbf16>
    %c2_149 = arith.constant 2 : index
    %c0_150 = arith.constant 0 : index
    %c0_151 = arith.constant 0 : index
    %212 = vector.load %arg8[%c2_149, %c0_150, %c0_151] : memref<3x128x128xbf16, #tpu.memory_space<vmem>>, vector<1x128x128xbf16>
    %213 = vector.shape_cast %212 : vector<1x128x128xbf16> to vector<128x128xbf16>
    %cst_152 = arith.constant dense<0.000000e+00> : vector<16x128xf32>
    %214 = tpu.matmul %211, %213, %cst_152 {dimension_numbers = #tpu.dot_dimension_numbers<[1], [0], [0], [1], [0, 0, 1, 1], [], []>} : vector<16x128xbf16>, vector<128x128xbf16>, vector<16x128xf32> -> vector<16x128xf32>
    %215 = arith.addf %209, %214 : vector<16x128xf32>
    %c0_153 = arith.constant 0 : index
    %c0_154 = arith.constant 0 : index
    %216 = vector.load %arg14[%c0_153, %c0_154] : memref<1x128xf32, #tpu.memory_space<vmem>>, vector<1x128xf32>
    %217 = vector.shape_cast %216 : vector<1x128xf32> to vector<128xf32>
    %218 = vector.shape_cast %217 : vector<128xf32> to vector<1x128xf32>
    %219 = vector.broadcast %218 : vector<1x128xf32> to vector<16x128xf32>
    %220 = arith.addf %215, %219 : vector<16x128xf32>
    %221 = math.tanh %220 : vector<16x128xf32>
    %222 = tpu.iota {dimensions = array<i32: 0>} : vector<16x1xi32>
    %c6_i32_155 = arith.constant 6 : i32
    %223 = arith.addi %0, %c6_i32_155 : i32
    %c6_i32_156 = arith.constant 6 : i32
    %224 = arith.subi %223, %c6_i32_156 : i32
    %225 = vector.broadcast %224 : i32 to vector<16x1xi32>
    %226 = arith.addi %222, %225 : vector<16x1xi32>
    %c0_i32_157 = arith.constant 0 : i32
    %227 = vector.broadcast %c0_i32_157 : i32 to vector<16x1xi32>
    %228 = arith.cmpi sge, %226, %227 : vector<16x1xi32>
    %c16_i32_158 = arith.constant 16 : i32
    %229 = vector.broadcast %c16_i32_158 : i32 to vector<16x1xi32>
    %230 = arith.cmpi slt, %226, %229 : vector<16x1xi32>
    %231 = arith.andi %228, %230 : vector<16x1xi1>
    %cst_159 = arith.constant 0.000000e+00 : f32
    %232 = vector.shape_cast %231 : vector<16x1xi1> to vector<16x1xi1>
    %233 = vector.broadcast %232 : vector<16x1xi1> to vector<16x128xi1>
    %234 = vector.broadcast %cst_159 : f32 to vector<16x128xf32>
    %235 = arith.select %233, %221, %234 : vector<16x128xi1>, vector<16x128xf32>
    %c0_160 = arith.constant 0 : index
    %c0_161 = arith.constant 0 : index
    %c0_162 = arith.constant 0 : index
    %c0_163 = arith.constant 0 : index
    %236 = vector.load %arg15[%c0_160, %c0_161, %c0_162, %c0_163] : memref<1x1x16x128xf32, #tpu.memory_space<vmem>>, vector<1x1x16x128xf32>
    %237 = vector.shape_cast %236 : vector<1x1x16x128xf32> to vector<16x128xf32>
    %238 = vector.shape_cast %235 : vector<16x128xf32> to vector<1x1x16x128xf32>
    tpu.vector_store %arg15[%c0_160, %c0_161, %c0_162, %c0_163], %238 {strides = array<i32>} : memref<1x1x16x128xf32, #tpu.memory_space<vmem>>, vector<1x1x16x128xf32>,
    return
  }
  func.func @transform_0(%arg0: i32, %arg1: i32) -> (i32, i32, i32, i32) {
    %c0_i32 = arith.constant 0 : i32
    %c0_i32_0 = arith.constant 0 : i32
    %c0_i32_1 = arith.constant 0 : i32
    return %arg0, %arg1, %c0_i32, %c0_i32_0 : i32, i32, i32, i32
  }
  func.func @transform_1(%arg0: i32, %arg1: i32) -> (i32, i32, i32) {
    %c0_i32 = arith.constant 0 : i32
    %c0_i32_0 = arith.constant 0 : i32
    %c0_i32_1 = arith.constant 0 : i32
    %c0_i32_2 = arith.constant 0 : i32
    return %c0_i32, %c0_i32_0, %c0_i32_1 : i32, i32, i32
  }
  func.func @transform_2(%arg0: i32, %arg1: i32) -> (i32, i32, i32) {
    %c0_i32 = arith.constant 0 : i32
    %c0_i32_0 = arith.constant 0 : i32
    %c0_i32_1 = arith.constant 0 : i32
    %c0_i32_2 = arith.constant 0 : i32
    return %c0_i32, %c0_i32_0, %c0_i32_1 : i32, i32, i32
  }
  func.func @transform_3(%arg0: i32, %arg1: i32) -> (i32, i32, i32) {
    %c0_i32 = arith.constant 0 : i32
    %c0_i32_0 = arith.constant 0 : i32
    %c0_i32_1 = arith.constant 0 : i32
    %c0_i32_2 = arith.constant 0 : i32
    return %c0_i32, %c0_i32_0, %c0_i32_1 : i32, i32, i32
  }
  func.func @transform_4(%arg0: i32, %arg1: i32) -> (i32, i32, i32) {
    %c0_i32 = arith.constant 0 : i32
    %c0_i32_0 = arith.constant 0 : i32
    %c0_i32_1 = arith.constant 0 : i32
    %c0_i32_2 = arith.constant 0 : i32
    return %c0_i32, %c0_i32_0, %c0_i32_1 : i32, i32, i32
  }
  func.func @transform_5(%arg0: i32, %arg1: i32) -> (i32, i32, i32) {
    %c0_i32 = arith.constant 0 : i32
    %c0_i32_0 = arith.constant 0 : i32
    %c0_i32_1 = arith.constant 0 : i32
    %c0_i32_2 = arith.constant 0 : i32
    return %c0_i32, %c0_i32_0, %c0_i32_1 : i32, i32, i32
  }
  func.func @transform_6(%arg0: i32, %arg1: i32) -> (i32, i32, i32) {
    %c0_i32 = arith.constant 0 : i32
    %c0_i32_0 = arith.constant 0 : i32
    %c0_i32_1 = arith.constant 0 : i32
    %c0_i32_2 = arith.constant 0 : i32
    return %c0_i32, %c0_i32_0, %c0_i32_1 : i32, i32, i32
  }
  func.func @transform_7(%arg0: i32, %arg1: i32) -> (i32, i32) {
    %c0_i32 = arith.constant 0 : i32
    %c0_i32_0 = arith.constant 0 : i32
    %c0_i32_1 = arith.constant 0 : i32
    return %c0_i32, %c0_i32_0 : i32, i32
  }
  func.func @transform_8(%arg0: i32, %arg1: i32) -> (i32, i32) {
    %c0_i32 = arith.constant 0 : i32
    %c0_i32_0 = arith.constant 0 : i32
    %c0_i32_1 = arith.constant 0 : i32
    return %c0_i32, %c0_i32_0 : i32, i32
  }
  func.func @transform_9(%arg0: i32, %arg1: i32) -> (i32, i32) {
    %c0_i32 = arith.constant 0 : i32
    %c0_i32_0 = arith.constant 0 : i32
    %c0_i32_1 = arith.constant 0 : i32
    return %c0_i32, %c0_i32_0 : i32, i32
  }
  func.func @transform_10(%arg0: i32, %arg1: i32) -> (i32, i32) {
    %c0_i32 = arith.constant 0 : i32
    %c0_i32_0 = arith.constant 0 : i32
    %c0_i32_1 = arith.constant 0 : i32
    return %c0_i32, %c0_i32_0 : i32, i32
  }
  func.func @transform_11(%arg0: i32, %arg1: i32) -> (i32, i32) {
    %c0_i32 = arith.constant 0 : i32
    %c0_i32_0 = arith.constant 0 : i32
    %c0_i32_1 = arith.constant 0 : i32
    return %c0_i32, %c0_i32_0 : i32, i32
  }
  func.func @transform_12(%arg0: i32, %arg1: i32) -> (i32, i32) {
    %c0_i32 = arith.constant 0 : i32
    %c0_i32_0 = arith.constant 0 : i32
    %c0_i32_1 = arith.constant 0 : i32
    return %c0_i32, %c0_i32_0 : i32, i32
  }
  func.func @transform_13(%arg0: i32, %arg1: i32) -> (i32, i32, i32, i32) {
    %c0_i32 = arith.constant 0 : i32
    %c0_i32_0 = arith.constant 0 : i32
    %c0_i32_1 = arith.constant 0 : i32
    return %arg0, %arg1, %c0_i32, %c0_i32_0 : i32, i32, i32, i32
  }
}

</mosaic_0001>

<bundles_post_ra>
// kernel: _lambda_.1
= control target key start
LH: loop header
LB: loop body
LE: loop exit
PB: predicated region body
PF: predicated region fallthrough
CT: control target
= control target key end

     0   :  { %s9942_s0 = inlined_call_operand.vmem [shape: f32[2,1,28,16], index: 0, kind: input, shape index: {}]   ;;  %s9943_s1 = inlined_call_operand.vmem [shape: bf16[3,16,128], index: 1, kind: input, shape index: {}]   ;;  %s9944_s2 = inlined_call_operand.hbm [shape: bf16[3,128,256], index: 2, kind: input, shape index: {}]   ;;  %s9945_s3 = inlined_call_operand.hbm [shape: bf16[3,256,512], index: 3, kind: input, shape index: {}]   ;;  %s9946_s4 = inlined_call_operand.hbm [shape: bf16[3,512,256], index: 4, kind: input, shape index: {}]   ;;  %s9947_s5 = inlined_call_operand.vmem [shape: bf16[3,256,128], index: 5, kind: input, shape index: {}]   ;;  %s9948_s6 = inlined_call_operand.hbm [shape: bf16[3,128,128], index: 6, kind: input, shape index: {}]   ;;  %s9949_s7 = inlined_call_operand.hbm [shape: f32[1,128], index: 7, kind: input, shape index: {}]   ;;  %s9950_s8 = inlined_call_operand.hbm [shape: f32[1,256], index: 8, kind: input, shape index: {}]   ;;  %s9951_s9 = inlined_call_operand.vmem [shape: f32[1,512], index: 9, kind: input, shape index: {}]   ;;  %s9952_s10 = inlined_call_operand.vmem [shape: f32[1,256], index: 10, kind: input, shape index: {}]   ;;  %s9953_s11 = inlined_call_operand.hbm [shape: f32[1,128], index: 11, kind: input, shape index: {}]   ;;  %s9954_s12 = inlined_call_operand.vmem [shape: f32[1,128], index: 12, kind: input, shape index: {}]   ;;  %s9955_s13 = inlined_call_operand.vmem [shape: f32[2,1,16,128], index: 13, kind: output, shape index: {}]  }
   0x1   :  { %9957 = sst [smem:[#allocation20_spill]] %s9945_s3 }
   0x2   :  { %9958 = sst [smem:[#allocation21_spill]] %s9948_s6 }
   0x3   :  { %9959 = sst [smem:[#allocation22_spill]] %s9954_s12 }
   0x4   :  { %9960 = sst [smem:[#allocation23_spill]] %s9955_s13 }
   0x5   :  { %18 = vsyncpa [#allocation5], 0 }
   0x6   :  { %19 = vsyncpa [#allocation7], 0 }
   0x7   :  { %20 = vsyncpa [#allocation10], 0 }
   0x8   :  { %21 = vsyncpa [#allocation13], 0  ;;  %s8999_s25 = smov 0   ;;  %s9001_s26 = smov 0  }
   0x9   :  { %s9003_s27 = smov 0  }
   0xa LB: > { %9961 = sst [smem:[#allocation19_spill]] %s8912_s27  ;;  %s5859_s14 = sadd.s32 4294967295, %s8912_s27   ;;  %s8912_s27 = sphi %s9003_s27, %s27_s27   ;;  %s8908_s26 = sphi %s9001_s26, %s9977_s26   ;;  %s8904_s25 = sphi %s8999_s25, %s9976_s25  }
   0xb   : > { %s9962_s3 = sld [smem:[#allocation20_spill]]  ;;  %p5861_p0 = scmp.ge.s32.totalorder %s8912_s27, 1 }
   0xc   : > { %p352_p1 = scmp.lt.s32.totalorder %s8912_s27, 3  ;;  %p9020_p2 = scmp.eq.s32.totalorder %s5859_s14, 0 }
   0xd   : > { %s8914_s17 = smov [#allocation6]   ;;  %s9965_s6 = sld [smem:[#allocation21_spill]] }
   0xe   : > { %p9024_p3 = pnand %p5861_p0, %p352_p1  ;;  %s382_s18 = sshll.u32 %s8914_s17, 4  ;;  %s383_s18 = int_to_ptr.vmem [resolvable:$true] %s382_s18 }
   0xf   : > { %s8915_s23 = smov [#allocation9]   ;;  %s8916_s28 = smov 256  }
  0x10   : > { %p8523_p4 = pneg %p9024_p3  ;;  %s413_s24 = sshll.u32 %s8915_s23, 4  ;;  %s414_s24 = int_to_ptr.vmem [resolvable:$true] %s413_s24 }
  0x11   : > { %s380_s30 = sshll.u32 %s9962_s3, 4  ;;  %s8917_s29 = smov 16   ;;  %s381_s30 = int_to_ptr.hbm [resolvable:$true] %s380_s30 }
  0x12   : > { %p9035_p5 = pnand %p9020_p2, %p8523_p4  ;;  %s438_s19 = sshll.u32 %s9950_s8, 4  ;;  %s439_s19 = int_to_ptr.hbm [resolvable:$true] %s438_s19 }
  0x13   : > { %s411_s21 = sshll.u32 %s9965_s6, 4  ;;  %s8918_s20 = smov 64   ;;  %s412_s21 = int_to_ptr.hbm [resolvable:$true] %s411_s21 }
  0x14   : > { %8529 = dma.hbm_to_vmem [thread:$0]  (!%p9035_p5), %s381_s30, 24576, %s383_s18, [#allocation7], %s8916_s28, %s8916_s28, %s8917_s29  }
  0x15   : > { %s8919_s3 = smov 4   ;;  %s8920_s6 = smov [#allocation12]  }
  0x16   : > { %8535 = dma.hbm_to_vmem [thread:$0]  (!%p9035_p5), %s412_s21, 3072, %s414_s24, [#allocation10], %s8918_s20, %s8918_s20, %s8919_s3  }
  0x17   : > { %s440_s27 = sshll.u32 %s8920_s6, 4  ;;  %s39_s23 = sadd.s32 1, %s8908_s26  ;;  %s441_s27 = int_to_ptr.vmem [resolvable:$true] %s440_s27 }
  0x18   : > { %8541 = dma.hbm_to_vmem [thread:$0]  (!%p9035_p5), %s439_s19, 32, %s441_s27, [#allocation13]  }
  0x19   : > { %s366_s30 = sshll.u32 %s9944_s2, 4  ;;  %p41_p6 = scmp.ge.s32.totalorder %s39_s23, 2  ;;  %s367_s30 = int_to_ptr.hbm [resolvable:$true] %s366_s30 }
  0x1a   : > { %s8921_s18 = smov [#allocation4]   ;;  %s394_s6 = sshll.u32 %s9946_s4, 4  ;;  %s395_s6 = int_to_ptr.hbm [resolvable:$true] %s394_s6 }
  0x1b   : > { %s9979_s23 = smov (%p41_p6, %s39_s23), 0  ;;  %s368_s28 = sshll.u32 %s8921_s18, 4  ;;  %s369_s28 = int_to_ptr.vmem [resolvable:$true] %s368_s28 }
  0x1c   : > { %s8922_s24 = smov 128   ;;  %s8923_s27 = smov 8  }
  0x1d   : > { %8526 = dma.hbm_to_vmem [thread:$0]  (!%p9035_p5), %s367_s30, 6144, %s369_s28, [#allocation5], %s8922_s24, %s8922_s24, %s8923_s27  }
  0x1e   : > { %s8924_s12 = smov [#allocation8]   ;;  %s426_s17 = sshll.u32 %s9949_s7, 4  ;;  %s427_s17 = int_to_ptr.hbm [resolvable:$true] %s426_s17 }
  0x1f   : > { %s396_s13 = sshll.u32 %s8924_s12, 4  ;;  %s456_s18 = sshll.u32 %s9953_s11, 4  ;;  %s397_s13 = int_to_ptr.vmem [resolvable:$true] %s396_s13  ;;  %s457_s18 = int_to_ptr.hbm [resolvable:$true] %s456_s18 }
  0x20   : > { %8532 = dma.hbm_to_vmem [thread:$0]  (!%p9035_p5), %s395_s6, 24576, %s397_s13, [#allocation7], %s8922_s24, %s8922_s24, %s8923_s27  }
  0x21   : > { %s8925_s3 = smov [#allocation11]   ;;  %s8926_s30 = smov [#allocation14]  }
  0x22   : > { %s428_s21 = sshll.u32 %s8925_s3, 4  ;;  %s458_s28 = sshll.u32 %s8926_s30, 4  ;;  %s429_s21 = int_to_ptr.vmem [resolvable:$true] %s428_s21  ;;  %s459_s28 = int_to_ptr.vmem [resolvable:$true] %s458_s28 }
  0x23   : > { %8538 = dma.hbm_to_vmem [thread:$0]  (!%p9035_p5), %s427_s17, 16, %s429_s21, [#allocation10]  }
  0x24   : > { %8544 = dma.hbm_to_vmem [thread:$0]  (!%p9035_p5), %s457_s18, 16, %s459_s28, [#allocation13]  }
  0x25   : > { %486 = sbr.rel (%p9024_p3) target bundleno = 1442 (0x5a2), region = 72 }
  0x2a   : > { %8887 = dma.done.wait (%p9020_p2), [#allocation5], 6144  }
  0x2b   : > { %8889 = vsyncadd (%p9020_p2), [#allocation5], 4294961152 }
  0x2c   : > { %8891 = dma.done.wait (%p9020_p2), [#allocation7], 49152  }
  0x2d   : > { %8893 = vsyncadd (%p9020_p2), [#allocation7], 4294918144 }
  0x2e   : > { %8895 = dma.done.wait (%p9020_p2), [#allocation10], 3088  }
  0x2f   : > { %8897 = vsyncadd (%p9020_p2), [#allocation10], 4294964208 }
  0x30   : > { %8899 = dma.done.wait (%p9020_p2), [#allocation13], 48  }
  0x31   : > { %8901 = vsyncadd (%p9020_p2), [#allocation13], 4294967248  ;;  %p569_p7 = scmp.lt.s32.totalorder %s8904_s25, 1  ;;  %v7989_v0 = vld [vmem:[%s9943_s1 + $0x8] sm:$0xff]  ;;  %v7988_v1 = vld [vmem:[%s9943_s1] sm:$0xff]  ;;  %vm612_vm0 = vcmask 130048  }
  0x32   : > { %v7990_v2 = vld [vmem:[%s9943_s1 + $0x10] sm:$0xff]  ;;  %626 = vmatpush.bf16.msra.mxu0 %v7989_v0  ;;  %657 = vmatpush.bf16.msra.mxu1 %v7988_v1  ;;  %v8006_v22 = vld [vmem:[#allocation4 + $0x74] sm:$0xf0]  ;;  %v6028_v25 = vld [vmem:[#allocation4 + $0x78] sm:$0xf0]  ;;  %vm8928_vm2 = vmmov 1  }
  0x33   : > { %s9981_s25 = smov (!%p569_p7, %s8904_s25), 1  ;;  %697 = vmatpush.bf16.msra.mxu2 %v7990_v2  ;;  %v6026_v21 = vld [vmem:[#allocation4 + $0x70] sm:$0xf]  ;;  %v8005_v23 = vld [vmem:[#allocation4 + $0x74] sm:$0xf]  ;;  %vm1079_vm7 = vcmask 1046528  }
  0x34   : > { %s7986_s16 = sshll.u32 %s9981_s25, 5  ;;  %v6027_v24 = vor.u32 %v8006_v22, %v6026_v21  ;;  %v6031_v26 = vor.u32 %v8005_v23, %v6028_v25  ;;  %v6018_v27 = vld [vmem:[#allocation4 + $0x60] sm:$0xf]  ;;  %v8004_v28 = vld [vmem:[#allocation4 + $0x64] sm:$0xf0]  ;;  %s9973_s27 = sld [smem:[#allocation22_spill]] }
  0x35   : > { %s577_s24 = scalar_lea.vmem %s9942_s0, %s7986_s16  ;;  %v8003_v29 = vld [vmem:[#allocation4 + $0x64] sm:$0xf]  ;;  %v6019_v30 = vor.u32 %v8004_v28, %v6018_v27  ;;  %v6020_v31 = vld [vmem:[#allocation4 + $0x68] sm:$0xf0]  ;;  %v6010_v33 = vld [vmem:[#allocation4 + $0x50] sm:$0xf] }
  0x36   : > { %v597_v3 = vld [vmem:[%s577_s24 + $0x1] sm:$0xff]  ;;  %v598_v4 = vld [vmem:[%s577_s24 + $0x9] sm:$0xff]  ;;  %v599_v12 = vld [vmem:[%s577_s24 + $0x11] sm:$0xff]  ;;  %1020 = vmatpush.bf16.msrb.mxu1 %v6027_v24  ;;  %v6023_v32 = vor.u32 %v8003_v29, %v6020_v31  ;;  %vm806_vm5 = vsmask.f32 7424  ;;  %s7987_s12 = sshll.u32 %s9981_s25, 4 }
  0x37   : > { %v589_v5 = vld [vmem:[%s577_s24] sm:$0xff]  ;;  %v601_v6 = vpack.c.bf16 %v598_v4, %v597_v3  ;;  %v590_v7 = vld [vmem:[%s577_s24 + $0x8] sm:$0xff]  ;;  %v600_v13 = vld [vmem:[%s577_s24 + $0x19] sm:$0x3]  ;;  %1038 = vmatpush.bf16.msrb.mxu2 %v6031_v26  ;;  %s9974_s15 = sld [smem:[#allocation23_spill]] }
  0x38   : > { %v669_v8 = vld [vmem:[%s577_s24 + $0x2] sm:$0xff]  ;;  %v670_v9 = vld [vmem:[%s577_s24 + $0xa] sm:$0xff]  ;;  %v593_v10 = vpack.c.bf16 %v590_v7, %v589_v5  ;;  %v592_v15 = vld [vmem:[%s577_s24 + $0x18] sm:$0x3]  ;;  %v602_v18 = vpack.c.bf16 %v600_v13, %v599_v12 }
  0x39   : > { %v673_v11 = vpack.c.bf16 %v670_v9, %v669_v8  ;;  %5888 = vmatmul.msk.bf16.vlgmr.msra.gmra.mxu0 %vm612_vm0, %v601_v6  ;;  %v591_v14 = vld [vmem:[%s577_s24 + $0x10] sm:$0xff]  ;;  %v672_v17 = vld [vmem:[%s577_s24 + $0x1a] sm:$0x3]  ;;  %v6012_v37 = vld [vmem:[#allocation4 + $0x58] sm:$0xf0] }
  0x3a   : > { %5894 = vmatmul.msk.bf16.vlgmr.msra.gmra.mxu1 %vm612_vm0, %v593_v10  ;;  %v671_v16 = vld [vmem:[%s577_s24 + $0x12] sm:$0xff]  ;;  %v594_v19 = vpack.c.bf16 %v592_v15, %v591_v14  ;;  %v6002_v39 = vld [vmem:[#allocation4 + $0x40] sm:$0xf]  ;;  %v8000_v40 = vld [vmem:[#allocation4 + $0x44] sm:$0xf0] }
  0x3b   : > { %5902 = vmatmul.msk.bf16.vlgmr.msra.gmra.mxu2 %vm612_vm0, %v673_v11  ;;  %v674_v20 = vpack.c.bf16 %v672_v17, %v671_v16  ;;  %1021 = vmatpush.bf16.msrb.mxu1 %v6019_v30  ;;  %v8002_v34 = vld [vmem:[#allocation4 + $0x54] sm:$0xf0]  ;;  %v8001_v35 = vld [vmem:[#allocation4 + $0x54] sm:$0xf]  ;;  %v7999_v41 = vld [vmem:[#allocation4 + $0x44] sm:$0xf]  ;;  %v6003_v42 = vor.u32 %v8000_v40, %v6002_v39 }
  0x3c   : > { %1039 = vmatpush.bf16.msrb.mxu2 %v6023_v32  ;;  %v6011_v36 = vor.u32 %v8002_v34, %v6010_v33  ;;  %v6015_v38 = vor.u32 %v8001_v35, %v6012_v37  ;;  %v6004_v43 = vld [vmem:[#allocation4 + $0x48] sm:$0xf0]  ;;  %v8021_v45 = vld [vmem:[#allocation4 + $0xf4] sm:$0xf]  ;;  %v5964_v46 = vld [vmem:[#allocation4 + $0xf8] sm:$0xf0] }
  0x3d   : > { %v6007_v44 = vor.u32 %v7999_v41, %v6004_v43  ;;  %v5962_v47 = vld [vmem:[#allocation4 + $0xf0] sm:$0xf]  ;;  %v5967_v48 = vor.u32 %v8021_v45, %v5964_v46  ;;  %v8022_v49 = vld [vmem:[#allocation4 + $0xf4] sm:$0xf0]  ;;  %v7997_v53 = vld [vmem:[#allocation4 + $0x34] sm:$0xf]  ;;  %s586_s14 = scalar_lea.vmem %s9974_s15, %s7987_s12 }
  0x3e   : > { %v5963_v50 = vor.u32 %v8022_v49, %v5962_v47  ;;  %v5994_v51 = vld [vmem:[#allocation4 + $0x30] sm:$0xf]  ;;  %v7998_v52 = vld [vmem:[#allocation4 + $0x34] sm:$0xf0]  ;;  %v5996_v55 = vld [vmem:[#allocation4 + $0x38] sm:$0xf0] }
  0x3f   : > { %1022 = vmatpush.bf16.msrb.mxu1 %v6011_v36  ;;  %922 = vmatpush.bf16.msrb.mxu0 %v5967_v48  ;;  %v5995_v54 = vor.u32 %v7998_v52, %v5994_v51  ;;  %v5999_v56 = vor.u32 %v7997_v53, %v5996_v55  ;;  %v8019_v57 = vld [vmem:[#allocation4 + $0xe4] sm:$0xf]  ;;  %v5956_v58 = vld [vmem:[#allocation4 + $0xe8] sm:$0xf0]  ;;  %v5954_v60 = vld [vmem:[#allocation4 + $0xe0] sm:$0xf]  ;;  %v725_v48 = vlaneseq }
  0x40   : > { %1040 = vmatpush.bf16.msrb.mxu2 %v6015_v38  ;;  %904 = vmatpush.bf16.msra.mxu3 %v5963_v50  ;;  %v5959_v59 = vor.u32 %v8019_v57, %v5956_v58  ;;  %v8020_v61 = vld [vmem:[#allocation4 + $0xe4] sm:$0xf0]  ;;  %v5986_v63 = vld [vmem:[#allocation4 + $0x20] sm:$0xf]  ;;  %v7995_v1 = vld [vmem:[#allocation4 + $0x24] sm:$0xf] }
  0x41   : > { %v5955_v62 = vor.u32 %v8020_v61, %v5954_v60  ;;  %v7996_v0 = vld [vmem:[#allocation4 + $0x24] sm:$0xf0]  ;;  %v5988_v3 = vld [vmem:[#allocation4 + $0x28] sm:$0xf0]  ;;  %v8017_v5 = vld [vmem:[#allocation4 + $0xd4] sm:$0xf] }
  0x42   : > { %v5987_v2 = vor.u32 %v7996_v0, %v5986_v63  ;;  %v5991_v4 = vor.u32 %v7995_v1, %v5988_v3  ;;  %v5948_v6 = vld [vmem:[#allocation4 + $0xd8] sm:$0xf0]  ;;  %v5946_v7 = vld [vmem:[#allocation4 + $0xd0] sm:$0xf]  ;;  %v8018_v9 = vld [vmem:[#allocation4 + $0xd4] sm:$0xf0] }
  0x43   : > { %1023 = vmatpush.bf16.msrb.mxu1 %v6003_v42  ;;  %923 = vmatpush.bf16.msrb.mxu0 %v5959_v59  ;;  %v5951_v8 = vor.u32 %v8017_v5, %v5948_v6  ;;  %v5947_v10 = vor.u32 %v8018_v9, %v5946_v7  ;;  %v5978_v11 = vld [vmem:[#allocation4 + $0x10] sm:$0xf]  ;;  %v7994_v12 = vld [vmem:[#allocation4 + $0x14] sm:$0xf0]  ;;  %v7993_v13 = vld [vmem:[#allocation4 + $0x14] sm:$0xf] }
  0x44   : > { %1041 = vmatpush.bf16.msrb.mxu2 %v6007_v44  ;;  %905 = vmatpush.bf16.msra.mxu3 %v5955_v62  ;;  %v5979_v14 = vor.u32 %v7994_v12, %v5978_v11  ;;  %v5980_v15 = vld [vmem:[#allocation4 + $0x18] sm:$0xf0]  ;;  %v8015_v17 = vld [vmem:[#allocation4 + $0xc4] sm:$0xf]  ;;  %v8016_v21 = vld [vmem:[#allocation4 + $0xc4] sm:$0xf0] }
  0x45   : > { %v5983_v16 = vor.u32 %v7993_v13, %v5980_v15  ;;  %v5970_v23 = vld [vmem:[#allocation4] sm:$0xf]  ;;  %v7992_v24 = vld [vmem:[#allocation4 + $0x4] sm:$0xf0]  ;;  %v7991_v25 = vld [vmem:[#allocation4 + $0x4] sm:$0xf] }
  0x46   : > { %v5971_v26 = vor.u32 %v7992_v24, %v5970_v23  ;;  %v5972_v27 = vld [vmem:[#allocation4 + $0x8] sm:$0xf0]  ;;  %v8013_v29 = vld [vmem:[#allocation4 + $0xb4] sm:$0xf]  ;;  %v5932_v30 = vld [vmem:[#allocation4 + $0xb8] sm:$0xf0] }
  0x47   : > { %1024 = vmatpush.bf16.msrb.mxu1 %v5995_v54  ;;  %924 = vmatpush.bf16.msrb.mxu0 %v5951_v8  ;;  %v5975_v28 = vor.u32 %v7991_v25, %v5972_v27  ;;  %v5930_v31 = vld [vmem:[#allocation4 + $0xb0] sm:$0xf]  ;;  %v5935_v32 = vor.u32 %v8013_v29, %v5932_v30  ;;  %v8014_v33 = vld [vmem:[#allocation4 + $0xb4] sm:$0xf0]  ;;  %v8927_v35 = vmov 0.0   ;;  %v9112_v57 = vshrl.u32 %v725_v48, 7 }
  0x48   : > { %1042 = vmatpush.bf16.msrb.mxu2 %v5999_v56  ;;  %906 = vmatpush.bf16.msra.mxu3 %v5947_v10  ;;  %v5931_v34 = vor.u32 %v8014_v33, %v5930_v31  ;;  %763 = vst [vmem:[#allocation2 + $0x60] sm:$0x3] %v8927_v35  ;;  %v8011_v36 = vld [vmem:[#allocation4 + $0xa4] sm:$0xf]  ;;  %v5924_v37 = vld [vmem:[#allocation4 + $0xa8] sm:$0xf0] }
  0x49   : > { %5889 = vmatmul.msk.bf16.gmra.mxu0 %vm612_vm0, %v602_v18  ;;  %v5940_v18 = vld [vmem:[#allocation4 + $0xc8] sm:$0xf0]  ;;  %v5922_v38 = vld [vmem:[#allocation4 + $0xa0] sm:$0xf]  ;;  %v5927_v39 = vor.u32 %v8011_v36, %v5924_v37  ;;  %v8012_v40 = vld [vmem:[#allocation4 + $0xa4] sm:$0xf0] }
  0x4a   : > { %5895 = vmatmul.msk.bf16.gmra.mxu1 %vm612_vm0, %v594_v19  ;;  %v5938_v19 = vld [vmem:[#allocation4 + $0xc0] sm:$0xf]  ;;  %v5923_v41 = vor.u32 %v8012_v40, %v5922_v38  ;;  %v8009_v42 = vld [vmem:[#allocation4 + $0x94] sm:$0xf]  ;;  %v5916_v43 = vld [vmem:[#allocation4 + $0x98] sm:$0xf0] }
  0x4b   : > { %5903 = vmatmul.msk.bf16.gmra.mxu2 %vm612_vm0, %v674_v20  ;;  %1025 = vmatpush.bf16.msrb.mxu1 %v5987_v2  ;;  %v5943_v20 = vor.u32 %v8015_v17, %v5940_v18  ;;  %v5939_v22 = vor.u32 %v8016_v21, %v5938_v19  ;;  %v5914_v44 = vld [vmem:[#allocation4 + $0x90] sm:$0xf]  ;;  %v5919_v45 = vor.u32 %v8009_v42, %v5916_v43  ;;  %v8010_v46 = vld [vmem:[#allocation4 + $0x94] sm:$0xf0]  ;;  %v8007_v49 = vld [vmem:[#allocation4 + $0x84] sm:$0xf] }
  0x4c   : > { %1043 = vmatpush.bf16.msrb.mxu2 %v5991_v4  ;;  %v5915_v47 = vor.u32 %v8010_v46, %v5914_v44  ;;  %v5908_v50 = vld [vmem:[#allocation4 + $0x88] sm:$0xf0]  ;;  %v5906_v51 = vld [vmem:[#allocation4 + $0x80] sm:$0xf]  ;;  %v8008_v55 = vld [vmem:[#allocation4 + $0x84] sm:$0xf0] }
  0x4d   : > { %925 = vmatpush.bf16.msrb.mxu0 %v5943_v20  ;;  %907 = vmatpush.bf16.msra.mxu3 %v5939_v22  ;;  %v5911_v54 = vor.u32 %v8007_v49, %v5908_v50  ;;  %v5907_v56 = vor.u32 %v8008_v55, %v5906_v51  ;;  %v6090_v59 = vld [vmem:[#allocation4 + $0x170] sm:$0xf]  ;;  %v8038_v60 = vld [vmem:[#allocation4 + $0x174] sm:$0xf0]  ;;  %v8037_v61 = vld [vmem:[#allocation4 + $0x174] sm:$0xf] }
  0x4e   : > { %v6091_v62 = vor.u32 %v8038_v60, %v6090_v59  ;;  %v6092_v63 = vld [vmem:[#allocation4 + $0x178] sm:$0xf0]  ;;  %v9114_v0 = vld [vmem:[#allocation11] ss:$0 sm:$0xff]  ;;  %v9117_v3 = vadd.s32 4294967291, %v9112_v57 }
  0x4f   : > { %1026 = vmatpush.bf16.msrb.mxu1 %v5979_v14  ;;  %v6095_v1 = vor.u32 %v8037_v61, %v6092_v63  ;;  %v6082_v7 = vld [vmem:[#allocation4 + $0x160] sm:$0xf]  ;;  %v8036_v8 = vld [vmem:[#allocation4 + $0x164] sm:$0xf0]  ;;  %v8035_v9 = vld [vmem:[#allocation4 + $0x164] sm:$0xf] }
  0x50   : > { %1044 = vmatpush.bf16.msrb.mxu2 %v5983_v16  ;;  %v6083_v10 = vor.u32 %v8036_v8, %v6082_v7  ;;  %v6084_v11 = vld [vmem:[#allocation4 + $0x168] sm:$0xf0]  ;;  %v6074_v12 = vld [vmem:[#allocation4 + $0x150] sm:$0xf]  ;;  %v8034_v13 = vld [vmem:[#allocation4 + $0x154] sm:$0xf0] }
  0x51   : > { %926 = vmatpush.bf16.msrb.mxu0 %v5935_v32  ;;  %908 = vmatpush.bf16.msra.mxu3 %v5931_v34  ;;  %v6087_v15 = vor.u32 %v8035_v9, %v6084_v11  ;;  %v8033_v16 = vld [vmem:[#allocation4 + $0x154] sm:$0xf]  ;;  %v6076_v17 = vld [vmem:[#allocation4 + $0x158] sm:$0xf0]  ;;  %vm736_vm1 = vcmp.ge.s32.totalorder %v9117_v3, 0  ;;  %v6075_v18 = vor.u32 %v8034_v13, %v6074_v12  ;;  %v9125_v34 = vadd.s32 16, %v9112_v57 }
  0x52   : > { %v6079_v20 = vor.u32 %v8033_v16, %v6076_v17  ;;  %v6066_v21 = vld [vmem:[#allocation4 + $0x140] sm:$0xf]  ;;  %v8032_v22 = vld [vmem:[#allocation4 + $0x144] sm:$0xf0]  ;;  %v8031_v23 = vld [vmem:[#allocation4 + $0x144] sm:$0xf] }
  0x53   : > { %1027 = vmatpush.bf16.msrb.mxu1 %v5971_v26  ;;  %v6068_v24 = vld [vmem:[#allocation4 + $0x148] sm:$0xf0]  ;;  %v6058_v37 = vld [vmem:[#allocation4 + $0x130] sm:$0xf]  ;;  %v8030_v38 = vld [vmem:[#allocation4 + $0x134] sm:$0xf0] }
  0x54   : > { %1045 = vmatpush.bf16.msrb.mxu2 %v5975_v28  ;;  %v6067_v28 = vor.u32 %v8032_v22, %v6066_v21  ;;  %v6071_v32 = vor.u32 %v8031_v23, %v6068_v24  ;;  %v8029_v40 = vld [vmem:[#allocation4 + $0x134] sm:$0xf]  ;;  %v6050_v44 = vld [vmem:[#allocation4 + $0x120] sm:$0xf]  ;;  %v8027_v50 = vld [vmem:[#allocation4 + $0x124] sm:$0xf] }
  0x55   : > { %927 = vmatpush.bf16.msrb.mxu0 %v5927_v39  ;;  %909 = vmatpush.bf16.msra.mxu3 %v5923_v41  ;;  %v6059_v39 = vor.u32 %v8030_v38, %v6058_v37  ;;  %v6060_v41 = vld [vmem:[#allocation4 + $0x138] sm:$0xf0]  ;;  %v6052_v51 = vld [vmem:[#allocation4 + $0x128] sm:$0xf0]  ;;  %vm8607_vm3 = vmpackc.low %vm8928_vm2, %vm736_vm1 }
  0x56   : > { %v6063_v43 = vor.u32 %v8029_v40, %v6060_v41  ;;  %v6055_v59 = vor.u32 %v8027_v50, %v6052_v51  ;;  %v8025_v61 = vld [vmem:[#allocation4 + $0x114] sm:$0xf]  ;;  %v786_v63 = vld [vmem:[#allocation2 + $0x60] sm:$0x1]  ;;  %v8023_v8 = vld [vmem:[#allocation4 + $0x104] sm:$0xf] }
  0x57   : > { %v6036_v9 = vld [vmem:[#allocation4 + $0x108] sm:$0xf0]  ;;  %v1057_v22 = vld [vmem:[#allocation2 + $0x60] sm:$0x3]  ;;  %v8165_v40 = vld [vmem:[#allocation6 + $0x3ec] sm:$0xf0] }
  0x58   : > { %v8163_v41 = vld [vmem:[#allocation6 + $0x3e4] sm:$0xf]  ;;  %v6324_v51 = vld [vmem:[#allocation6 + $0x3d0] sm:$0xf0] }
  0x59   : > { %928 = vmatpush.bf16.msrb.mxu0 %v5919_v45  ;;  %910 = vmatpush.bf16.msra.mxu3 %v5915_v47  ;;  %v8028_v45 = vld [vmem:[#allocation4 + $0x124] sm:$0xf0]  ;;  %v734_v47 = vadd.s32 4294967291, %v9125_v34 }
  0x5a   : > { %v6051_v49 = vor.u32 %v8028_v45, %v6050_v44  ;;  %v6340_v44 = vld [vmem:[#allocation6 + $0x3f0] sm:$0xf0] }
  0x5b   : > { %vm742_vm4 = vcmp.lt.s32.totalorder %v734_v47, 16  ;;  %v6343_v45 = vor.u32 %v8163_v41, %v6340_v44  ;;  %v8161_v47 = vld [vmem:[#allocation6 + $0x3cc] sm:$0xf0]  ;;  %v8119_v44 = vld [vmem:[#allocation6 + $0x284] sm:$0xf] }
  0x5c   : > { %vm8613_vm6 = vmpackc.low %vm742_vm4, %vm742_vm4 }
  0x5d   : > { %929 = vmatpush.bf16.msrb.mxu0 %v5911_v54  ;;  %911 = vmatpush.bf16.msra.mxu3 %v5907_v56  ;;  %v6042_v56 = vld [vmem:[#allocation4 + $0x110] sm:$0xf] }
  0x61   : > { %1165 = vmatpush.bf16.msrb.mxu3 %v6091_v62  ;;  %1183 = vmatpush.bf16.msra.mxu0 %v6095_v1  ;;  %v6044_v62 = vld [vmem:[#allocation4 + $0x118] sm:$0xf0] }
  0x65   : > { %1166 = vmatpush.bf16.msrb.mxu3 %v6083_v10  ;;  %1184 = vmatpush.bf16.msra.mxu0 %v6087_v15  ;;  %v6039_v15 = vor.u32 %v8023_v8, %v6036_v9  ;;  %v6196_v9 = vld [vmem:[#allocation6 + $0x2d0] sm:$0xf0] }
  0x69   : > { %1167 = vmatpush.bf16.msrb.mxu3 %v6075_v18  ;;  %1185 = vmatpush.bf16.msra.mxu0 %v6079_v20 }
  0x6d   : > { %1168 = vmatpush.bf16.msrb.mxu3 %v6067_v28  ;;  %1186 = vmatpush.bf16.msra.mxu0 %v6071_v32 }
  0x71   : > { %1169 = vmatpush.bf16.msrb.mxu3 %v6059_v39  ;;  %1187 = vmatpush.bf16.msra.mxu0 %v6063_v43  ;;  %v6338_v39 = vld [vmem:[#allocation6 + $0x3e0] sm:$0xf] }
  0x72   : > { %v6339_v43 = vor.u32 %v8165_v40, %v6338_v39  ;;  %v6276_v40 = vld [vmem:[#allocation6 + $0x370] sm:$0xf0] }
  0x74   : > { %1776 = vmatpush.bf16.msra.mxu2 %v6339_v43  ;;  %v8121_v43 = vld [vmem:[#allocation6 + $0x28c] sm:$0xf0] }
  0x75   : > { %1170 = vmatpush.bf16.msrb.mxu3 %v6051_v49  ;;  %1188 = vmatpush.bf16.msra.mxu0 %v6055_v59 }
  0xb6   : > { %v628_v52 = vpop.f32.mrf.mxu0 }
  0xb7   : > { %v659_v53 = vpop.f32.mrf.mxu1 }
  0xb8   : > { %v660_v58 = vadd.f32 %v659_v53, %v628_v52 }
  0xbe   : > { %v699_v2 = vpop.f32.mrf.mxu2  ;;  %v630_v5 = vpop.f32.mrf.mxu0 }
  0xbf   : > { %v709_v4 = vadd.f32 %v699_v2, %v660_v58  ;;  %v661_v6 = vpop.f32.mrf.mxu1  ;;  %v8026_v58 = vld [vmem:[#allocation4 + $0x114] sm:$0xf0] }
  0xc0   : > { %v662_v26 = vadd.f32 %v661_v6, %v630_v5  ;;  %v6043_v2 = vor.u32 %v8026_v58, %v6042_v56  ;;  %v8024_v5 = vld [vmem:[#allocation4 + $0x104] sm:$0xf0]  ;;  %v6047_v6 = vor.u32 %v8025_v61, %v6044_v62  ;;  %v8131_v56 = vld [vmem:[#allocation6 + $0x2e4] sm:$0xf]  ;;  %v6212_v58 = vld [vmem:[#allocation6 + $0x2f0] sm:$0xf0] }
  0xc1   : > { %v717_v14 = vadd.f32 %v9114_v0, %v709_v4  ;;  %v6034_v4 = vld [vmem:[#allocation4 + $0x100] sm:$0xf]  ;;  %v6215_v61 = vor.u32 %v8131_v56, %v6212_v58  ;;  %v8117_v58 = vld [vmem:[#allocation6 + $0x26c] sm:$0xf0] }
  0xc2   : > { %1171 = vmatpush.bf16.msrb.mxu3 %v6043_v2  ;;  %v6035_v12 = vor.u32 %v8024_v5, %v6034_v4  ;;  %1189 = vmatpush.bf16.msra.mxu0 %v6047_v6  ;;  %v6306_v62 = vld [vmem:[#allocation6 + $0x3a0] sm:$0xf]  ;;  %v8129_v6 = vld [vmem:[#allocation6 + $0x2cc] sm:$0xf0] }
  0xc3   : > { %v721_v19 = vmax.f32 %v717_v14, 0.0  ;;  %v6194_v5 = vld [vmem:[#allocation6 + $0x2c0] sm:$0xf] }
  0xc4   : > { %v6195_v8 = vor.u32 %v8129_v6, %v6194_v5  ;;  %v6146_v56 = vld [vmem:[#allocation6 + $0x260] sm:$0xf]  ;;  %v8141_v5 = vld [vmem:[#allocation6 + $0x32c] sm:$0xf0]  ;;  %v8139_v6 = vld [vmem:[#allocation6 + $0x324] sm:$0xf] }
  0xc5   : > { %v756_v25 = vsel %vm736_vm1, %v721_v19, 0.0 }
  0xc6   : > { %760 = vst [vmem:[#allocation2 + $0x18] sm:$0xff] %v756_v25  ;;  %v701_v27 = vpop.f32.mrf.mxu2  ;;  %v633_v30 = vpop.f32.mrf.mxu0  ;;  %1172 = vmatpush.bf16.msrb.mxu3 %v6035_v12  ;;  %1190 = vmatpush.bf16.msra.mxu0 %v6039_v15  ;;  %v6292_v15 = vld [vmem:[#allocation6 + $0x390] sm:$0xf0] }
  0xc7   : > { %v710_v29 = vadd.f32 %v701_v27, %v662_v26  ;;  %v664_v31 = vpop.f32.mrf.mxu1 }
  0xc8   : > { %v665_v36 = vadd.f32 %v664_v31, %v633_v30 }
  0xc9   : > { %v718_v33 = vadd.f32 %v9114_v0, %v710_v29 }
  0xcb   : > { %v9127_v35 = vmax.f32 %v718_v33, 0.0 }
  0xcd   : > { %v785_v42 = vld [vmem:[#allocation2 + $0x18] sm:$0xfe]  ;;  %v8608_v55 = vpack.c.bf16 %v9127_v35, %v721_v19 }
  0xce   : > { %v704_v46 = vpop.f32.mrf.mxu2  ;;  %v787_v48 = vpack.c.bf16 %v9127_v35, %v785_v42  ;;  %v635_v53 = vpop.f32.mrf.mxu0  ;;  %v1056_v23 = vld [vmem:[#allocation2 + $0x18] sm:$0xfc] }
  0xcf   : > { %v711_v52 = vadd.f32 %v704_v46, %v665_v36  ;;  %v666_v54 = vpop.f32.mrf.mxu1  ;;  %8609 = vmatmul.msk.bf16.vlgmr.msrb.gmra.mxu1 %vm8607_vm3, %v8608_v55  ;;  %8612 = vmatmul.msk.bf16.vlgmr.msrb.gmra.mxu2 %vm8607_vm3, %v8608_v55  ;;  %v1058_v25 = vpack.c.bf16 %v9127_v35, %v1056_v23  ;;  %v6322_v46 = vld [vmem:[#allocation6 + $0x3c0] sm:$0xf]  ;;  %v8133_v53 = vld [vmem:[#allocation6 + $0x2ec] sm:$0xf0]  ;;  %v8123_v23 = vld [vmem:[#allocation6 + $0x2a4] sm:$0xf] }
  0xd0   : > { %v810_v1 = vshll.u32 %v787_v48, 16  ;;  %v808_v13 = vshrl.u32 %v787_v48, 16  ;;  %v8159_v48 = vld [vmem:[#allocation6 + $0x3c4] sm:$0xf]  ;;  %v6323_v50 = vor.u32 %v8161_v47, %v6322_v46  ;;  %v6164_v47 = vld [vmem:[#allocation6 + $0x290] sm:$0xf0] }
  0xd1   : > { %v719_v60 = vadd.f32 %v9114_v0, %v711_v52  ;;  %v1080_v27 = vrot.slane %v1058_v25, 1  ;;  %v6210_v52 = vld [vmem:[#allocation6 + $0x2e0] sm:$0xf]  ;;  %v6327_v54 = vor.u32 %v8159_v48, %v6324_v51  ;;  %v6167_v48 = vor.u32 %v8119_v44, %v6164_v47  ;;  %v8145_v51 = vld [vmem:[#allocation6 + $0x34c] sm:$0xf0] }
  0xd2   : > { %v812_v0 = vrot.slane %v810_v1, 1  ;;  %v6211_v55 = vor.u32 %v8133_v53, %v6210_v52  ;;  %1777 = vmatpush.bf16.msra.mxu2 %v6323_v50  ;;  %v8155_v1 = vld [vmem:[#allocation6 + $0x3a4] sm:$0xf]  ;;  %v6258_v50 = vld [vmem:[#allocation6 + $0x340] sm:$0xf] }
  0xd3   : > { %v723_v3 = vmax.f32 %v719_v60, 0.0  ;;  %v8143_v52 = vld [vmem:[#allocation6 + $0x344] sm:$0xf]  ;;  %v8166_v47 = vld [vmem:[#allocation6 + $0x3f4] sm:$0xf0] }
  0xd4   : > { %v813_v16 = vor.u32 %v812_v0, %v808_v13  ;;  %1758 = vmatpush.bf16.msra.mxu1 %v6211_v55  ;;  %v8153_v0 = vld [vmem:[#allocation6 + $0x38c] sm:$0xf0]  ;;  %v6260_v55 = vld [vmem:[#allocation6 + $0x350] sm:$0xf0] }
  0xd5   : > { %v758_v7 = vsel %vm742_vm4, %v723_v3, 0.0  ;;  %v8614_v19 = vpack.c.bf16 %v723_v3, %v723_v3  ;;  %v6308_v3 = vld [vmem:[#allocation6 + $0x3b0] sm:$0xf0] }
  0xd6   : > { %762 = vst [vmem:[#allocation2 + $0x50] sm:$0xff] %v758_v7  ;;  %v706_v10 = vpop.f32.mrf.mxu2  ;;  %v788_v11 = vpack.c.bf16 %v786_v63, %v758_v7  ;;  %v1059_v24 = vpack.c.bf16 %v1057_v22, %v758_v7  ;;  %v8157_v63 = vld [vmem:[#allocation6 + $0x3ac] sm:$0xf0]  ;;  %v6311_v4 = vor.u32 %v8155_v1, %v6308_v3  ;;  %v8127_v7 = vld [vmem:[#allocation6 + $0x2c4] sm:$0xf] }
  0xd7   : > { %v6307_v2 = vor.u32 %v8157_v63, %v6306_v62  ;;  %v6199_v10 = vor.u32 %v8127_v7, %v6196_v9  ;;  %v6147_v62 = vor.u32 %v8117_v58, %v6146_v56  ;;  %v8115_v63 = vld [vmem:[#allocation6 + $0x264] sm:$0xf]  ;;  %v6148_v1 = vld [vmem:[#allocation6 + $0x270] sm:$0xf0] }
  0xd8   : > { %v815_v14 = vshll.u32 %v788_v11, 16  ;;  %v819_v20 = vshrl.u32 %v788_v11, 16  ;;  %v1081_v26 = vrot.slane %v1059_v24, 1  ;;  %v6290_v11 = vld [vmem:[#allocation6 + $0x380] sm:$0xf]  ;;  %1759 = vmatpush.bf16.msra.mxu1 %v6195_v8 }
  0xd9   : > { %1778 = vmatpush.bf16.msra.mxu2 %v6307_v2  ;;  %v6291_v13 = vor.u32 %v8153_v0, %v6290_v11  ;;  %v6180_v24 = vld [vmem:[#allocation6 + $0x2b0] sm:$0xf0]  ;;  %v6242_v2 = vld [vmem:[#allocation6 + $0x320] sm:$0xf]  ;;  %v8113_v0 = vld [vmem:[#allocation6 + $0x24c] sm:$0xf0] }
  0xda   : > { %v817_v17 = vrot.slane %v815_v14, 1  ;;  %v1082_v28 = vsel %vm1079_vm7, %v1080_v27, %v1081_v26  ;;  %v8151_v14 = vld [vmem:[#allocation6 + $0x384] sm:$0xf]  ;;  %v6183_v25 = vor.u32 %v8123_v23, %v6180_v24  ;;  %v8149_v27 = vld [vmem:[#allocation6 + $0x36c] sm:$0xf0]  ;;  %v6243_v9 = vor.u32 %v8141_v5, %v6242_v2 }
  0xdb   : > { %v6244_v7 = vld [vmem:[#allocation6 + $0x330] sm:$0xf0]  ;;  %v6130_v11 = vld [vmem:[#allocation6 + $0x240] sm:$0xf]  ;;  %v8109_v24 = vld [vmem:[#allocation6 + $0x22c] sm:$0xf0] }
  0xdc   : > { %v818_v18 = vsel %vm806_vm5, %v813_v16, %v817_v17  ;;  %v821_v21 = vor.u32 %v819_v20, %v817_v17  ;;  %v9166_v16 = vld [vmem:[#allocation12] sm:$0x3]  ;;  %v6295_v17 = vor.u32 %v8151_v14, %v6292_v15  ;;  %v8137_v15 = vld [vmem:[#allocation6 + $0x30c] sm:$0xf0]  ;;  %v6100_v58 = vld [vmem:[#allocation6 + $0x210] sm:$0xf0] }
  0xdd   : > { %912 = vmatmul.bf16.vlgmr.msra.gmra.mxu3 %v818_v18  ;;  %930 = vmatmul.bf16.vlgmr.msrb.gmra.mxu0 %v818_v18  ;;  %v6178_v18 = vld [vmem:[#allocation6 + $0x2a0] sm:$0xf] }
  0xde   : > { %1812 = vmatpush.bf16.msrb.mxu0 %v6343_v45  ;;  %1794 = vmatpush.bf16.msra.mxu3 %v6215_v61  ;;  %v9172_v45 = vperm.slane %v9166_v16, 1  ;;  %v6263_v61 = vor.u32 %v8143_v52, %v6260_v55  ;;  %v6226_v14 = vld [vmem:[#allocation6 + $0x300] sm:$0xf]  ;;  %v8103_v55 = vld [vmem:[#allocation6 + $0x204] sm:$0xf] }
  0xdf   : > { %8615 = vmatmul.msk.bf16.gmra.mxu1 %vm8613_vm6, %v8614_v19  ;;  %8618 = vmatmul.msk.bf16.gmra.mxu2 %vm8613_vm6, %v8614_v19  ;;  %v8125_v19 = vld [vmem:[#allocation6 + $0x2ac] sm:$0xf0]  ;;  %v6227_v23 = vor.u32 %v8137_v15, %v6226_v14 }
  0xe0   : > { %1779 = vmatpush.bf16.msra.mxu2 %v6291_v13  ;;  %v6179_v22 = vor.u32 %v8125_v19, %v6178_v18  ;;  %v8111_v13 = vld [vmem:[#allocation6 + $0x244] sm:$0xf] }
  0xe1   : > { %v8135_v19 = vld [vmem:[#allocation6 + $0x304] sm:$0xf] }
  0xe2   : > { %1813 = vmatpush.bf16.msrb.mxu0 %v6327_v54  ;;  %1795 = vmatpush.bf16.msra.mxu3 %v6199_v10  ;;  %v6259_v54 = vor.u32 %v8145_v51, %v6258_v50  ;;  %v6247_v10 = vor.u32 %v8139_v6, %v6244_v7  ;;  %v8164_v50 = vld [vmem:[#allocation6 + $0x3ec] sm:$0xf]  ;;  %v6348_v51 = vld [vmem:[#allocation6 + $0x3f8] sm:$0xf0] }
  0xe3   : > { %1760 = vmatpush.bf16.msra.mxu1 %v6179_v22  ;;  %v6114_v22 = vld [vmem:[#allocation6 + $0x220] sm:$0xf] }
  0xe6   : > { %1814 = vmatpush.bf16.msrb.mxu0 %v6311_v4  ;;  %1796 = vmatpush.bf16.msra.mxu3 %v6183_v25  ;;  %v6151_v4 = vor.u32 %v8115_v63, %v6148_v1  ;;  %v8107_v25 = vld [vmem:[#allocation6 + $0x224] sm:$0xf]  ;;  %v6103_v1 = vor.u32 %v8103_v55, %v6100_v58  ;;  %v6188_v58 = vld [vmem:[#allocation6 + $0x2b8] sm:$0xf0] }
  0xea   : > { %1815 = vmatpush.bf16.msrb.mxu0 %v6295_v17  ;;  %1797 = vmatpush.bf16.msra.mxu3 %v6167_v48 }
  0xed   : > { %917 = vmatmul.bf16.gmra.mxu3 %v821_v21  ;;  %935 = vmatmul.bf16.gmra.mxu0 %v821_v21  ;;  %v9169_v21 = vadd.s32 4294967292, %v9112_v57 }
  0xee   : > { %1798 = vmatpush.bf16.msra.mxu3 %v6151_v4  ;;  %v6332_v4 = vld [vmem:[#allocation6 + $0x3d8] sm:$0xf0] }
  0xef   : > { %vm1230_vm8 = vcmp.ge.s32.totalorder %v9169_v21, 0  ;;  %v8229_v21 = vld [vmem:[#allocation6 + $0x5ec] sm:$0xf0] }
  0xf0   : > { %vm9277_vm10 = vmpackc.low %vm8928_vm2, %vm1230_vm8 }
  0xfd   : > { %1173 = vmatmul.bf16.vlgmr.msrb.gmra.mxu3 %v1082_v28  ;;  %1191 = vmatmul.bf16.vlgmr.msra.gmra.mxu0 %v1082_v28  ;;  %v8147_v28 = vld [vmem:[#allocation6 + $0x364] sm:$0xf] }
  0xfe   : > { %v6279_v41 = vor.u32 %v8147_v28, %v6276_v40 }
 0x100   : > { %1816 = vmatpush.bf16.msrb.mxu0 %v6279_v41 }
 0x104   : > { %1817 = vmatpush.bf16.msrb.mxu0 %v6263_v61  ;;  %v8162_v61 = vld [vmem:[#allocation6 + $0x3d4] sm:$0xf0] }
 0x108   : > { %1818 = vmatpush.bf16.msrb.mxu0 %v6247_v10  ;;  %v8134_v10 = vld [vmem:[#allocation6 + $0x2f4] sm:$0xf0] }
 0x10d   : > { %1178 = vmatmul.bf16.gmra.mxu3 %v1081_v26  ;;  %1196 = vmatmul.bf16.gmra.mxu0 %v1081_v26  ;;  %v6274_v26 = vld [vmem:[#allocation6 + $0x360] sm:$0xf] }
 0x10e   : > { %v6275_v39 = vor.u32 %v8149_v27, %v6274_v26  ;;  %v6116_v26 = vld [vmem:[#allocation6 + $0x230] sm:$0xf0] }
 0x110   : > { %1780 = vmatpush.bf16.msra.mxu2 %v6275_v39  ;;  %v9184_v39 = vperm.slane %v9166_v16, 0 }
 0x114   : > { %1781 = vmatpush.bf16.msra.mxu2 %v6259_v54  ;;  %v8105_v54 = vld [vmem:[#allocation6 + $0x20c] sm:$0xf0] }
 0x118   : > { %1782 = vmatpush.bf16.msra.mxu2 %v6243_v9  ;;  %v6218_v9 = vld [vmem:[#allocation6 + $0x2e8] sm:$0xf] }
 0x11c   : > { %1783 = vmatpush.bf16.msra.mxu2 %v6227_v23  ;;  %v6202_v23 = vld [vmem:[#allocation6 + $0x2c8] sm:$0xf] }
 0x14c   : > { %v9142_v29 = vpop.f32.mrf.mxu1 }
 0x152   : > { %v9144_v30 = vpop.f32.mrf.mxu2 }
 0x154   : > { %v9146_v31 = vpop.f32.mrf.mxu1 }
 0x15a   : > { %v9148_v32 = vpop.f32.mrf.mxu0  ;;  %v9150_v33 = vpop.f32.mrf.mxu2 }
 0x15c   : > { %v9152_v35 = vpop.f32.mrf.mxu1 }
 0x160   : > { %v9154_v36 = vpop.f32.mrf.mxu3 }
 0x161   : > { %v1030_v27 = vadd.f32 %v9142_v29, %v9154_v36  ;;  %v6119_v29 = vor.u32 %v8107_v25, %v6116_v26  ;;  %v6346_v36 = vld [vmem:[#allocation6 + $0x3e8] sm:$0xf] }
 0x162   : > { %v9156_v37 = vpop.f32.mrf.mxu0  ;;  %v9158_v38 = vpop.f32.mrf.mxu2  ;;  %v6347_v48 = vor.u32 %v8166_v47, %v6346_v36 }
 0x164   : > { %v1036_v42 = vpop.f32.mrf.mxu1  ;;  %1848 = vmatpush.bf16.msrb.mxu2 %v6347_v48  ;;  %v6300_v48 = vld [vmem:[#allocation6 + $0x398] sm:$0xf0] }
 0x165   : > { %v6162_v42 = vld [vmem:[#allocation6 + $0x280] sm:$0xf] }
 0x166   : > { %v6163_v46 = vor.u32 %v8121_v43, %v6162_v42  ;;  %v6115_v42 = vor.u32 %v8109_v24, %v6114_v22  ;;  %v1050_v43 = vadd.f32 %v9150_v33, %v9156_v37  ;;  %v6351_v37 = vor.u32 %v8164_v50, %v6348_v51  ;;  %v6316_v22 = vld [vmem:[#allocation6 + $0x3b8] sm:$0xf0] }
 0x168   : > { %v9160_v49 = vpop.f32.mrf.mxu3  ;;  %1761 = vmatpush.bf16.msra.mxu1 %v6163_v46 }
 0x169   : > { %v1032_v6 = vadd.f32 %v9146_v31, %v9160_v49  ;;  %v6219_v31 = vor.u32 %v8134_v10, %v6218_v9  ;;  %v8132_v49 = vld [vmem:[#allocation6 + $0x2ec] sm:$0xf]  ;;  %v8122_v9 = vld [vmem:[#allocation6 + $0x294] sm:$0xf0] }
 0x16a   : > { %v9162_v59 = vpop.f32.mrf.mxu0  ;;  %v1054_v60 = vpop.f32.mrf.mxu2 }
 0x16b   : > { %v1048_v60 = vadd.f32 %v9144_v30, %v9148_v32  ;;  %v6131_v30 = vor.u32 %v8113_v0, %v6130_v11  ;;  %v6132_v32 = vld [vmem:[#allocation6 + $0x250] sm:$0xf0]  ;;  %v1053_v11 = vadd.f32 %v9158_v38, %v9162_v59  ;;  %v8156_v59 = vld [vmem:[#allocation6 + $0x3ac] sm:$0xf] }
 0x16c   : > { %1762 = vmatpush.bf16.msra.mxu1 %v6147_v62  ;;  %v6135_v18 = vor.u32 %v8111_v13, %v6132_v32  ;;  %v9208_v13 = vadd.s32 4294967292, %v9125_v34  ;;  %v6319_v26 = vor.u32 %v8156_v59, %v6316_v22  ;;  %v6154_v22 = vld [vmem:[#allocation6 + $0x268] sm:$0xf] }
 0x16e   : > { %1799 = vmatpush.bf16.msra.mxu3 %v6135_v18  ;;  %v6314_v18 = vld [vmem:[#allocation6 + $0x3a8] sm:$0xf]  ;;  %vm1235_vm9 = vcmp.lt.s32.totalorder %v9208_v13, 16 }
 0x16f   : > { %v6250_v13 = vld [vmem:[#allocation6 + $0x328] sm:$0xf] }
 0x170   : > { %v9164_v12 = vpop.f32.mrf.mxu3  ;;  %1763 = vmatpush.bf16.msra.mxu1 %v6131_v30  ;;  %v6220_v30 = vld [vmem:[#allocation6 + $0x2f8] sm:$0xf0] }
 0x171   : > { %v6223_v15 = vor.u32 %v8132_v49, %v6220_v30  ;;  %v6172_v49 = vld [vmem:[#allocation6 + $0x298] sm:$0xf0] }
 0x172   : > { %v938_v20 = vpop.f32.mrf.mxu0  ;;  %1800 = vmatpush.bf16.msra.mxu3 %v6119_v29 }
 0x173   : > { %v6228_v20 = vld [vmem:[#allocation6 + $0x310] sm:$0xf0] }
 0x174   : > { %v6231_v40 = vor.u32 %v8135_v19, %v6228_v20  ;;  %1764 = vmatpush.bf16.msra.mxu1 %v6115_v42  ;;  %v8158_v19 = vld [vmem:[#allocation6 + $0x3b4] sm:$0xf0] }
 0x175   : > { %v6315_v38 = vor.u32 %v8158_v19, %v6314_v18  ;;  %v8144_v19 = vld [vmem:[#allocation6 + $0x34c] sm:$0xf] }
 0x176   : > { %1819 = vmatpush.bf16.msrb.mxu0 %v6231_v40  ;;  %1801 = vmatpush.bf16.msra.mxu3 %v6103_v1  ;;  %v8128_v40 = vld [vmem:[#allocation6 + $0x2cc] sm:$0xf]  ;;  %v6282_v1 = vld [vmem:[#allocation6 + $0x368] sm:$0xf] }
 0x178   : > { %v920_v53 = vpop.f32.mrf.mxu3 }
 0x179   : > { %v6098_v53 = vld [vmem:[#allocation6 + $0x200] sm:$0xf] }
 0x17a   : > { %v1192_v3 = vpop.f32.mrf.mxu0  ;;  %v6099_v56 = vor.u32 %v8105_v54, %v6098_v53  ;;  %1884 = vmatpush.bf16.msra.mxu0 %v6351_v37  ;;  %1866 = vmatpush.bf16.msrb.mxu3 %v6223_v15  ;;  %v8126_v37 = vld [vmem:[#allocation6 + $0x2b4] sm:$0xf0]  ;;  %v1035_v53 = vadd.f32 %v9152_v35, %v9164_v12  ;;  %v8148_v12 = vld [vmem:[#allocation6 + $0x36c] sm:$0xf] }
 0x17b   : > { %v1202_v8 = vadd.f32 %v1192_v3, %v1048_v60  ;;  %v6330_v60 = vld [vmem:[#allocation6 + $0x3c8] sm:$0xf]  ;;  %v8160_v3 = vld [vmem:[#allocation6 + $0x3cc] sm:$0xf]  ;;  %v8146_v15 = vld [vmem:[#allocation6 + $0x354] sm:$0xf0] }
 0x17c   : > { %v6331_v2 = vor.u32 %v8162_v61, %v6330_v60  ;;  %v6335_v5 = vor.u32 %v8160_v3, %v6332_v4  ;;  %1765 = vmatpush.bf16.msra.mxu1 %v6099_v56 }
 0x17d   : > { %v9178_v17 = vadd.f32 %v9172_v45, %v1202_v8 }
 0x17e   : > { %1849 = vmatpush.bf16.msrb.mxu2 %v6331_v2  ;;  %1885 = vmatpush.bf16.msra.mxu0 %v6335_v5  ;;  %v8150_v2 = vld [vmem:[#allocation6 + $0x374] sm:$0xf0] }
 0x17f   : > { %v1220_v28 = vmax.f32 %v9178_v17, 0.0  ;;  %v6283_v35 = vor.u32 %v8150_v2, %v6282_v1  ;;  %v6122_v1 = vld [vmem:[#allocation6 + $0x228] sm:$0xf]  ;;  %v8042_v17 = vld [vmem:[#allocation6 + $0x14] sm:$0xf0] }
 0x180   : > { %v1174_v41 = vpop.f32.mrf.mxu3  ;;  %1830 = vmatpush.bf16.msrb.mxu1 %v6219_v31  ;;  %v8120_v31 = vld [vmem:[#allocation6 + $0x28c] sm:$0xf] }
 0x181   : > { %v1246_v44 = vsel %vm1230_vm8, %v1220_v28, 0.0  ;;  %v1201_v46 = vadd.f32 %v1174_v41, %v1030_v27  ;;  %v8130_v27 = vld [vmem:[#allocation6 + $0x2d4] sm:$0xf0]  ;;  %v6204_v41 = vld [vmem:[#allocation6 + $0x2d8] sm:$0xf0] }
 0x182   : > { %1252 = vst [vmem:[#allocation3 + $0x8] sm:$0xff] %v1246_v44  ;;  %v1194_v16 = vpop.f32.mrf.mxu0  ;;  %1850 = vmatpush.bf16.msrb.mxu2 %v6315_v38  ;;  %v6203_v42 = vor.u32 %v8130_v27, %v6202_v23  ;;  %v6298_v44 = vld [vmem:[#allocation6 + $0x388] sm:$0xf]  ;;  %1886 = vmatpush.bf16.msra.mxu0 %v6319_v26  ;;  %v8118_v23 = vld [vmem:[#allocation6 + $0x274] sm:$0xf0] }
 0x183   : > { %v9193_v52 = vadd.f32 %v9184_v39, %v1201_v46  ;;  %v1204_v33 = vadd.f32 %v1194_v16, %v1050_v43  ;;  %v6207_v43 = vor.u32 %v8128_v40, %v6204_v41  ;;  %v8154_v46 = vld [vmem:[#allocation6 + $0x394] sm:$0xf0]  ;;  %v8152_v16 = vld [vmem:[#allocation6 + $0x38c] sm:$0xf]  ;;  %v6155_v27 = vor.u32 %v8118_v23, %v6154_v22  ;;  %v6156_v41 = vld [vmem:[#allocation6 + $0x278] sm:$0xf0] }
 0x184   : > { %v6299_v47 = vor.u32 %v8154_v46, %v6298_v44  ;;  %1831 = vmatpush.bf16.msrb.mxu1 %v6203_v42  ;;  %v6303_v51 = vor.u32 %v8152_v16, %v6300_v48  ;;  %v8116_v40 = vld [vmem:[#allocation6 + $0x26c] sm:$0xf]  ;;  %v8142_v44 = vld [vmem:[#allocation6 + $0x334] sm:$0xf0]  ;;  %v6252_v16 = vld [vmem:[#allocation6 + $0x338] sm:$0xf0] }
 0x185   : > { %v1219_v62 = vmax.f32 %v9193_v52, 0.0  ;;  %v1216_v63 = vadd.f32 %v9172_v45, %v1204_v33  ;;  %v6186_v33 = vld [vmem:[#allocation6 + $0x2a8] sm:$0xf]  ;;  %1867 = vmatpush.bf16.msrb.mxu3 %v6207_v43  ;;  %v6159_v43 = vor.u32 %v8116_v40, %v6156_v41  ;;  %v8095_v41 = vld [vmem:[#allocation6 + $0x1c4] sm:$0xf] }
 0x186   : > { %v6187_v55 = vor.u32 %v8126_v37, %v6186_v33  ;;  %1851 = vmatpush.bf16.msrb.mxu2 %v6299_v47  ;;  %1887 = vmatpush.bf16.msra.mxu0 %v6303_v51  ;;  %v8140_v47 = vld [vmem:[#allocation6 + $0x32c] sm:$0xf]  ;;  %v6138_v48 = vld [vmem:[#allocation6 + $0x248] sm:$0xf]  ;;  %v8114_v51 = vld [vmem:[#allocation6 + $0x254] sm:$0xf0] }
 0x187   : > { %v1245_v7 = vsel %vm1230_vm8, %v1219_v62, 0.0  ;;  %v9203_v8 = vmax.f32 %v1216_v63, 0.0  ;;  %v8112_v33 = vld [vmem:[#allocation6 + $0x24c] sm:$0xf]  ;;  %v6140_v37 = vld [vmem:[#allocation6 + $0x258] sm:$0xf0] }
 0x188   : > { %1251 = vst [vmem:[#allocation3] sm:$0xff] %v1245_v7  ;;  %v1176_v0 = vpop.f32.mrf.mxu3  ;;  %1832 = vmatpush.bf16.msrb.mxu1 %v6187_v55  ;;  %v6170_v7 = vld [vmem:[#allocation6 + $0x288] sm:$0xf]  ;;  %v6139_v55 = vor.u32 %v8114_v51, %v6138_v48  ;;  %v6468_v48 = vld [vmem:[#allocation6 + $0xf0] sm:$0xf0] }
 0x189   : > { %v1203_v32 = vadd.f32 %v1176_v0, %v1032_v6  ;;  %v1332_v14 = vld [vmem:[#allocation3 + $0x8] sm:$0xfe]  ;;  %v6284_v6 = vld [vmem:[#allocation6 + $0x378] sm:$0xf0]  ;;  %v6171_v0 = vor.u32 %v8122_v9, %v6170_v7  ;;  %v8093_v51 = vld [vmem:[#allocation6 + $0x1ac] sm:$0xf0] }
 0x18a   : > { %v1197_v20 = vpop.f32.mrf.mxu0  ;;  %v9216_v50 = vpack.c.bf16 %v9203_v8, %v1332_v14  ;;  %1852 = vmatpush.bf16.msrb.mxu2 %v6283_v35  ;;  %v6266_v14 = vld [vmem:[#allocation6 + $0x348] sm:$0xf]  ;;  %v8110_v35 = vld [vmem:[#allocation6 + $0x234] sm:$0xf0]  ;;  %v6124_v7 = vld [vmem:[#allocation6 + $0x238] sm:$0xf0] }
 0x18b   : > { %v1215_v24 = vadd.f32 %v9184_v39, %v1203_v32  ;;  %v1206_v25 = vadd.f32 %v1197_v20, %v1053_v11  ;;  %v6287_v11 = vor.u32 %v8148_v12, %v6284_v6  ;;  %v6175_v32 = vor.u32 %v8120_v31, %v6172_v49  ;;  %v6268_v20 = vld [vmem:[#allocation6 + $0x358] sm:$0xf0]  ;;  %v8108_v12 = vld [vmem:[#allocation6 + $0x22c] sm:$0xf]  ;;  %v6594_v31 = vld [vmem:[#allocation6 + $0x1e0] sm:$0xf] }
 0x18c   : > { %v1419_v4 = vshll.u32 %v9216_v50, 16  ;;  %1833 = vmatpush.bf16.msrb.mxu1 %v6171_v0  ;;  %v6267_v18 = vor.u32 %v8146_v15, %v6266_v14  ;;  %v1417_v38 = vshrl.u32 %v9216_v50, 16  ;;  %v6271_v59 = vor.u32 %v8144_v19, %v6268_v20  ;;  %v8101_v49 = vld [vmem:[#allocation6 + $0x1ec] sm:$0xf0]  ;;  %v6106_v19 = vld [vmem:[#allocation6 + $0x208] sm:$0xf] }
 0x18d   : > { %v9211_v29 = vmax.f32 %v1215_v24, 0.0  ;;  %v1218_v36 = vadd.f32 %v9172_v45, %v1206_v25  ;;  %v8124_v45 = vld [vmem:[#allocation6 + $0x2ac] sm:$0xf]  ;;  %1888 = vmatpush.bf16.msra.mxu0 %v6287_v11  ;;  %v6255_v50 = vor.u32 %v8140_v47, %v6252_v16  ;;  %v6123_v6 = vor.u32 %v8110_v35, %v6122_v1  ;;  %v8067_v47 = vld [vmem:[#allocation6 + $0xe4] sm:$0xf] }
 0x18e   : > { %v6191_v63 = vor.u32 %v8124_v45, %v6188_v58  ;;  %v1421_v25 = vrot.slane %v1419_v4, 1  ;;  %1853 = vmatpush.bf16.msrb.mxu2 %v6267_v18  ;;  %v6143_v45 = vor.u32 %v8112_v33, %v6140_v37  ;;  %v8138_v58 = vld [vmem:[#allocation6 + $0x314] sm:$0xf0]  ;;  %v6127_v0 = vor.u32 %v8108_v12, %v6124_v7  ;;  %v6596_v18 = vld [vmem:[#allocation6 + $0x1f0] sm:$0xf0] }
 0x18f   : > { %v1224_v54 = vmax.f32 %v1218_v36, 0.0  ;;  %v1331_v10 = vld [vmem:[#allocation3] sm:$0xfe]  ;;  %v6251_v36 = vor.u32 %v8142_v44, %v6250_v13  ;;  %v6595_v15 = vor.u32 %v8101_v49, %v6594_v31  ;;  %v6471_v33 = vor.u32 %v8067_v47, %v6468_v48  ;;  %v6548_v12 = vld [vmem:[#allocation6 + $0x190] sm:$0xf0] }
 0x190   : > { %v1179_v56 = vpop.f32.mrf.mxu3  ;;  %1868 = vmatpush.bf16.msrb.mxu3 %v6191_v63  ;;  %v9228_v26 = vpack.c.bf16 %v9211_v29, %v1331_v10  ;;  %1834 = vmatpush.bf16.msrb.mxu1 %v6155_v27  ;;  %v6236_v63 = vld [vmem:[#allocation6 + $0x318] sm:$0xf0]  ;;  %v1422_v2 = vor.u32 %v1421_v25, %v1417_v38  ;;  %v8104_v38 = vld [vmem:[#allocation6 + $0x20c] sm:$0xf]  ;;  %v6578_v27 = vld [vmem:[#allocation6 + $0x1c0] sm:$0xf] }
 0x191   : > { %v1250_v60 = vsel %vm1235_vm9, %v1224_v54, 0.0  ;;  %v1205_v61 = vadd.f32 %v1179_v56, %v1035_v53  ;;  %1889 = vmatpush.bf16.msra.mxu0 %v6271_v59  ;;  %v6234_v56 = vld [vmem:[#allocation6 + $0x308] sm:$0xf]  ;;  %v6108_v59 = vld [vmem:[#allocation6 + $0x218] sm:$0xf0] }
 0x192   : > { %1256 = vst [vmem:[#allocation3 + $0x28] sm:$0xff] %v1250_v60  ;;  %v1199_v3 = vpop.f32.mrf.mxu0  ;;  %v1407_v54 = vshll.u32 %v9228_v26, 16  ;;  %1854 = vmatpush.bf16.msrb.mxu2 %v6251_v36  ;;  %v6235_v60 = vor.u32 %v8138_v58, %v6234_v56  ;;  %v6111_v25 = vor.u32 %v8104_v38, %v6108_v59  ;;  %v6466_v44 = vld [vmem:[#allocation6 + $0xe0] sm:$0xf]  ;;  %v8069_v36 = vld [vmem:[#allocation6 + $0xec] sm:$0xf0] }
 0x193   : > { %v1217_v5 = vadd.f32 %v9184_v39, %v1205_v61  ;;  %v8136_v61 = vld [vmem:[#allocation6 + $0x30c] sm:$0xf]  ;;  %v6467_v16 = vor.u32 %v8069_v36, %v6466_v44  ;;  %v8065_v56 = vld [vmem:[#allocation6 + $0xcc] sm:$0xf0]  ;;  %v8063_v58 = vld [vmem:[#allocation6 + $0xc4] sm:$0xf] }
 0x194   : > { %1869 = vmatpush.bf16.msrb.mxu3 %v6175_v32  ;;  %1835 = vmatpush.bf16.msrb.mxu1 %v6139_v55  ;;  %v6239_v4 = vor.u32 %v8136_v61, %v6236_v63  ;;  %v1409_v11 = vrot.slane %v1407_v54, 1  ;;  %v1405_v32 = vshrl.u32 %v9228_v26, 16  ;;  %v8097_v26 = vld [vmem:[#allocation6 + $0x1cc] sm:$0xf0]  ;;  %v6564_v54 = vld [vmem:[#allocation6 + $0x1b0] sm:$0xf0] }
 0x195   : > { %v1223_v30 = vmax.f32 %v1217_v5, 0.0  ;;  %1890 = vmatpush.bf16.msra.mxu0 %v6255_v50  ;;  %v6579_v40 = vor.u32 %v8097_v26, %v6578_v27  ;;  %v6562_v50 = vld [vmem:[#allocation6 + $0x1a0] sm:$0xf]  ;;  %v8057_v38 = vld [vmem:[#allocation6 + $0x8c] sm:$0xf0] }
 0x196   : > { %1855 = vmatpush.bf16.msrb.mxu2 %v6235_v60  ;;  %v1410_v22 = vor.u32 %v1409_v11, %v1405_v32  ;;  %v6563_v37 = vor.u32 %v8093_v51, %v6562_v50  ;;  %v6450_v55 = vld [vmem:[#allocation6 + $0xc0] sm:$0xf]  ;;  %v6452_v60 = vld [vmem:[#allocation6 + $0xd0] sm:$0xf0]  ;;  %v8059_v11 = vld [vmem:[#allocation6 + $0xa4] sm:$0xf] }
 0x197   : > { %v1249_v39 = vsel %vm1235_vm9, %v1223_v30, 0.0  ;;  %v8099_v30 = vld [vmem:[#allocation6 + $0x1e4] sm:$0xf]  ;;  %v6451_v61 = vor.u32 %v8065_v56, %v6450_v55  ;;  %v6455_v63 = vor.u32 %v8063_v58, %v6452_v60  ;;  %v6546_v1 = vld [vmem:[#allocation6 + $0x180] sm:$0xf] }
 0x198   : > { %1255 = vst [vmem:[#allocation3 + $0x10] sm:$0xff] %v1249_v39  ;;  %v1181_v24 = vpop.f32.mrf.mxu3  ;;  %1870 = vmatpush.bf16.msrb.mxu3 %v6159_v43  ;;  %1836 = vmatpush.bf16.msrb.mxu1 %v6123_v6  ;;  %v6599_v20 = vor.u32 %v8099_v30, %v6596_v18  ;;  %v8106_v39 = vld [vmem:[#allocation6 + $0x214] sm:$0xf0]  ;;  %v8061_v6 = vld [vmem:[#allocation6 + $0xac] sm:$0xf0] }
 0x199   : > { %v1334_v42 = vld [vmem:[#allocation3 + $0x28] sm:$0x7f]  ;;  %1891 = vmatpush.bf16.msra.mxu0 %v6239_v4  ;;  %v6107_v24 = vor.u32 %v8106_v39, %v6106_v19  ;;  %v8087_v4 = vld [vmem:[#allocation6 + $0x184] sm:$0xf]  ;;  %v6418_v39 = vld [vmem:[#allocation6 + $0x80] sm:$0xf] }
 0x19a   : > { %v9230_v46 = vpack.c.bf16 %v1334_v42, %v1334_v42  ;;  %v6580_v42 = vld [vmem:[#allocation6 + $0x1d0] sm:$0xf0]  ;;  %v6551_v31 = vor.u32 %v8087_v4, %v6548_v12  ;;  %v8083_v18 = vld [vmem:[#allocation6 + $0x164] sm:$0xf]  ;;  %v6419_v59 = vor.u32 %v8057_v38, %v6418_v39  ;;  %v8081_v27 = vld [vmem:[#allocation6 + $0x14c] sm:$0xf0] }
 0x19b   : > { %v6583_v13 = vor.u32 %v8095_v41, %v6580_v42  ;;  %v8079_v26 = vld [vmem:[#allocation6 + $0x144] sm:$0xf]  ;;  %v6402_v44 = vld [vmem:[#allocation6 + $0x60] sm:$0xf]  ;;  %v8053_v36 = vld [vmem:[#allocation6 + $0x6c] sm:$0xf0] }
 0x19c   : > { %v1424_v53 = vshll.u32 %v9230_v46, 16  ;;  %1871 = vmatpush.bf16.msrb.mxu3 %v6143_v45  ;;  %1837 = vmatpush.bf16.msrb.mxu1 %v6107_v24  ;;  %v1431_v7 = vshrl.u32 %v9230_v46, 16  ;;  %v8085_v46 = vld [vmem:[#allocation6 + $0x16c] sm:$0xf0]  ;;  %v6420_v24 = vld [vmem:[#allocation6 + $0x90] sm:$0xf0] }
 0x19d   : > { %v8051_v47 = vld [vmem:[#allocation6 + $0x64] sm:$0xf]  ;;  %v6404_v48 = vld [vmem:[#allocation6 + $0x70] sm:$0xf0]  ;;  %v6498_v50 = vld [vmem:[#allocation6 + $0x120] sm:$0xf] }
 0x19e   : > { %v9234_v3 = vrot.slane %v1424_v53, 1  ;;  %v8091_v53 = vld [vmem:[#allocation6 + $0x1a4] sm:$0xf]  ;;  %v8077_v51 = vld [vmem:[#allocation6 + $0x12c] sm:$0xf0] }
 0x19f   : > { %v1333_v5 = vld [vmem:[#allocation3 + $0x10] sm:$0x7f]  ;;  %v6567_v45 = vor.u32 %v8091_v53, %v6564_v54  ;;  %v6386_v54 = vld [vmem:[#allocation6 + $0x40] sm:$0xf]  ;;  %v8047_v56 = vld [vmem:[#allocation6 + $0x44] sm:$0xf] }
 0x1a0   : > { %v9238_v9 = vsel %vm806_vm5, %v1422_v2, %v9234_v3  ;;  %v9240_v10 = vpack.c.bf16 %v1333_v5, %v1333_v5  ;;  %1872 = vmatpush.bf16.msrb.mxu3 %v6127_v0  ;;  %v8089_v2 = vld [vmem:[#allocation6 + $0x18c] sm:$0xf0]  ;;  %v6434_v5 = vld [vmem:[#allocation6 + $0xa0] sm:$0xf]  ;;  %v6436_v0 = vld [vmem:[#allocation6 + $0xb0] sm:$0xf0]  ;;  %v9256_v30 = vor.u32 %v1431_v7, %v9234_v3 }
 0x1a1   : > { %1784 = vmatmul.bf16.vlgmr.msra.gmra.mxu2 %v9238_v9  ;;  %1820 = vmatmul.bf16.vlgmr.msrb.gmra.mxu0 %v9238_v9  ;;  %v6547_v35 = vor.u32 %v8089_v2, %v6546_v1  ;;  %v6435_v49 = vor.u32 %v8061_v6, %v6434_v5  ;;  %v6439_v32 = vor.u32 %v8059_v11, %v6436_v0  ;;  %v6500_v53 = vld [vmem:[#allocation6 + $0x130] sm:$0xf0]  ;;  %v8071_v1 = vld [vmem:[#allocation6 + $0x104] sm:$0xf]  ;;  %v6370_v12 = vld [vmem:[#allocation6 + $0x20] sm:$0xf] }
 0x1a2   : > { %v1412_v14 = vshll.u32 %v9240_v10, 16  ;;  %2240 = vmatpush.bf16.msra.mxu2 %v6595_v15  ;;  %2276 = vmatpush.bf16.msrb.mxu0 %v6599_v20  ;;  %v6530_v15 = vld [vmem:[#allocation6 + $0x160] sm:$0xf]  ;;  %v6532_v20 = vld [vmem:[#allocation6 + $0x170] sm:$0xf0] }
 0x1a3   : > { %v6531_v19 = vor.u32 %v8085_v46, %v6530_v15  ;;  %v6535_v3 = vor.u32 %v8083_v18, %v6532_v20  ;;  %v6388_v58 = vld [vmem:[#allocation6 + $0x50] sm:$0xf0]  ;;  %v8045_v5 = vld [vmem:[#allocation6 + $0x2c] sm:$0xf0]  ;;  %v8043_v6 = vld [vmem:[#allocation6 + $0x24] sm:$0xf] }
 0x1a4   : > { %v9246_v23 = vrot.slane %v1412_v14, 1  ;;  %1873 = vmatpush.bf16.msrb.mxu3 %v6111_v25  ;;  %v1428_v14 = vshrl.u32 %v9240_v10, 16  ;;  %v6514_v10 = vld [vmem:[#allocation6 + $0x140] sm:$0xf]  ;;  %v6391_v2 = vor.u32 %v8047_v56, %v6388_v58  ;;  %v6372_v7 = vld [vmem:[#allocation6 + $0x30] sm:$0xf0]  ;;  %v6371_v0 = vor.u32 %v8045_v5, %v6370_v12 }
 0x1a5   : > { %v6515_v42 = vor.u32 %v8081_v27, %v6514_v10  ;;  %v6604_v46 = vld [vmem:[#allocation6 + $0x1f8] sm:$0xf0]  ;;  %v6354_v18 = vld [vmem:[#allocation6] sm:$0xf]  ;;  %v8039_v38 = vld [vmem:[#allocation6 + $0x4] sm:$0xf] }
 0x1a6   : > { %v9250_v43 = vsel %vm806_vm5, %v1410_v22, %v9246_v23  ;;  %2241 = vmatpush.bf16.msra.mxu2 %v6579_v40  ;;  %2277 = vmatpush.bf16.msrb.mxu0 %v6583_v13  ;;  %v8055_v22 = vld [vmem:[#allocation6 + $0x84] sm:$0xf]  ;;  %v6516_v40 = vld [vmem:[#allocation6 + $0x150] sm:$0xf0]  ;;  %v9262_v41 = vor.u32 %v1428_v14, %v9246_v23  ;;  %v6499_v23 = vor.u32 %v8077_v51, %v6498_v50  ;;  %v8100_v14 = vld [vmem:[#allocation6 + $0x1ec] sm:$0xf] }
 0x1a7   : > { %1766 = vmatmul.bf16.vlgmr.msra.gmra.mxu1 %v9250_v43  ;;  %1802 = vmatmul.bf16.vlgmr.msra.gmra.mxu3 %v9250_v43  ;;  %v6423_v25 = vor.u32 %v8055_v22, %v6420_v24  ;;  %v6519_v13 = vor.u32 %v8079_v26, %v6516_v40  ;;  %v6607_v20 = vor.u32 %v8100_v14, %v6604_v46  ;;  %v8098_v24 = vld [vmem:[#allocation6 + $0x1d4] sm:$0xf0]  ;;  %v8096_v10 = vld [vmem:[#allocation6 + $0x1cc] sm:$0xf]  ;;  %v6474_v26 = vld [vmem:[#allocation6 + $0xe8] sm:$0xf] }
 0x1a8   : > { %2222 = vmatpush.bf16.msra.mxu1 %v6467_v16  ;;  %2258 = vmatpush.bf16.msra.mxu3 %v6471_v33  ;;  %v6403_v16 = vor.u32 %v8053_v36, %v6402_v44  ;;  %v6407_v33 = vor.u32 %v8051_v47, %v6404_v48  ;;  %v8070_v40 = vld [vmem:[#allocation6 + $0xf4] sm:$0xf0]  ;;  %v6476_v44 = vld [vmem:[#allocation6 + $0xf8] sm:$0xf0]  ;;  %v6570_v36 = vld [vmem:[#allocation6 + $0x1a8] sm:$0xf] }
 0x1a9   : > { %v8094_v47 = vld [vmem:[#allocation6 + $0x1b4] sm:$0xf0]  ;;  %v8092_v50 = vld [vmem:[#allocation6 + $0x1ac] sm:$0xf]  ;;  %v6572_v51 = vld [vmem:[#allocation6 + $0x1b8] sm:$0xf0] }
 0x1aa   : > { %2242 = vmatpush.bf16.msra.mxu2 %v6563_v37  ;;  %2278 = vmatpush.bf16.msrb.mxu0 %v6567_v45  ;;  %v8075_v37 = vld [vmem:[#allocation6 + $0x124] sm:$0xf]  ;;  %v8049_v45 = vld [vmem:[#allocation6 + $0x4c] sm:$0xf0]  ;;  %v6571_v48 = vor.u32 %v8094_v47, %v6570_v36  ;;  %v8090_v56 = vld [vmem:[#allocation6 + $0x194] sm:$0xf0] }
 0x1ab   : > { %v6503_v55 = vor.u32 %v8075_v37, %v6500_v53  ;;  %v6387_v60 = vor.u32 %v8049_v45, %v6386_v54  ;;  %v8066_v37 = vld [vmem:[#allocation6 + $0xd4] sm:$0xf0]  ;;  %v8064_v53 = vld [vmem:[#allocation6 + $0xcc] sm:$0xf]  ;;  %v6554_v45 = vld [vmem:[#allocation6 + $0x188] sm:$0xf] }
 0x1ac   : > { %2223 = vmatpush.bf16.msra.mxu1 %v6451_v61  ;;  %2259 = vmatpush.bf16.msra.mxu3 %v6455_v63  ;;  %v6482_v61 = vld [vmem:[#allocation6 + $0x100] sm:$0xf]  ;;  %v8073_v63 = vld [vmem:[#allocation6 + $0x10c] sm:$0xf0]  ;;  %v8088_v58 = vld [vmem:[#allocation6 + $0x18c] sm:$0xf] }
 0x1ad   : > { %v6483_v4 = vor.u32 %v8073_v63, %v6482_v61  ;;  %v6556_v61 = vld [vmem:[#allocation6 + $0x198] sm:$0xf0]  ;;  %v6442_v63 = vld [vmem:[#allocation6 + $0xa8] sm:$0xf]  ;;  %v8056_v46 = vld [vmem:[#allocation6 + $0x8c] sm:$0xf] }
 0x1ae   : > { %2243 = vmatpush.bf16.msra.mxu2 %v6547_v35  ;;  %2279 = vmatpush.bf16.msrb.mxu0 %v6551_v31  ;;  %v6484_v35 = vld [vmem:[#allocation6 + $0x110] sm:$0xf0]  ;;  %v6375_v31 = vor.u32 %v8043_v6, %v6372_v7  ;;  %v6538_v6 = vld [vmem:[#allocation6 + $0x168] sm:$0xf]  ;;  %v8086_v7 = vld [vmem:[#allocation6 + $0x174] sm:$0xf0] }
 0x1af   : > { %v6487_v11 = vor.u32 %v8071_v1, %v6484_v35  ;;  %v8062_v1 = vld [vmem:[#allocation6 + $0xb4] sm:$0xf0]  ;;  %v6559_v35 = vor.u32 %v8088_v58, %v6556_v61  ;;  %v6394_v36 = vld [vmem:[#allocation6 + $0x48] sm:$0xf]  ;;  %v8221_v52 = vld [vmem:[#allocation6 + $0x5ac] sm:$0xf0] }
 0x1b0   : > { %2224 = vmatpush.bf16.msra.mxu1 %v6435_v49  ;;  %2260 = vmatpush.bf16.msra.mxu3 %v6439_v32  ;;  %v6602_v49 = vld [vmem:[#allocation6 + $0x1e8] sm:$0xf]  ;;  %v8102_v32 = vld [vmem:[#allocation6 + $0x1f4] sm:$0xf0]  ;;  %v6443_v12 = vor.u32 %v8062_v1, %v6442_v63  ;;  %v9284_v1 = vpack.c.bf16 %v9203_v8, %v1220_v28 }
 0x1b1   : > { %1789 = vmatmul.bf16.gmra.mxu2 %v9256_v30  ;;  %1825 = vmatmul.bf16.gmra.mxu0 %v9256_v30  ;;  %v6603_v15 = vor.u32 %v8102_v32, %v6602_v49  ;;  %v6426_v49 = vld [vmem:[#allocation6 + $0x88] sm:$0xf]  ;;  %v8058_v32 = vld [vmem:[#allocation6 + $0x94] sm:$0xf0] }
 0x1b2   : > { %2244 = vmatpush.bf16.msra.mxu2 %v6531_v19  ;;  %2280 = vmatpush.bf16.msrb.mxu0 %v6535_v3  ;;  %v8041_v19 = vld [vmem:[#allocation6 + $0xc] sm:$0xf0]  ;;  %v6356_v3 = vld [vmem:[#allocation6 + $0x10] sm:$0xf0]  ;;  %v6714_v63 = vld [vmem:[#allocation6 + $0x4c8] sm:$0xf] }
 0x1b3   : > { %v6355_v39 = vor.u32 %v8041_v19, %v6354_v18  ;;  %v6359_v22 = vor.u32 %v8039_v38, %v6356_v3  ;;  %v6428_v18 = vld [vmem:[#allocation6 + $0x98] sm:$0xf0]  ;;  %v6522_v19 = vld [vmem:[#allocation6 + $0x148] sm:$0xf]  ;;  %v8080_v38 = vld [vmem:[#allocation6 + $0x14c] sm:$0xf] }
 0x1b4   : > { %2225 = vmatpush.bf16.msra.mxu1 %v6419_v59  ;;  %2261 = vmatpush.bf16.msra.mxu3 %v6423_v25  ;;  %v6586_v59 = vld [vmem:[#allocation6 + $0x1c8] sm:$0xf] }
 0x1b5   : > { %v6587_v25 = vor.u32 %v8098_v24, %v6586_v59  ;;  %v8054_v24 = vld [vmem:[#allocation6 + $0x74] sm:$0xf0] }
 0x1b6   : > { %2245 = vmatpush.bf16.msra.mxu2 %v6515_v42  ;;  %2281 = vmatpush.bf16.msrb.mxu0 %v6519_v13  ;;  %v8068_v42 = vld [vmem:[#allocation6 + $0xec] sm:$0xf]  ;;  %v6475_v13 = vor.u32 %v8070_v40, %v6474_v26  ;;  %v8078_v26 = vld [vmem:[#allocation6 + $0x134] sm:$0xf0] }
 0x1b7   : > { %1771 = vmatmul.bf16.gmra.mxu1 %v9262_v41  ;;  %1807 = vmatmul.bf16.gmra.mxu3 %v9262_v41 }
 0x1b8   : > { %2226 = vmatpush.bf16.msra.mxu1 %v6403_v16  ;;  %2262 = vmatpush.bf16.msra.mxu3 %v6407_v33  ;;  %v6479_v16 = vor.u32 %v8068_v42, %v6476_v44  ;;  %v6458_v33 = vld [vmem:[#allocation6 + $0xc8] sm:$0xf]  ;;  %v6508_v44 = vld [vmem:[#allocation6 + $0x138] sm:$0xf0] }
 0x1b9   : > { %v6459_v54 = vor.u32 %v8066_v37, %v6458_v33  ;;  %v8074_v33 = vld [vmem:[#allocation6 + $0x114] sm:$0xf0] }
 0x1ba   : > { %2246 = vmatpush.bf16.msra.mxu2 %v6499_v23  ;;  %2282 = vmatpush.bf16.msrb.mxu0 %v6503_v55  ;;  %v6575_v23 = vor.u32 %v8092_v50, %v6572_v51  ;;  %v6490_v51 = vld [vmem:[#allocation6 + $0x108] sm:$0xf] }
 0x1bc   : > { %2227 = vmatpush.bf16.msra.mxu1 %v6387_v60  ;;  %2263 = vmatpush.bf16.msra.mxu3 %v6391_v2  ;;  %v6555_v60 = vor.u32 %v8090_v56, %v6554_v45  ;;  %v8060_v2 = vld [vmem:[#allocation6 + $0xac] sm:$0xf]  ;;  %v6380_v56 = vld [vmem:[#allocation6 + $0x38] sm:$0xf0] }
 0x1bd   : > { %v8044_v45 = vld [vmem:[#allocation6 + $0x2c] sm:$0xf] }
 0x1be   : > { %2247 = vmatpush.bf16.msra.mxu2 %v6483_v4  ;;  %2283 = vmatpush.bf16.msrb.mxu0 %v6487_v11  ;;  %v6444_v4 = vld [vmem:[#allocation6 + $0xb8] sm:$0xf0]  ;;  %v8084_v11 = vld [vmem:[#allocation6 + $0x16c] sm:$0xf]  ;;  %v6383_v61 = vor.u32 %v8044_v45, %v6380_v56  ;;  %v8213_v45 = vld [vmem:[#allocation6 + $0x56c] sm:$0xf0] }
 0x1bf   : > { %v6447_v5 = vor.u32 %v8060_v2, %v6444_v4  ;;  %v6850_v2 = vld [vmem:[#allocation6 + $0x5e0] sm:$0xf]  ;;  %v8227_v4 = vld [vmem:[#allocation6 + $0x5e4] sm:$0xf] }
 0x1c0   : > { %2228 = vmatpush.bf16.msra.mxu1 %v6371_v0  ;;  %2264 = vmatpush.bf16.msra.mxu3 %v6375_v31  ;;  %v6539_v0 = vor.u32 %v8086_v7, %v6538_v6  ;;  %v6540_v31 = vld [vmem:[#allocation6 + $0x178] sm:$0xf0]  ;;  %v8040_v7 = vld [vmem:[#allocation6 + $0xc] sm:$0xf]  ;;  %v8211_v56 = vld [vmem:[#allocation6 + $0x564] sm:$0xf] }
 0x1c1   : > { %1856 = vmatmul.bf16.vlgmr.msrb.gmra.mxu2 %v9238_v9  ;;  %1892 = vmatmul.bf16.vlgmr.msra.gmra.mxu0 %v9238_v9  ;;  %v6588_v9 = vld [vmem:[#allocation6 + $0x1d8] sm:$0xf0]  ;;  %v6543_v14 = vor.u32 %v8084_v11, %v6540_v31 }
 0x1c2   : > { %2312 = vmatpush.bf16.msrb.mxu2 %v6603_v15  ;;  %2348 = vmatpush.bf16.msra.mxu0 %v6607_v20  ;;  %v6591_v27 = vor.u32 %v8096_v10, %v6588_v9  ;;  %v6427_v15 = vor.u32 %v8058_v32, %v6426_v49  ;;  %v6431_v20 = vor.u32 %v8056_v46, %v6428_v18  ;;  %v8052_v10 = vld [vmem:[#allocation6 + $0x6c] sm:$0xf]  ;;  %v6364_v11 = vld [vmem:[#allocation6 + $0x18] sm:$0xf0]  ;;  %v8225_v49 = vld [vmem:[#allocation6 + $0x5cc] sm:$0xf0] }
 0x1c3   : > { %v6367_v31 = vor.u32 %v8040_v7, %v6364_v11  ;;  %v8223_v32 = vld [vmem:[#allocation6 + $0x5c4] sm:$0xf]  ;;  %v9295_v18 = vpack.c.bf16 %v9211_v29, %v1219_v62  ;;  %v6772_v7 = vld [vmem:[#allocation6 + $0x550] sm:$0xf0] }
 0x1c4   : > { %2229 = vmatpush.bf16.msra.mxu1 %v6355_v39  ;;  %2265 = vmatpush.bf16.msra.mxu3 %v6359_v22  ;;  %v8082_v39 = vld [vmem:[#allocation6 + $0x154] sm:$0xf0]  ;;  %v6410_v22 = vld [vmem:[#allocation6 + $0x68] sm:$0xf] }
 0x1c5   : > { %v6523_v3 = vor.u32 %v8082_v39, %v6522_v19  ;;  %v6411_v9 = vor.u32 %v8054_v24, %v6410_v22  ;;  %v6722_v19 = vld [vmem:[#allocation6 + $0x4e0] sm:$0xf]  ;;  %v8195_v39 = vld [vmem:[#allocation6 + $0x4e4] sm:$0xf]  ;;  %v6820_v24 = vld [vmem:[#allocation6 + $0x5b0] sm:$0xf0] }
 0x1c6   : > { %2313 = vmatpush.bf16.msrb.mxu2 %v6587_v25  ;;  %2349 = vmatpush.bf16.msra.mxu0 %v6591_v27  ;;  %v6412_v25 = vld [vmem:[#allocation6 + $0x78] sm:$0xf0]  ;;  %v6506_v27 = vld [vmem:[#allocation6 + $0x128] sm:$0xf]  ;;  %v8219_v22 = vld [vmem:[#allocation6 + $0x5a4] sm:$0xf] }
 0x1c7   : > { %1838 = vmatmul.bf16.vlgmr.msrb.gmra.mxu1 %v9250_v43  ;;  %1874 = vmatmul.bf16.vlgmr.msrb.gmra.mxu3 %v9250_v43  ;;  %v6460_v43 = vld [vmem:[#allocation6 + $0xd8] sm:$0xf0]  ;;  %v6415_v40 = vor.u32 %v8052_v10, %v6412_v25  ;;  %v6507_v42 = vor.u32 %v8078_v26, %v6506_v27  ;;  %v6706_v10 = vld [vmem:[#allocation6 + $0x4c0] sm:$0xf]  ;;  %v6823_v25 = vor.u32 %v8219_v22, %v6820_v24  ;;  %v8193_v27 = vld [vmem:[#allocation6 + $0x4cc] sm:$0xf0] }
 0x1c8   : > { %2294 = vmatpush.bf16.msrb.mxu1 %v6475_v13  ;;  %2330 = vmatpush.bf16.msrb.mxu3 %v6479_v16  ;;  %v6463_v55 = vor.u32 %v8064_v53, %v6460_v43  ;;  %v8076_v13 = vld [vmem:[#allocation6 + $0x12c] sm:$0xf]  ;;  %v8050_v16 = vld [vmem:[#allocation6 + $0x54] sm:$0xf0]  ;;  %v6491_v53 = vor.u32 %v8074_v33, %v6490_v51  ;;  %v6492_v43 = vld [vmem:[#allocation6 + $0x118] sm:$0xf0] }
 0x1c9   : > { %v6511_v47 = vor.u32 %v8076_v13, %v6508_v44  ;;  %v6395_v50 = vor.u32 %v8050_v16, %v6394_v36  ;;  %v8191_v26 = vld [vmem:[#allocation6 + $0x4c4] sm:$0xf]  ;;  %v6802_v44 = vld [vmem:[#allocation6 + $0x580] sm:$0xf]  ;;  %v8217_v36 = vld [vmem:[#allocation6 + $0x58c] sm:$0xf0] }
 0x1ca   : > { %2314 = vmatpush.bf16.msrb.mxu2 %v6571_v48  ;;  %2350 = vmatpush.bf16.msra.mxu0 %v6575_v23  ;;  %v8048_v48 = vld [vmem:[#allocation6 + $0x4c] sm:$0xf]  ;;  %v6803_v16 = vor.u32 %v8217_v36, %v6802_v44  ;;  %v8187_v51 = vld [vmem:[#allocation6 + $0x4a4] sm:$0xf]  ;;  %v6692_v33 = vld [vmem:[#allocation6 + $0x4b0] sm:$0xf0] }
 0x1cb   : > { %v8072_v23 = vld [vmem:[#allocation6 + $0x10c] sm:$0xf]  ;;  %v8175_v22 = vld [vmem:[#allocation6 + $0x444] sm:$0xf]  ;;  %v6644_v24 = vld [vmem:[#allocation6 + $0x450] sm:$0xf0] }
 0x1cc   : > { %2295 = vmatpush.bf16.msrb.mxu1 %v6459_v54  ;;  %2331 = vmatpush.bf16.msrb.mxu3 %v6463_v55  ;;  %v6378_v54 = vld [vmem:[#allocation6 + $0x28] sm:$0xf]  ;;  %v8046_v55 = vld [vmem:[#allocation6 + $0x34] sm:$0xf0]  ;;  %v6495_v58 = vor.u32 %v8072_v23, %v6492_v43  ;;  %v6695_v43 = vor.u32 %v8187_v51, %v6692_v33  ;;  %v8173_v36 = vld [vmem:[#allocation6 + $0x42c] sm:$0xf0] }
 0x1cd   : > { %v8230_v51 = vld [vmem:[#allocation6 + $0x5f4] sm:$0xf0]  ;;  %v8228_v33 = vld [vmem:[#allocation6 + $0x5ec] sm:$0xf] }
 0x1ce   : > { %2315 = vmatpush.bf16.msrb.mxu2 %v6555_v60  ;;  %2351 = vmatpush.bf16.msra.mxu0 %v6559_v35  ;;  %v6379_v60 = vor.u32 %v8046_v55, %v6378_v54  ;;  %v6851_v35 = vor.u32 %v8229_v21, %v6850_v2  ;;  %v1261_v54 = vld [vmem:[#allocation3 + $0x10] sm:$0x3f]  ;;  %v6786_v55 = vld [vmem:[#allocation6 + $0x560] sm:$0xf] }
 0x1cf   : > { %v8185_v2 = vld [vmem:[#allocation6 + $0x48c] sm:$0xf0]  ;;  %v9307_v11 = vpack.c.bf16 %v1261_v54, %v1261_v54 }
 0x1d0   : > { %2296 = vmatpush.bf16.msrb.mxu1 %v6443_v12  ;;  %2332 = vmatpush.bf16.msrb.mxu3 %v6447_v5  ;;  %v6852_v12 = vld [vmem:[#allocation6 + $0x5f0] sm:$0xf0]  ;;  %v6362_v5 = vld [vmem:[#allocation6 + $0x8] sm:$0xf]  ;;  %v8169_v54 = vld [vmem:[#allocation6 + $0x40c] sm:$0xf0] }
 0x1d1   : > { %1861 = vmatmul.bf16.gmra.mxu2 %v9256_v30  ;;  %1897 = vmatmul.bf16.gmra.mxu0 %v9256_v30  ;;  %v6524_v30 = vld [vmem:[#allocation6 + $0x158] sm:$0xf0]  ;;  %v6855_v6 = vor.u32 %v8227_v4, %v6852_v12  ;;  %v6363_v28 = vor.u32 %v8042_v17, %v6362_v5  ;;  %v6676_v12 = vld [vmem:[#allocation6 + $0x490] sm:$0xf0]  ;;  %v6770_v5 = vld [vmem:[#allocation6 + $0x540] sm:$0xf] }
 0x1d2   : > { %2316 = vmatpush.bf16.msrb.mxu2 %v6539_v0  ;;  %2352 = vmatpush.bf16.msra.mxu0 %v6543_v14  ;;  %v6527_v59 = vor.u32 %v8080_v38, %v6524_v30  ;;  %v6834_v0 = vld [vmem:[#allocation6 + $0x5c0] sm:$0xf]  ;;  %v6836_v14 = vld [vmem:[#allocation6 + $0x5d0] sm:$0xf0] }
 0x1d3   : > { %v6839_v46 = vor.u32 %v8223_v32, %v6836_v14  ;;  %v6724_v30 = vld [vmem:[#allocation6 + $0x4f0] sm:$0xf0]  ;;  %v8181_v32 = vld [vmem:[#allocation6 + $0x46c] sm:$0xf0]  ;;  %v8179_v14 = vld [vmem:[#allocation6 + $0x464] sm:$0xf] }
 0x1d4   : > { %2297 = vmatpush.bf16.msrb.mxu1 %v6427_v15  ;;  %2333 = vmatpush.bf16.msrb.mxu3 %v6431_v20  ;;  %v6835_v15 = vor.u32 %v8225_v49, %v6834_v0  ;;  %v8197_v20 = vld [vmem:[#allocation6 + $0x4ec] sm:$0xf0]  ;;  %v6727_v62 = vor.u32 %v8195_v39, %v6724_v30  ;;  %v6658_v49 = vld [vmem:[#allocation6 + $0x460] sm:$0xf]  ;;  %v8203_v30 = vld [vmem:[#allocation6 + $0x524] sm:$0xf] }
 0x1d5   : > { %v6723_v38 = vor.u32 %v8197_v20, %v6722_v19  ;;  %v6754_v19 = vld [vmem:[#allocation6 + $0x520] sm:$0xf]  ;;  %v8205_v20 = vld [vmem:[#allocation6 + $0x52c] sm:$0xf0] }
 0x1d6   : > { %2317 = vmatpush.bf16.msrb.mxu2 %v6523_v3  ;;  %2353 = vmatpush.bf16.msra.mxu0 %v6527_v59  ;;  %v6818_v3 = vld [vmem:[#allocation6 + $0x5a0] sm:$0xf] }
 0x1d7   : > { %1843 = vmatmul.bf16.gmra.mxu1 %v9262_v41  ;;  %1879 = vmatmul.bf16.gmra.mxu3 %v9262_v41  ;;  %v6396_v41 = vld [vmem:[#allocation6 + $0x58] sm:$0xf0]  ;;  %v6819_v59 = vor.u32 %v8221_v52, %v6818_v3  ;;  %v6756_v3 = vld [vmem:[#allocation6 + $0x530] sm:$0xf0]  ;;  %v6642_v52 = vld [vmem:[#allocation6 + $0x440] sm:$0xf] }
 0x1d8   : > { %2298 = vmatpush.bf16.msrb.mxu1 %v6411_v9  ;;  %2334 = vmatpush.bf16.msrb.mxu3 %v6415_v40  ;;  %v6399_v37 = vor.u32 %v8048_v48, %v6396_v41  ;;  %v1262_v9 = vld [vmem:[#allocation3 + $0x28] sm:$0x3f]  ;;  %v6708_v40 = vld [vmem:[#allocation6 + $0x4d0] sm:$0xf0]  ;;  %v6690_v41 = vld [vmem:[#allocation6 + $0x4a0] sm:$0xf] }
 0x1d9   : > { %v6711_v13 = vor.u32 %v8191_v26, %v6708_v40  ;;  %v6804_v48 = vld [vmem:[#allocation6 + $0x590] sm:$0xf0]  ;;  %v8199_v40 = vld [vmem:[#allocation6 + $0x504] sm:$0xf] }
 0x1da   : > { %2318 = vmatpush.bf16.msrb.mxu2 %v6507_v42  ;;  %2354 = vmatpush.bf16.msra.mxu0 %v6511_v47  ;;  %v6707_v42 = vor.u32 %v8193_v27, %v6706_v10  ;;  %v8215_v47 = vld [vmem:[#allocation6 + $0x584] sm:$0xf]  ;;  %v6647_v27 = vor.u32 %v8175_v22, %v6644_v24  ;;  %v6698_v22 = vld [vmem:[#allocation6 + $0x4a8] sm:$0xf]  ;;  %v8190_v24 = vld [vmem:[#allocation6 + $0x4b4] sm:$0xf0] }
 0x1db   : > { %v6807_v23 = vor.u32 %v8215_v47, %v6804_v48  ;;  %v8171_v47 = vld [vmem:[#allocation6 + $0x424] sm:$0xf] }
 0x1dc   : > { %2299 = vmatpush.bf16.msrb.mxu1 %v6395_v50  ;;  %2335 = vmatpush.bf16.msrb.mxu3 %v6399_v37  ;;  %v8189_v50 = vld [vmem:[#allocation6 + $0x4ac] sm:$0xf0] }
 0x1dd   : > { %v6691_v37 = vor.u32 %v8189_v50, %v6690_v41  ;;  %v6858_v50 = vld [vmem:[#allocation6 + $0x5e8] sm:$0xf] }
 0x1de   : > { %2319 = vmatpush.bf16.msrb.mxu2 %v6491_v53  ;;  %2355 = vmatpush.bf16.msra.mxu0 %v6495_v58  ;;  %v9303_v53 = vpack.c.bf16 %v1262_v9, %v1262_v9  ;;  %v6787_v58 = vor.u32 %v8213_v45, %v6786_v55  ;;  %v6738_v9 = vld [vmem:[#allocation6 + $0x500] sm:$0xf] }
 0x1e0   : > { %2300 = vmatpush.bf16.msrb.mxu1 %v6379_v60  ;;  %2336 = vmatpush.bf16.msrb.mxu3 %v6383_v61  ;;  %v6788_v60 = vld [vmem:[#allocation6 + $0x570] sm:$0xf0]  ;;  %v6674_v61 = vld [vmem:[#allocation6 + $0x480] sm:$0xf] }
 0x1e1   : > { %8621 = vmatmul.msk.bf16.vlgmr.msra.gmra.mxu2 %vm9277_vm10, %v9284_v1  ;;  %8624 = vmatmul.msk.bf16.vlgmr.msrb.gmra.mxu0 %vm9277_vm10, %v9284_v1  ;;  %v6791_v21 = vor.u32 %v8211_v56, %v6788_v60  ;;  %v6675_v4 = vor.u32 %v8185_v2, %v6674_v61  ;;  %v8167_v56 = vld [vmem:[#allocation6 + $0x404] sm:$0xf]  ;;  %v6842_v60 = vld [vmem:[#allocation6 + $0x5c8] sm:$0xf]  ;;  %v8224_v2 = vld [vmem:[#allocation6 + $0x5cc] sm:$0xf] }
 0x1e2   : > { %2791 = vmatpush.bf16.msra.mxu2 %v6851_v35  ;;  %2827 = vmatpush.bf16.msrb.mxu0 %v6855_v6  ;;  %v8183_v35 = vld [vmem:[#allocation6 + $0x484] sm:$0xf]  ;;  %v8209_v6 = vld [vmem:[#allocation6 + $0x54c] sm:$0xf0] }
 0x1e3   : > { %v6679_v17 = vor.u32 %v8183_v35, %v6676_v12  ;;  %v6771_v0 = vor.u32 %v8209_v6, %v6770_v5  ;;  %v6730_v12 = vld [vmem:[#allocation6 + $0x4e8] sm:$0xf]  ;;  %v8198_v5 = vld [vmem:[#allocation6 + $0x4f4] sm:$0xf0] }
 0x1e4   : > { %2301 = vmatpush.bf16.msrb.mxu1 %v6363_v28  ;;  %2337 = vmatpush.bf16.msrb.mxu3 %v6367_v31  ;;  %v8207_v28 = vld [vmem:[#allocation6 + $0x544] sm:$0xf]  ;;  %v6731_v6 = vor.u32 %v8198_v5, %v6730_v12 }
 0x1e5   : > { %v6775_v31 = vor.u32 %v8207_v28, %v6772_v7  ;;  %v6732_v28 = vld [vmem:[#allocation6 + $0x4f8] sm:$0xf0]  ;;  %v6826_v7 = vld [vmem:[#allocation6 + $0x5a8] sm:$0xf] }
 0x1e6   : > { %2792 = vmatpush.bf16.msra.mxu2 %v6835_v15  ;;  %2828 = vmatpush.bf16.msrb.mxu0 %v6839_v46  ;;  %v6659_v15 = vor.u32 %v8181_v32, %v6658_v49  ;;  %v6660_v46 = vld [vmem:[#allocation6 + $0x470] sm:$0xf0]  ;;  %v8220_v32 = vld [vmem:[#allocation6 + $0x5ac] sm:$0xf] }
 0x1e7   : > { %8627 = vmatmul.msk.bf16.vlgmr.msra.gmra.mxu1 %vm9277_vm10, %v9295_v18  ;;  %8630 = vmatmul.msk.bf16.vlgmr.msra.gmra.mxu3 %vm9277_vm10, %v9295_v18  ;;  %v6663_v39 = vor.u32 %v8179_v14, %v6660_v46  ;;  %v6828_v14 = vld [vmem:[#allocation6 + $0x5b8] sm:$0xf0] }
 0x1e8   : > { %2773 = vmatpush.bf16.msra.mxu1 %v6723_v38  ;;  %2809 = vmatpush.bf16.msra.mxu3 %v6727_v62  ;;  %v6755_v38 = vor.u32 %v8205_v20, %v6754_v19  ;;  %v6759_v62 = vor.u32 %v8203_v30, %v6756_v3  ;;  %v8192_v19 = vld [vmem:[#allocation6 + $0x4cc] sm:$0xf]  ;;  %v6716_v20 = vld [vmem:[#allocation6 + $0x4d8] sm:$0xf0]  ;;  %v8218_v30 = vld [vmem:[#allocation6 + $0x594] sm:$0xf0] }
 0x1e9   : > { %v8216_v3 = vld [vmem:[#allocation6 + $0x58c] sm:$0xf] }
 0x1ea   : > { %2793 = vmatpush.bf16.msra.mxu2 %v6819_v59  ;;  %2829 = vmatpush.bf16.msrb.mxu0 %v6823_v25  ;;  %v8177_v59 = vld [vmem:[#allocation6 + $0x44c] sm:$0xf0] }
 0x1eb   : > { %v6643_v10 = vor.u32 %v8177_v59, %v6642_v52  ;;  %v8201_v25 = vld [vmem:[#allocation6 + $0x50c] sm:$0xf0]  ;;  %v6812_v52 = vld [vmem:[#allocation6 + $0x598] sm:$0xf0] }
 0x1ec   : > { %2774 = vmatpush.bf16.msra.mxu1 %v6707_v42  ;;  %2810 = vmatpush.bf16.msra.mxu3 %v6711_v13  ;;  %v6739_v26 = vor.u32 %v8201_v25, %v6738_v9  ;;  %v6740_v42 = vld [vmem:[#allocation6 + $0x510] sm:$0xf0]  ;;  %v6626_v13 = vld [vmem:[#allocation6 + $0x420] sm:$0xf]  ;;  %v6815_v59 = vor.u32 %v8216_v3, %v6812_v52  ;;  %v6699_v9 = vor.u32 %v8190_v24, %v6698_v22  ;;  %v6700_v25 = vld [vmem:[#allocation6 + $0x4b8] sm:$0xf0] }
 0x1ed   : > { %v6743_v44 = vor.u32 %v8199_v40, %v6740_v42  ;;  %v6627_v48 = vor.u32 %v8173_v36, %v6626_v13  ;;  %v8214_v40 = vld [vmem:[#allocation6 + $0x574] sm:$0xf0]  ;;  %v2369_v42 = vld [vmem:[#allocation3 + $0x28] sm:$0xff]  ;;  %v6796_v36 = vld [vmem:[#allocation6 + $0x578] sm:$0xf0] }
 0x1ee   : > { %2794 = vmatpush.bf16.msra.mxu2 %v6803_v16  ;;  %2830 = vmatpush.bf16.msrb.mxu0 %v6807_v23  ;;  %v6628_v16 = vld [vmem:[#allocation6 + $0x430] sm:$0xf0]  ;;  %v6859_v23 = vor.u32 %v8230_v51, %v6858_v50  ;;  %v8184_v51 = vld [vmem:[#allocation6 + $0x48c] sm:$0xf]  ;;  %v6634_v3 = vld [vmem:[#allocation6 + $0x428] sm:$0xf] }
 0x1ef   : > { %v6631_v41 = vor.u32 %v8171_v47, %v6628_v16  ;;  %v6682_v47 = vld [vmem:[#allocation6 + $0x488] sm:$0xf]  ;;  %v8172_v22 = vld [vmem:[#allocation6 + $0x42c] sm:$0xf]  ;;  %v6636_v24 = vld [vmem:[#allocation6 + $0x438] sm:$0xf0] }
 0x1f0   : > { %2775 = vmatpush.bf16.msra.mxu1 %v6691_v37  ;;  %2811 = vmatpush.bf16.msra.mxu3 %v6695_v43  ;;  %v6860_v37 = vld [vmem:[#allocation6 + $0x5f8] sm:$0xf0]  ;;  %v6610_v43 = vld [vmem:[#allocation6 + $0x400] sm:$0xf]  ;;  %v2367_v16 = vld [vmem:[#allocation3 + $0x8] sm:$0xfc] }
 0x1f1   : > { %2253 = vmatmul.bf16.gmra.mxu2 %v9303_v53  ;;  %2289 = vmatmul.bf16.gmra.mxu0 %v9303_v53  ;;  %v6863_v55 = vor.u32 %v8228_v33, %v6860_v37  ;;  %v6611_v45 = vor.u32 %v8169_v54, %v6610_v43  ;;  %v6684_v33 = vld [vmem:[#allocation6 + $0x498] sm:$0xf0]  ;;  %v8210_v43 = vld [vmem:[#allocation6 + $0x554] sm:$0xf0]  ;;  %v8208_v54 = vld [vmem:[#allocation6 + $0x54c] sm:$0xf] }
 0x1f2   : > { %2795 = vmatpush.bf16.msra.mxu2 %v6787_v58  ;;  %2831 = vmatpush.bf16.msrb.mxu0 %v6791_v21  ;;  %v6612_v58 = vld [vmem:[#allocation6 + $0x410] sm:$0xf0]  ;;  %v6844_v21 = vld [vmem:[#allocation6 + $0x5d8] sm:$0xf0]  ;;  %v6687_v37 = vor.u32 %v8184_v51, %v6684_v33 }
 0x1f3   : > { %v6615_v61 = vor.u32 %v8167_v56, %v6612_v58  ;;  %v6847_v35 = vor.u32 %v8224_v2, %v6844_v21  ;;  %v6666_v58 = vld [vmem:[#allocation6 + $0x468] sm:$0xf]  ;;  %v6668_v2 = vld [vmem:[#allocation6 + $0x478] sm:$0xf0] }
 0x1f4   : > { %2776 = vmatpush.bf16.msra.mxu1 %v6675_v4  ;;  %2812 = vmatpush.bf16.msra.mxu3 %v6679_v17  ;;  %v8196_v17 = vld [vmem:[#allocation6 + $0x4ec] sm:$0xf]  ;;  %v6762_v21 = vld [vmem:[#allocation6 + $0x528] sm:$0xf] }
 0x1f6   : > { %2796 = vmatpush.bf16.msra.mxu2 %v6771_v0  ;;  %2832 = vmatpush.bf16.msrb.mxu0 %v6775_v31  ;;  %v8222_v0 = vld [vmem:[#allocation6 + $0x5b4] sm:$0xf0]  ;;  %v6735_v31 = vor.u32 %v8196_v17, %v6732_v28  ;;  %v2366_v17 = vld [vmem:[#allocation3] sm:$0xfc]  ;;  %v8204_v28 = vld [vmem:[#allocation6 + $0x52c] sm:$0xf] }
 0x1f7   : > { %2235 = vmatmul.bf16.gmra.mxu1 %v9307_v11  ;;  %2271 = vmatmul.bf16.gmra.mxu3 %v9307_v11  ;;  %v6827_v49 = vor.u32 %v8222_v0, %v6826_v7  ;;  %v6764_v7 = vld [vmem:[#allocation6 + $0x538] sm:$0xf0]  ;;  %v6650_v0 = vld [vmem:[#allocation6 + $0x448] sm:$0xf]  ;;  %v2370_v52 = vpack.c.bf16 %v9211_v29, %v2366_v17 }
 0x1f8   : > { %2777 = vmatpush.bf16.msra.mxu1 %v6659_v15  ;;  %2813 = vmatpush.bf16.msra.mxu3 %v6663_v39  ;;  %v8194_v15 = vld [vmem:[#allocation6 + $0x4d4] sm:$0xf0]  ;;  %v6810_v39 = vld [vmem:[#allocation6 + $0x588] sm:$0xf] }
 0x1f9   : > { %v6715_v46 = vor.u32 %v8194_v15, %v6714_v63  ;;  %v6746_v15 = vld [vmem:[#allocation6 + $0x508] sm:$0xf] }
 0x1fa   : > { %2797 = vmatpush.bf16.msra.mxu2 %v6755_v38  ;;  %2833 = vmatpush.bf16.msrb.mxu0 %v6759_v62  ;;  %v6719_v38 = vor.u32 %v8192_v19, %v6716_v20  ;;  %v6811_v62 = vor.u32 %v8218_v30, %v6810_v39  ;;  %v6748_v30 = vld [vmem:[#allocation6 + $0x518] sm:$0xf0] }
 0x1fc   : > { %2778 = vmatpush.bf16.msra.mxu1 %v6643_v10  ;;  %2814 = vmatpush.bf16.msra.mxu3 %v6647_v27  ;;  %v8188_v10 = vld [vmem:[#allocation6 + $0x4ac] sm:$0xf] }
 0x1fd   : > { %v6703_v27 = vor.u32 %v8188_v10, %v6700_v25  ;;  %v6639_v25 = vor.u32 %v8172_v22, %v6636_v24 }
 0x1fe   : > { %2798 = vmatpush.bf16.msra.mxu2 %v6739_v26  ;;  %2834 = vmatpush.bf16.msrb.mxu0 %v6743_v44  ;;  %v6794_v26 = vld [vmem:[#allocation6 + $0x568] sm:$0xf]  ;;  %v8212_v44 = vld [vmem:[#allocation6 + $0x56c] sm:$0xf] }
 0x1ff   : > { %v6795_v13 = vor.u32 %v8214_v40, %v6794_v26  ;;  %v6618_v26 = vld [vmem:[#allocation6 + $0x408] sm:$0xf]  ;;  %v8170_v40 = vld [vmem:[#allocation6 + $0x414] sm:$0xf0] }
 0x200   : > { %2779 = vmatpush.bf16.msra.mxu1 %v6627_v48  ;;  %2815 = vmatpush.bf16.msra.mxu3 %v6631_v41  ;;  %v6799_v48 = vor.u32 %v8212_v44, %v6796_v36  ;;  %v8186_v41 = vld [vmem:[#allocation6 + $0x494] sm:$0xf0]  ;;  %v6619_v44 = vor.u32 %v8170_v40, %v6618_v26 }
 0x201   : > { %8633 = vmatmul.msk.bf16.vlgmr.msrb.gmra.mxu2 %vm9277_vm10, %v9284_v1  ;;  %8636 = vmatmul.msk.bf16.vlgmr.msra.gmra.mxu0 %vm9277_vm10, %v9284_v1  ;;  %v8226_v1 = vld [vmem:[#allocation6 + $0x5d4] sm:$0xf0]  ;;  %v6683_v50 = vor.u32 %v8186_v41, %v6682_v47  ;;  %v8168_v47 = vld [vmem:[#allocation6 + $0x40c] sm:$0xf] }
 0x202   : > { %2863 = vmatpush.bf16.msrb.mxu2 %v6859_v23  ;;  %2899 = vmatpush.bf16.msra.mxu0 %v6863_v55  ;;  %v6843_v4 = vor.u32 %v8226_v1, %v6842_v60  ;;  %v6778_v23 = vld [vmem:[#allocation6 + $0x548] sm:$0xf]  ;;  %v6780_v55 = vld [vmem:[#allocation6 + $0x558] sm:$0xf0]  ;;  %v8182_v60 = vld [vmem:[#allocation6 + $0x474] sm:$0xf0] }
 0x203   : > { %v6783_v56 = vor.u32 %v8208_v54, %v6780_v55  ;;  %v6667_v1 = vor.u32 %v8182_v60, %v6666_v58 }
 0x204   : > { %2780 = vmatpush.bf16.msra.mxu1 %v6611_v45  ;;  %2816 = vmatpush.bf16.msra.mxu3 %v6615_v61  ;;  %v6779_v45 = vor.u32 %v8210_v43, %v6778_v23  ;;  %v8180_v61 = vld [vmem:[#allocation6 + $0x46c] sm:$0xf] }
 0x205   : > { %v6671_v12 = vor.u32 %v8180_v61, %v6668_v2 }
 0x206   : > { %2864 = vmatpush.bf16.msrb.mxu2 %v6843_v4  ;;  %2900 = vmatpush.bf16.msra.mxu0 %v6847_v35  ;;  %v8206_v4 = vld [vmem:[#allocation6 + $0x534] sm:$0xf0]  ;;  %v2371_v35 = vpack.c.bf16 %v9203_v8, %v2367_v16  ;;  %v6620_v16 = vld [vmem:[#allocation6 + $0x418] sm:$0xf0] }
 0x207   : > { %8639 = vmatmul.msk.bf16.vlgmr.msrb.gmra.mxu1 %vm9277_vm10, %v9295_v18  ;;  %8642 = vmatmul.msk.bf16.vlgmr.msrb.gmra.mxu3 %vm9277_vm10, %v9295_v18  ;;  %v6831_v18 = vor.u32 %v8220_v32, %v6828_v14  ;;  %v8176_v32 = vld [vmem:[#allocation6 + $0x44c] sm:$0xf]  ;;  %v6652_v14 = vld [vmem:[#allocation6 + $0x458] sm:$0xf0] }
 0x208   : > { %2845 = vmatpush.bf16.msrb.mxu1 %v6731_v6  ;;  %2881 = vmatpush.bf16.msrb.mxu3 %v6735_v31  ;;  %v2368_v6 = vld [vmem:[#allocation3 + $0x10] sm:$0xff]  ;;  %v6767_v31 = vor.u32 %v8204_v28, %v6764_v7  ;;  %v2446_v63 = vrot.slane %v2371_v35, 1  ;;  %v6655_v8 = vor.u32 %v8176_v32, %v6652_v14 }
 0x209   : > { %v2372_v20 = vpack.c.bf16 %v2368_v6, %v2368_v6 }
 0x20a   : > { %2865 = vmatpush.bf16.msrb.mxu2 %v6827_v49  ;;  %2901 = vmatpush.bf16.msra.mxu0 %v6831_v18  ;;  %v8178_v49 = vld [vmem:[#allocation6 + $0x454] sm:$0xf0] }
 0x20b   : > { %v6651_v18 = vor.u32 %v8178_v49, %v6650_v0 }
 0x20c   : > { %2846 = vmatpush.bf16.msrb.mxu1 %v6715_v46  ;;  %2882 = vmatpush.bf16.msrb.mxu3 %v6719_v38  ;;  %v8202_v46 = vld [vmem:[#allocation6 + $0x514] sm:$0xf0]  ;;  %v8200_v38 = vld [vmem:[#allocation6 + $0x50c] sm:$0xf] }
 0x20d   : > { %v6747_v39 = vor.u32 %v8202_v46, %v6746_v15 }
 0x20e   : > { %2866 = vmatpush.bf16.msrb.mxu2 %v6811_v62  ;;  %2902 = vmatpush.bf16.msra.mxu0 %v6815_v59  ;;  %v6751_v62 = vor.u32 %v8200_v38, %v6748_v30  ;;  %v8174_v59 = vld [vmem:[#allocation6 + $0x434] sm:$0xf0] }
 0x210   : > { %2847 = vmatpush.bf16.msrb.mxu1 %v6699_v9  ;;  %2883 = vmatpush.bf16.msrb.mxu3 %v6703_v27  ;;  %v6635_v9 = vor.u32 %v8174_v59, %v6634_v3  ;;  %v2444_v27 = vrot.slane %v2372_v20, 1 }
 0x211   : > { %2325 = vmatmul.bf16.gmra.mxu2 %v9303_v53  ;;  %2361 = vmatmul.bf16.gmra.mxu0 %v9303_v53  ;;  %v2373_v53 = vpack.c.bf16 %v2369_v42, %v2369_v42 }
 0x212   : > { %2867 = vmatpush.bf16.msrb.mxu2 %v6795_v13  ;;  %2903 = vmatpush.bf16.msra.mxu0 %v6799_v48  ;;  %v2443_v13 = vrot.slane %v2370_v52, 1 }
 0x213   : > { %v9328_v5 = vrot.slane %v2373_v53, 1 }
 0x214   : > { %2848 = vmatpush.bf16.msrb.mxu1 %v6683_v50  ;;  %2884 = vmatpush.bf16.msrb.mxu3 %v6687_v37  ;;  %v2445_v41 = vsel %vm1079_vm7, %v2443_v13, %v2444_v27  ;;  %v6623_v50 = vor.u32 %v8168_v47, %v6620_v16 }
 0x215   : > { %v2448_v10 = vsel %vm1079_vm7, %v2446_v63, %v9328_v5 }
 0x216   : > { %2868 = vmatpush.bf16.msrb.mxu2 %v6779_v45  ;;  %2904 = vmatpush.bf16.msra.mxu0 %v6783_v56 }
 0x217   : > { %2307 = vmatmul.bf16.gmra.mxu1 %v9307_v11  ;;  %2343 = vmatmul.bf16.gmra.mxu3 %v9307_v11  ;;  %v6763_v11 = vor.u32 %v8206_v4, %v6762_v21 }
 0x218   : > { %2849 = vmatpush.bf16.msrb.mxu1 %v6667_v1  ;;  %2885 = vmatpush.bf16.msrb.mxu3 %v6671_v12 }
 0x21a   : > { %2869 = vmatpush.bf16.msrb.mxu2 %v6763_v11  ;;  %2905 = vmatpush.bf16.msra.mxu0 %v6767_v31 }
 0x21c   : > { %2850 = vmatpush.bf16.msrb.mxu1 %v6651_v18  ;;  %2886 = vmatpush.bf16.msrb.mxu3 %v6655_v8 }
 0x21e   : > { %v1821_v19 = vpop.f32.mrf.mxu0  ;;  %2870 = vmatpush.bf16.msrb.mxu2 %v6747_v39  ;;  %2906 = vmatpush.bf16.msra.mxu0 %v6751_v62 }
 0x220   : > { %2851 = vmatpush.bf16.msrb.mxu1 %v6635_v9  ;;  %2887 = vmatpush.bf16.msrb.mxu3 %v6639_v25 }
 0x221   : > { %2799 = vmatmul.bf16.vlgmr.msra.gmra.mxu2 %v2448_v10  ;;  %2835 = vmatmul.bf16.vlgmr.msrb.gmra.mxu0 %v2448_v10 }
 0x224   : > { %v1767_v42 = vpop.f32.mrf.mxu1  ;;  %v1785_v29 = vpop.f32.mrf.mxu2  ;;  %2852 = vmatpush.bf16.msrb.mxu1 %v6619_v44  ;;  %2888 = vmatpush.bf16.msrb.mxu3 %v6623_v50 }
 0x225   : > { %v1786_v36 = vadd.f32 %v1785_v29, %v1767_v42 }
 0x226   : > { %v9333_v48 = vpop.f32.mrf.mxu0 }
 0x227   : > { %2781 = vmatmul.bf16.vlgmr.msra.gmra.mxu1 %v2445_v41  ;;  %2817 = vmatmul.bf16.vlgmr.msra.gmra.mxu3 %v2445_v41 }
 0x22a   : > { %v1803_v51 = vpop.f32.mrf.mxu3 }
 0x22b   : > { %v1822_v33 = vadd.f32 %v1821_v19, %v1803_v51 }
 0x22c   : > { %v9336_v23 = vpop.f32.mrf.mxu1  ;;  %v9338_v53 = vpop.f32.mrf.mxu2 }
 0x22e   : > { %v1826_v37 = vpop.f32.mrf.mxu0 }
 0x231   : > { %2804 = vmatmul.bf16.gmra.mxu2 %v9328_v5  ;;  %2840 = vmatmul.bf16.gmra.mxu0 %v9328_v5 }
 0x232   : > { %v9342_v43 = vpop.f32.mrf.mxu3 }
 0x234   : > { %v1772_v54 = vpop.f32.mrf.mxu1  ;;  %v1790_v55 = vpop.f32.mrf.mxu2 }
 0x235   : > { %v1791_v45 = vadd.f32 %v1790_v55, %v1772_v54 }
 0x236   : > { %v1828_v56 = vpop.f32.mrf.mxu0 }
 0x237   : > { %2786 = vmatmul.bf16.gmra.mxu1 %v2444_v27  ;;  %2822 = vmatmul.bf16.gmra.mxu3 %v2444_v27 }
 0x23a   : > { %v1808_v58 = vpop.f32.mrf.mxu3 }
 0x23b   : > { %v1827_v60 = vadd.f32 %v1826_v37, %v1808_v58 }
 0x23c   : > { %v1774_v61 = vpop.f32.mrf.mxu1  ;;  %v1792_v1 = vpop.f32.mrf.mxu2 }
 0x23e   : > { %v1893_v2 = vpop.f32.mrf.mxu0 }
 0x241   : > { %2871 = vmatmul.bf16.vlgmr.msrb.gmra.mxu2 %v2448_v10  ;;  %2907 = vmatmul.bf16.vlgmr.msra.gmra.mxu0 %v2448_v10 }
 0x242   : > { %v1810_v21 = vpop.f32.mrf.mxu3 }
 0x243   : > { %v8310_v21 = vld [vmem:[#allocation8 + $0x274] sm:$0xf0] }
 0x244   : > { %v1839_v4 = vpop.f32.mrf.mxu1  ;;  %v1857_v35 = vpop.f32.mrf.mxu2 }
 0x245   : > { %v1858_v12 = vadd.f32 %v1857_v35, %v1839_v4 }
 0x246   : > { %v9344_v17 = vpop.f32.mrf.mxu0 }
 0x247   : > { %2853 = vmatmul.bf16.vlgmr.msrb.gmra.mxu1 %v2445_v41  ;;  %2889 = vmatmul.bf16.vlgmr.msrb.gmra.mxu3 %v2445_v41 }
 0x24a   : > { %v1875_v6 = vpop.f32.mrf.mxu3 }
 0x24b   : > { %v1894_v11 = vadd.f32 %v1893_v2, %v1875_v6  ;;  %v6922_v2 = vld [vmem:[#allocation8 + $0x270] sm:$0xf] }
 0x24c   : > { %v9346_v28 = vpop.f32.mrf.mxu1  ;;  %v9348_v7 = vpop.f32.mrf.mxu2 }
 0x24e   : > { %v1898_v0 = vpop.f32.mrf.mxu0 }
 0x251   : > { %2876 = vmatmul.bf16.gmra.mxu2 %v9328_v5  ;;  %2912 = vmatmul.bf16.gmra.mxu0 %v9328_v5 }
 0x252   : > { %v9352_v31 = vpop.f32.mrf.mxu3 }
 0x254   : > { %v1844_v49 = vpop.f32.mrf.mxu1  ;;  %v1862_v32 = vpop.f32.mrf.mxu2 }
 0x255   : > { %v1863_v14 = vadd.f32 %v1862_v32, %v1844_v49  ;;  %v8308_v32 = vld [vmem:[#allocation8 + $0x264] sm:$0xf0] }
 0x256   : > { %v1900_v63 = vpop.f32.mrf.mxu0 }
 0x257   : > { %2858 = vmatmul.bf16.gmra.mxu1 %v2444_v27  ;;  %2894 = vmatmul.bf16.gmra.mxu3 %v2444_v27 }
 0x25a   : > { %v1880_v18 = vpop.f32.mrf.mxu3 }
 0x25b   : > { %v1899_v8 = vadd.f32 %v1898_v0, %v1880_v18  ;;  %v6986_v18 = vld [vmem:[#allocation8 + $0x2f0] sm:$0xf] }
 0x25c   : > { %v1846_v15 = vpop.f32.mrf.mxu1  ;;  %v1864_v46 = vpop.f32.mrf.mxu2 }
 0x25d   : > { %v8326_v15 = vld [vmem:[#allocation8 + $0x2f4] sm:$0xf0] }
 0x25e   : > { %v2285_v19 = vpop.f32.mrf.mxu0 }
 0x262   : > { %v1882_v20 = vpop.f32.mrf.mxu3 }
 0x264   : > { %v2231_v39 = vpop.f32.mrf.mxu1  ;;  %v2249_v38 = vpop.f32.mrf.mxu2 }
 0x265   : > { %v2232_v30 = vadd.f32 %v2231_v39, %v1786_v36  ;;  %v6906_v39 = vld [vmem:[#allocation8 + $0x250] sm:$0xf] }
 0x266   : > { %v9354_v3 = vpop.f32.mrf.mxu0 }
 0x267   : > { %v9356_v5 = vadd.f32 %v2249_v38, %v2232_v30  ;;  %v8306_v38 = vld [vmem:[#allocation8 + $0x254] sm:$0xf0] }
 0x26a   : > { %v2267_v52 = vpop.f32.mrf.mxu3 }
 0x26b   : > { %v2268_v62 = vadd.f32 %v2267_v52, %v1822_v33 }
 0x26c   : > { %v9358_v59 = vpop.f32.mrf.mxu1  ;;  %v9360_v22 = vpop.f32.mrf.mxu2 }
 0x26d   : > { %v9362_v24 = vadd.f32 %v2285_v19, %v2268_v62  ;;  %v6987_v19 = vor.u32 %v8326_v15, %v6986_v18  ;;  %v6907_v62 = vor.u32 %v8306_v38, %v6906_v39 }
 0x26e   : > { %v2290_v10 = vpop.f32.mrf.mxu0 }
 0x26f   : > { %3578 = vmatpush.bf16.msra.mxu2 %v6987_v19  ;;  %v6954_v19 = vld [vmem:[#allocation8 + $0x2b0] sm:$0xf] }
 0x272   : > { %v9364_v9 = vpop.f32.mrf.mxu3 }
 0x274   : > { %v2236_v25 = vpop.f32.mrf.mxu1  ;;  %v2254_v27 = vpop.f32.mrf.mxu2 }
 0x275   : > { %v2237_v26 = vadd.f32 %v2236_v25, %v1791_v45  ;;  %v8324_v25 = vld [vmem:[#allocation8 + $0x2e4] sm:$0xf0] }
 0x276   : > { %v2292_v40 = vpop.f32.mrf.mxu0 }
 0x277   : > { %v9366_v42 = vadd.f32 %v2254_v27, %v2237_v26  ;;  %v6898_v40 = vld [vmem:[#allocation8 + $0x240] sm:$0xf] }
 0x27a   : > { %v2272_v29 = vpop.f32.mrf.mxu3 }
 0x27b   : > { %v2273_v13 = vadd.f32 %v2272_v29, %v1827_v60  ;;  %v8304_v29 = vld [vmem:[#allocation8 + $0x244] sm:$0xf0] }
 0x27c   : > { %v2238_v44 = vpop.f32.mrf.mxu1  ;;  %v2256_v36 = vpop.f32.mrf.mxu2 }
 0x27d   : > { %v9368_v47 = vadd.f32 %v2290_v10, %v2273_v13  ;;  %v6978_v10 = vld [vmem:[#allocation8 + $0x2e0] sm:$0xf]  ;;  %v6899_v13 = vor.u32 %v8304_v29, %v6898_v40  ;;  %v6970_v44 = vld [vmem:[#allocation8 + $0x2d0] sm:$0xf]  ;;  %v8322_v36 = vld [vmem:[#allocation8 + $0x2d4] sm:$0xf0] }
 0x27e   : > { %v2357_v16 = vpop.f32.mrf.mxu0  ;;  %v6979_v26 = vor.u32 %v8324_v25, %v6978_v10 }
 0x280   : > { %3579 = vmatpush.bf16.msra.mxu2 %v6979_v26 }
 0x282   : > { %v2274_v41 = vpop.f32.mrf.mxu3 }
 0x283   : > { %v6971_v41 = vor.u32 %v8322_v36, %v6970_v44  ;;  %v8316_v44 = vld [vmem:[#allocation8 + $0x2a4] sm:$0xf0] }
 0x284   : > { %v2303_v50 = vpop.f32.mrf.mxu1  ;;  %v2321_v51 = vpop.f32.mrf.mxu2 }
 0x285   : > { %v2304_v33 = vadd.f32 %v2303_v50, %v1858_v12  ;;  %v6923_v12 = vor.u32 %v8310_v21, %v6922_v2  ;;  %v6890_v50 = vld [vmem:[#allocation8 + $0x230] sm:$0xf]  ;;  %3580 = vmatpush.bf16.msra.mxu2 %v6971_v41  ;;  %v8320_v2 = vld [vmem:[#allocation8 + $0x2c4] sm:$0xf0]  ;;  %v6882_v21 = vld [vmem:[#allocation8 + $0x220] sm:$0xf] }
 0x286   : > { %v9370_v37 = vpop.f32.mrf.mxu0  ;;  %v6866_v41 = vld [vmem:[#allocation8 + $0x200] sm:$0xf] }
 0x287   : > { %v9372_v54 = vadd.f32 %v2321_v51, %v2304_v33  ;;  %3560 = vmatpush.bf16.msra.mxu1 %v6923_v12  ;;  %v8302_v51 = vld [vmem:[#allocation8 + $0x234] sm:$0xf0] }
 0x28a   : > { %v2339_v55 = vpop.f32.mrf.mxu3 }
 0x28b   : > { %v2340_v45 = vadd.f32 %v2339_v55, %v1894_v11  ;;  %v6914_v11 = vld [vmem:[#allocation8 + $0x260] sm:$0xf] }
 0x28c   : > { %v9374_v56 = vpop.f32.mrf.mxu1  ;;  %v9376_v58 = vpop.f32.mrf.mxu2  ;;  %v6915_v63 = vor.u32 %v8308_v32, %v6914_v11 }
 0x28d   : > { %v9378_v60 = vadd.f32 %v2357_v16, %v2340_v45  ;;  %v9389_v16 = vld [vmem:[%s9951_s9] sm:$0xf]  ;;  %v6891_v45 = vor.u32 %v8302_v51, %v6890_v50  ;;  %v8296_v50 = vld [vmem:[#allocation8 + $0x204] sm:$0xf0] }
 0x28e   : > { %v2362_v61 = vpop.f32.mrf.mxu0  ;;  %3561 = vmatpush.bf16.msra.mxu1 %v6915_v63  ;;  %v1788_v63 = vadd.f32 %v9338_v53, %v9336_v23  ;;  %v9407_v23 = vperm.slane %v9389_v16, 1  ;;  %v6874_v53 = vld [vmem:[#allocation8 + $0x210] sm:$0xf]  ;;  %v6867_v51 = vor.u32 %v8296_v50, %v6866_v41  ;;  %v8358_v41 = vld [vmem:[#allocation8 + $0x3f4] sm:$0xf0] }
 0x290   : > { %v2234_v15 = vadd.f32 %v9358_v59, %v1788_v63  ;;  %v1824_v59 = vadd.f32 %v9333_v48, %v9342_v43 }
 0x292   : > { %v9380_v1 = vpop.f32.mrf.mxu3  ;;  %3562 = vmatpush.bf16.msra.mxu1 %v6907_v62  ;;  %v2252_v26 = vadd.f32 %v9360_v22, %v2234_v15  ;;  %v2270_v43 = vadd.f32 %v9364_v9, %v1824_v59 }
 0x294   : > { %v2308_v4 = vpop.f32.mrf.mxu1  ;;  %v2326_v35 = vpop.f32.mrf.mxu2 }
 0x295   : > { %v2309_v6 = vadd.f32 %v2308_v4, %v1863_v14 }
 0x296   : > { %v2364_v0 = vpop.f32.mrf.mxu0  ;;  %3563 = vmatpush.bf16.msra.mxu1 %v6899_v13  ;;  %v6946_v13 = vld [vmem:[#allocation8 + $0x2a0] sm:$0xf] }
 0x297   : > { %v9382_v49 = vadd.f32 %v2326_v35, %v2309_v6  ;;  %v9392_v35 = vperm.slane %v9389_v16, 0  ;;  %v8300_v6 = vld [vmem:[#allocation8 + $0x224] sm:$0xf0]  ;;  %v9395_v0 = vadd.s32 4294967293, %v9112_v57  ;;  %v6947_v48 = vor.u32 %v8316_v44, %v6946_v13  ;;  %v6916_v13 = vld [vmem:[#allocation8 + $0x268] sm:$0xf0] }
 0x298   : > { %v6883_v32 = vor.u32 %v8300_v6, %v6882_v21  ;;  %v2288_v21 = vadd.f32 %v9354_v3, %v2270_v43  ;;  %v7050_v6 = vld [vmem:[#allocation8 + $0x370] sm:$0xf] }
 0x299   : > { %vm2968_vm11 = vcmp.ge.s32.totalorder %v9395_v0, 0 }
 0x29a   : > { %v2344_v46 = vpop.f32.mrf.mxu3  ;;  %3564 = vmatpush.bf16.msra.mxu1 %v6891_v45  ;;  %v8314_v45 = vld [vmem:[#allocation8 + $0x294] sm:$0xf0]  ;;  %vm9584_vm13 = vmpackc.low %vm8928_vm2, %vm2968_vm11 }
 0x29b   : > { %v2345_v20 = vadd.f32 %v2344_v46, %v1899_v8 }
 0x29c   : > { %v2310_v30 = vpop.f32.mrf.mxu1  ;;  %v2328_v52 = vpop.f32.mrf.mxu2 }
 0x29d   : > { %v9384_v14 = vadd.f32 %v2362_v61, %v2345_v20  ;;  %v6962_v61 = vld [vmem:[#allocation8 + $0x2c0] sm:$0xf]  ;;  %v8318_v20 = vld [vmem:[#allocation8 + $0x2b4] sm:$0xf0] }
 0x29e   : > { %v2836_v27 = vpop.f32.mrf.mxu0  ;;  %v6963_v12 = vor.u32 %v8320_v2, %v6962_v61  ;;  %3565 = vmatpush.bf16.msra.mxu1 %v6883_v32  ;;  %v6955_v38 = vor.u32 %v8318_v20, %v6954_v19  ;;  %v8342_v32 = vld [vmem:[#allocation8 + $0x374] sm:$0xf0]  ;;  %v8309_v19 = vld [vmem:[#allocation8 + $0x274] sm:$0xf]  ;;  %v6924_v20 = vld [vmem:[#allocation8 + $0x278] sm:$0xf0] }
 0x29f   : > { %v7051_v15 = vor.u32 %v8342_v32, %v7050_v6  ;;  %v6927_v3 = vor.u32 %v8309_v19, %v6924_v20  ;;  %v8338_v6 = vld [vmem:[#allocation8 + $0x354] sm:$0xf0]  ;;  %v8305_v32 = vld [vmem:[#allocation8 + $0x254] sm:$0xf] }
 0x2a0   : > { %3581 = vmatpush.bf16.msra.mxu2 %v6963_v12 }
 0x2a1   : > { %3596 = vmatpush.bf16.msra.mxu3 %v7051_v15 }
 0x2a2   : > { %v2346_v8 = vpop.f32.mrf.mxu3 }
 0x2a4   : > { %v2782_v33 = vpop.f32.mrf.mxu1  ;;  %v2800_v55 = vpop.f32.mrf.mxu2  ;;  %3582 = vmatpush.bf16.msra.mxu2 %v6955_v38 }
 0x2a5   : > { %v2801_v4 = vadd.f32 %v2800_v55, %v2782_v33  ;;  %v6938_v55 = vld [vmem:[#allocation8 + $0x290] sm:$0xf] }
 0x2a6   : > { %v2838_v11 = vpop.f32.mrf.mxu0  ;;  %v6939_v2 = vor.u32 %v8314_v45, %v6938_v55  ;;  %v6988_v55 = vld [vmem:[#allocation8 + $0x2f8] sm:$0xf0] }
 0x2a7   : > { %v2917_v18 = vadd.f32 %v2801_v4, %v9356_v5  ;;  %v8298_v5 = vld [vmem:[#allocation8 + $0x214] sm:$0xf0] }
 0x2a8   : > { %v6875_v25 = vor.u32 %v8298_v5, %v6874_v53  ;;  %3583 = vmatpush.bf16.msra.mxu2 %v6947_v48  ;;  %v8312_v53 = vld [vmem:[#allocation8 + $0x284] sm:$0xf0]  ;;  %v9433_v5 = vadd.s32 4294967293, %v9125_v34 }
 0x2a9   : > { %v9402_v46 = vadd.f32 %v9392_v35, %v2917_v18 }
 0x2aa   : > { %v2818_v39 = vpop.f32.mrf.mxu3  ;;  %3566 = vmatpush.bf16.msra.mxu1 %v6875_v25  ;;  %vm2973_vm12 = vcmp.lt.s32.totalorder %v9433_v5, 16  ;;  %v8236_v5 = vld [vmem:[#allocation8 + $0x24] sm:$0xf0] }
 0x2ab   : > { %v2951_v30 = vmax.f32 %v9402_v46, 0.0  ;;  %v2837_v52 = vadd.f32 %v2836_v27, %v2818_v39 }
 0x2ac   : > { %v2784_v62 = vpop.f32.mrf.mxu1  ;;  %v2802_v10 = vpop.f32.mrf.mxu2  ;;  %3584 = vmatpush.bf16.msra.mxu2 %v6939_v2 }
 0x2ad   : > { %v2983_v40 = vsel %vm2968_vm11, %v2951_v30, 0.0  ;;  %v2918_v27 = vadd.f32 %v2837_v52, %v9362_v24  ;;  %v2803_v29 = vadd.f32 %v2802_v10, %v2784_v62  ;;  %v6930_v52 = vld [vmem:[#allocation8 + $0x280] sm:$0xf]  ;;  %v8340_v10 = vld [vmem:[#allocation8 + $0x364] sm:$0xf0] }
 0x2ae   : > { %2995 = vst [vmem:[#allocation2 + $0x18] sm:$0xff] %v2983_v40  ;;  %v9417_v36 = vpop.f32.mrf.mxu0  ;;  %3567 = vmatpush.bf16.msra.mxu1 %v6867_v51  ;;  %v7042_v62 = vld [vmem:[#allocation8 + $0x360] sm:$0xf] }
 0x2af   : > { %v9421_v8 = vadd.f32 %v9407_v23, %v2918_v27  ;;  %v2921_v22 = vadd.f32 %v2803_v29, %v2252_v26  ;;  %v7043_v27 = vor.u32 %v8340_v10, %v7042_v62  ;;  %v8307_v29 = vld [vmem:[#allocation8 + $0x264] sm:$0xf]  ;;  %v7026_v62 = vld [vmem:[#allocation8 + $0x340] sm:$0xf]  ;;  %v8336_v10 = vld [vmem:[#allocation8 + $0x344] sm:$0xf0] }
 0x2b0   : > { %v6919_v44 = vor.u32 %v8307_v29, %v6916_v13 }
 0x2b1   : > { %v2952_v24 = vmax.f32 %v9421_v8, 0.0  ;;  %v2943_v33 = vadd.f32 %v9392_v35, %v2921_v22  ;;  %v7114_v22 = vld [vmem:[#allocation8 + $0x3f0] sm:$0xf]  ;;  %3597 = vmatpush.bf16.msra.mxu3 %v7043_v27  ;;  %v6900_v27 = vld [vmem:[#allocation8 + $0x248] sm:$0xf0] }
 0x2b2   : > { %v2820_v61 = vpop.f32.mrf.mxu3  ;;  %3632 = vmatpush.bf16.msrb.mxu1 %v6927_v3 }
 0x2b3   : > { %v2984_v9 = vsel %vm2968_vm11, %v2952_v24, 0.0  ;;  %v9430_v4 = vmax.f32 %v2943_v33, 0.0  ;;  %v2839_v12 = vadd.f32 %v2838_v11, %v2820_v61  ;;  %v6931_v11 = vor.u32 %v8312_v53, %v6930_v52  ;;  %v8325_v33 = vld [vmem:[#allocation8 + $0x2f4] sm:$0xf]  ;;  %v8323_v53 = vld [vmem:[#allocation8 + $0x2e4] sm:$0xf] }
 0x2b4   : > { %2996 = vst [vmem:[#allocation2 + $0x48] sm:$0xff] %v2984_v9  ;;  %v2787_v63 = vpop.f32.mrf.mxu1  ;;  %v2805_v18 = vpop.f32.mrf.mxu2 }
 0x2b5   : > { %v2922_v39 = vadd.f32 %v2839_v12, %v2288_v21  ;;  %v2806_v38 = vadd.f32 %v2805_v18, %v2787_v63  ;;  %v3091_v40 = vld [vmem:[#allocation2 + $0x18] sm:$0xfe]  ;;  %3585 = vmatpush.bf16.msra.mxu2 %v6931_v11  ;;  %v7034_v21 = vld [vmem:[#allocation8 + $0x350] sm:$0xf] }
 0x2b6   : > { %v2843_v59 = vpop.f32.mrf.mxu0  ;;  %v9442_v51 = vpack.c.bf16 %v9430_v4, %v3091_v40  ;;  %3633 = vmatpush.bf16.msrb.mxu1 %v6919_v44  ;;  %v6908_v63 = vld [vmem:[#allocation8 + $0x258] sm:$0xf0]  ;;  %v7035_v19 = vor.u32 %v8338_v6, %v7034_v21  ;;  %v8303_v40 = vld [vmem:[#allocation8 + $0x244] sm:$0xf]  ;;  %v7098_v44 = vld [vmem:[#allocation8 + $0x3d0] sm:$0xf] }
 0x2b7   : > { %v2944_v25 = vadd.f32 %v9407_v23, %v2922_v39  ;;  %v2925_v26 = vadd.f32 %v2806_v38, %v9366_v42  ;;  %v7115_v42 = vor.u32 %v8358_v41, %v7114_v22  ;;  %v6911_v20 = vor.u32 %v8305_v32, %v6908_v63  ;;  %v7106_v39 = vld [vmem:[#allocation8 + $0x3e0] sm:$0xf]  ;;  %v8301_v6 = vld [vmem:[#allocation8 + $0x234] sm:$0xf]  ;;  %v6892_v32 = vld [vmem:[#allocation8 + $0x238] sm:$0xf0] }
 0x2b8   : > { %v3175_v3 = vshll.u32 %v9442_v51, 16  ;;  %3598 = vmatpush.bf16.msra.mxu3 %v7035_v19  ;;  %v6903_v13 = vor.u32 %v8303_v40, %v6900_v27  ;;  %v1860_v63 = vadd.f32 %v9348_v7, %v9346_v28  ;;  %v6895_v19 = vor.u32 %v8301_v6, %v6892_v32  ;;  %v8332_v7 = vld [vmem:[#allocation8 + $0x324] sm:$0xf0] }
 0x2b9   : > { %v9437_v48 = vmax.f32 %v2944_v25, 0.0  ;;  %v2947_v43 = vadd.f32 %v9392_v35, %v2925_v26  ;;  %v6991_v35 = vor.u32 %v8325_v33, %v6988_v55  ;;  %3614 = vmatpush.bf16.msrb.mxu0 %v7115_v42  ;;  %v7027_v26 = vor.u32 %v8336_v10, %v7026_v62  ;;  %v8321_v42 = vld [vmem:[#allocation8 + $0x2d4] sm:$0xf]  ;;  %v6972_v33 = vld [vmem:[#allocation8 + $0x2d8] sm:$0xf0] }
 0x2ba   : > { %v2823_v50 = vpop.f32.mrf.mxu3  ;;  %3634 = vmatpush.bf16.msrb.mxu1 %v6911_v20  ;;  %v3177_v41 = vrot.slane %v3175_v3, 1  ;;  %v7090_v20 = vld [vmem:[#allocation8 + $0x3c0] sm:$0xf]  ;;  %v2306_v62 = vadd.f32 %v9374_v56, %v1860_v63  ;;  %v3173_v40 = vshrl.u32 %v9442_v51, 16  ;;  %v1896_v56 = vadd.f32 %v9344_v17, %v9352_v31  ;;  %v6876_v63 = vld [vmem:[#allocation8 + $0x218] sm:$0xf0] }
 0x2bb   : > { %3000 = vst [vmem:[#allocation2 + $0x28] sm:$0xff] %v9437_v48  ;;  %v2959_v45 = vmax.f32 %v2947_v43, 0.0  ;;  %v2842_v61 = vadd.f32 %v9417_v36, %v2823_v50  ;;  %v3092_v2 = vld [vmem:[#allocation2 + $0x48] sm:$0xfe]  ;;  %3650 = vmatpush.bf16.msrb.mxu2 %v6991_v35  ;;  %v8354_v43 = vld [vmem:[#allocation8 + $0x3d4] sm:$0xf0] }
 0x2bc   : > { %v2789_v9 = vpop.f32.mrf.mxu1  ;;  %v2807_v12 = vpop.f32.mrf.mxu2  ;;  %v8356_v36 = vld [vmem:[#allocation8 + $0x3e4] sm:$0xf0]  ;;  %v9454_v11 = vpack.c.bf16 %v9437_v48, %v3092_v2  ;;  %v7099_v50 = vor.u32 %v8354_v43, %v7098_v44  ;;  %3599 = vmatpush.bf16.msra.mxu3 %v7027_v26  ;;  %v7018_v2 = vld [vmem:[#allocation8 + $0x330] sm:$0xf]  ;;  %v8334_v35 = vld [vmem:[#allocation8 + $0x334] sm:$0xf0]  ;;  %v3178_v51 = vor.u32 %v3177_v41, %v3173_v40 }
 0x2bd   : > { %v2991_v18 = vsel %vm2973_vm12, %v2959_v45, 0.0  ;;  %v2926_v15 = vadd.f32 %v2842_v61, %v9368_v47  ;;  %v7107_v52 = vor.u32 %v8356_v36, %v7106_v39  ;;  %v6980_v47 = vld [vmem:[#allocation8 + $0x2e8] sm:$0xf0]  ;;  %v6975_v61 = vor.u32 %v8321_v42, %v6972_v33  ;;  %v8352_v39 = vld [vmem:[#allocation8 + $0x3c4] sm:$0xf0] }
 0x2be   : > { %3003 = vst [vmem:[#allocation2 + $0x50] sm:$0x3f] %v2991_v18  ;;  %v9449_v38 = vpop.f32.mrf.mxu0  ;;  %v6983_v25 = vor.u32 %v8323_v53, %v6980_v47  ;;  %v3187_v45 = vshll.u32 %v9454_v11, 16  ;;  %3635 = vmatpush.bf16.msrb.mxu1 %v6903_v13  ;;  %v7019_v12 = vor.u32 %v8334_v35, %v7018_v2  ;;  %v8319_v53 = vld [vmem:[#allocation8 + $0x2c4] sm:$0xf] }
 0x2bf   : > { %v2948_v59 = vadd.f32 %v9407_v23, %v2926_v15  ;;  %3615 = vmatpush.bf16.msrb.mxu0 %v7107_v52  ;;  %v9457_v23 = vperm.slane %v9389_v16, 2  ;;  %v7091_v52 = vor.u32 %v8352_v39, %v7090_v20  ;;  %v7010_v47 = vld [vmem:[#allocation8 + $0x320] sm:$0xf]  ;;  %v6884_v26 = vld [vmem:[#allocation8 + $0x228] sm:$0xf0] }
 0x2c0   : > { %3651 = vmatpush.bf16.msrb.mxu2 %v6983_v25  ;;  %3600 = vmatpush.bf16.msra.mxu3 %v7019_v12  ;;  %v8299_v25 = vld [vmem:[#allocation8 + $0x224] sm:$0xf]  ;;  %v7082_v44 = vld [vmem:[#allocation8 + $0x3b0] sm:$0xf]  ;;  %v8350_v43 = vld [vmem:[#allocation8 + $0x3b4] sm:$0xf0] }
 0x2c1   : > { %v2960_v29 = vmax.f32 %v2948_v59, 0.0  ;;  %v6964_v59 = vld [vmem:[#allocation8 + $0x2c8] sm:$0xf0]  ;;  %v6887_v13 = vor.u32 %v8299_v25, %v6884_v26  ;;  %v6956_v42 = vld [vmem:[#allocation8 + $0x2b8] sm:$0xf0]  ;;  %v3189_v6 = vrot.slane %v3187_v45, 1 }
 0x2c2   : > { %v2825_v22 = vpop.f32.mrf.mxu3  ;;  %3636 = vmatpush.bf16.msrb.mxu1 %v6895_v19  ;;  %v6967_v28 = vor.u32 %v8319_v53, %v6964_v59  ;;  %v7002_v33 = vld [vmem:[#allocation8 + $0x310] sm:$0xf]  ;;  %v7074_v39 = vld [vmem:[#allocation8 + $0x3a0] sm:$0xf]  ;;  %v8328_v40 = vld [vmem:[#allocation8 + $0x304] sm:$0xf0] }
 0x2c3   : > { %v2992_v55 = vsel %vm2973_vm12, %v2960_v29, 0.0  ;;  %3616 = vmatpush.bf16.msrb.mxu0 %v7099_v50  ;;  %v7011_v29 = vor.u32 %v8332_v7, %v7010_v47  ;;  %v7083_v22 = vor.u32 %v8350_v43, %v7082_v44  ;;  %v8317_v50 = vld [vmem:[#allocation8 + $0x2b4] sm:$0xf]  ;;  %v6948_v47 = vld [vmem:[#allocation8 + $0x2a8] sm:$0xf0]  ;;  %v3185_v7 = vshrl.u32 %v9454_v11, 16 }
 0x2c4   : > { %3004 = vst [vmem:[#allocation2 + $0x40] sm:$0x3f] %v2992_v55  ;;  %v2854_v21 = vpop.f32.mrf.mxu1  ;;  %v2872_v9 = vpop.f32.mrf.mxu2  ;;  %3652 = vmatpush.bf16.msrb.mxu2 %v6975_v61  ;;  %v9476_v61 = vperm.slane %v9389_v16, 3  ;;  %v6959_v35 = vor.u32 %v8317_v50, %v6956_v42  ;;  %v6868_v44 = vld [vmem:[#allocation8 + $0x208] sm:$0xf0] }
 0x2c5   : > { %v2873_v18 = vadd.f32 %v2872_v9, %v2854_v21  ;;  %v3095_v15 = vld [vmem:[#allocation2 + $0x50] sm:$0x1f]  ;;  %v8330_v21 = vld [vmem:[#allocation8 + $0x314] sm:$0xf0]  ;;  %3601 = vmatpush.bf16.msra.mxu3 %v7011_v29 }
 0x2c6   : > { %v9464_v36 = vpop.f32.mrf.mxu0  ;;  %v9466_v3 = vpack.c.bf16 %v3095_v15, %v3095_v15  ;;  %v8297_v9 = vld [vmem:[#allocation8 + $0x214] sm:$0xf]  ;;  %3637 = vmatpush.bf16.msrb.mxu1 %v6887_v13  ;;  %v7003_v32 = vor.u32 %v8330_v21, %v7002_v33  ;;  %v8295_v13 = vld [vmem:[#allocation8 + $0x204] sm:$0xf]  ;;  %v7066_v43 = vld [vmem:[#allocation8 + $0x390] sm:$0xf] }
 0x2c7   : > { %v2919_v10 = vadd.f32 %v2873_v18, %v9372_v54  ;;  %3617 = vmatpush.bf16.msrb.mxu0 %v7091_v52  ;;  %v2324_v18 = vadd.f32 %v9376_v58, %v2306_v62  ;;  %v6879_v20 = vor.u32 %v8297_v9, %v6876_v63  ;;  %v8315_v52 = vld [vmem:[#allocation8 + $0x2a4] sm:$0xf]  ;;  %v6994_v62 = vld [vmem:[#allocation8 + $0x300] sm:$0xf]  ;;  %v8346_v11 = vld [vmem:[#allocation8 + $0x394] sm:$0xf0] }
 0x2c8   : > { %v3180_v27 = vshll.u32 %v9466_v3, 16  ;;  %3653 = vmatpush.bf16.msrb.mxu2 %v6967_v28  ;;  %v6951_v26 = vor.u32 %v8315_v52, %v6948_v47  ;;  %v6995_v29 = vor.u32 %v8328_v40, %v6994_v62  ;;  %v7067_v33 = vor.u32 %v8346_v11, %v7066_v43  ;;  %v8339_v47 = vld [vmem:[#allocation8 + $0x364] sm:$0xf]  ;;  %v7242_v43 = vld [vmem:[#allocation8 + $0xf0] sm:$0xf] }
 0x2c9   : > { %v2941_v54 = vadd.f32 %v9457_v23, %v2919_v10  ;;  %v2342_v10 = vadd.f32 %v9380_v1, %v1896_v56  ;;  %3602 = vmatpush.bf16.msra.mxu3 %v7003_v32  ;;  %v3190_v1 = vor.u32 %v3189_v6, %v3185_v7  ;;  %v8246_v6 = vld [vmem:[#allocation8 + $0x74] sm:$0xf0]  ;;  %v7044_v7 = vld [vmem:[#allocation8 + $0x368] sm:$0xf0]  ;;  %v3015_v8 = vld [vmem:[#allocation2 + $0x50] sm:$0xf] }
 0x2ca   : > { %v2890_v55 = vpop.f32.mrf.mxu3  ;;  %v9478_v2 = vrot.slane %v3180_v27, 1  ;;  %3638 = vmatpush.bf16.msrb.mxu1 %v6879_v20  ;;  %v8262_v11 = vld [vmem:[#allocation8 + $0xf4] sm:$0xf0] }
 0x2cb   : > { %v2953_v12 = vmax.f32 %v2941_v54, 0.0  ;;  %v2909_v17 = vadd.f32 %v9449_v38, %v2890_v55  ;;  %v3096_v31 = vld [vmem:[#allocation2 + $0x40] sm:$0x1f]  ;;  %3618 = vmatpush.bf16.msrb.mxu0 %v7083_v22  ;;  %v8348_v38 = vld [vmem:[#allocation8 + $0x3a4] sm:$0xf0]  ;;  %v6871_v54 = vor.u32 %v8295_v13, %v6868_v44 }
 0x2cc   : > { %v2856_v16 = vpop.f32.mrf.mxu1  ;;  %v2874_v15 = vpop.f32.mrf.mxu2  ;;  %v9484_v41 = vsel %vm806_vm5, %v3178_v51, %v9478_v2  ;;  %v9486_v19 = vpack.c.bf16 %v3096_v31, %v3096_v31  ;;  %v7075_v58 = vor.u32 %v8348_v38, %v7074_v39  ;;  %3654 = vmatpush.bf16.msrb.mxu2 %v6959_v35  ;;  %v8313_v22 = vld [vmem:[#allocation8 + $0x294] sm:$0xf]  ;;  %v6940_v55 = vld [vmem:[#allocation8 + $0x298] sm:$0xf0]  ;;  %v2360_v35 = vadd.f32 %v9370_v37, %v2342_v10  ;;  %v7178_v31 = vld [vmem:[#allocation8 + $0x70] sm:$0xf] }
 0x2cd   : > { %v2985_v45 = vsel %vm2968_vm11, %v2953_v12, 0.0  ;;  %v2920_v53 = vadd.f32 %v2909_v17, %v9378_v60  ;;  %v2875_v59 = vadd.f32 %v2874_v15, %v2856_v16  ;;  %3568 = vmatmul.bf16.vlgmr.msra.gmra.mxu1 %v9484_v41  ;;  %v8341_v51 = vld [vmem:[#allocation8 + $0x374] sm:$0xf]  ;;  %v6943_v12 = vor.u32 %v8313_v22, %v6940_v55  ;;  %v7052_v17 = vld [vmem:[#allocation8 + $0x378] sm:$0xf0]  ;;  %3603 = vmatpush.bf16.msra.mxu3 %v6995_v29 }
 0x2ce   : > { %2997 = vst [vmem:[#allocation2 + $0x8] sm:$0xff] %v2985_v45  ;;  %v9493_v28 = vpop.f32.mrf.mxu0  ;;  %v3192_v25 = vshll.u32 %v9486_v19, 16  ;;  %v7055_v37 = vor.u32 %v8341_v51, %v7052_v17  ;;  %v7058_v16 = vld [vmem:[#allocation8 + $0x380] sm:$0xf]  ;;  %v8344_v15 = vld [vmem:[#allocation8 + $0x384] sm:$0xf0]  ;;  %3639 = vmatpush.bf16.msrb.mxu1 %v6871_v54  ;;  %v7179_v38 = vor.u32 %v8246_v6, %v7178_v31 }
 0x2cf   : > { %v2942_v60 = vadd.f32 %v9476_v61, %v2920_v53  ;;  %v2923_v27 = vadd.f32 %v2875_v59, %v2324_v18  ;;  %3619 = vmatpush.bf16.msrb.mxu0 %v7075_v58  ;;  %v7059_v52 = vor.u32 %v8344_v15, %v7058_v16  ;;  %v8311_v45 = vld [vmem:[#allocation8 + $0x284] sm:$0xf]  ;;  %v6932_v53 = vld [vmem:[#allocation8 + $0x288] sm:$0xf0]  ;;  %v8357_v13 = vld [vmem:[#allocation8 + $0x3f4] sm:$0xf] }
 0x2d0   : > { %v9498_v56 = vrot.slane %v3192_v25, 1  ;;  %3655 = vmatpush.bf16.msrb.mxu2 %v6951_v26  ;;  %v6935_v10 = vor.u32 %v8311_v45, %v6932_v53  ;;  %v7170_v25 = vld [vmem:[#allocation8 + $0x60] sm:$0xf]  ;;  %v8244_v26 = vld [vmem:[#allocation8 + $0x64] sm:$0xf0] }
 0x2d1   : > { %v2954_v50 = vmax.f32 %v2942_v60, 0.0  ;;  %v2945_v42 = vadd.f32 %v9457_v23, %v2923_v27  ;;  %3668 = vmatpush.bf16.msrb.mxu3 %v7055_v37  ;;  %v7047_v27 = vor.u32 %v8339_v47, %v7044_v7  ;;  %v7171_v29 = vor.u32 %v8244_v26, %v7170_v25  ;;  %v7116_v44 = vld [vmem:[#allocation8 + $0x3f8] sm:$0xf0]  ;;  %v8337_v22 = vld [vmem:[#allocation8 + $0x354] sm:$0xf] }
 0x2d2   : > { %v2892_v21 = vpop.f32.mrf.mxu3  ;;  %v9504_v9 = vsel %vm806_vm5, %v3190_v1, %v9498_v56  ;;  %4024 = vmatpush.bf16.msra.mxu1 %v7179_v38  ;;  %v3220_v1 = vshrl.u32 %v9466_v3, 16  ;;  %v7119_v54 = vor.u32 %v8357_v13, %v7116_v44  ;;  %v7036_v55 = vld [vmem:[#allocation8 + $0x358] sm:$0xf0]  ;;  %v7162_v51 = vld [vmem:[#allocation8 + $0x50] sm:$0xf] }
 0x2d3   : > { %v2986_v32 = vsel %vm2968_vm11, %v2954_v50, 0.0  ;;  %v9508_v63 = vmax.f32 %v2945_v42, 0.0  ;;  %v2911_v18 = vadd.f32 %v9464_v36, %v2892_v21  ;;  %3586 = vmatmul.bf16.vlgmr.msra.gmra.mxu2 %v9504_v9  ;;  %3620 = vmatpush.bf16.msrb.mxu0 %v7067_v33  ;;  %v7039_v3 = vor.u32 %v8337_v22, %v7036_v55  ;;  %v8355_v17 = vld [vmem:[#allocation8 + $0x3e4] sm:$0xf]  ;;  %v7028_v53 = vld [vmem:[#allocation8 + $0x348] sm:$0xf0] }
 0x2d4   : > { %2998 = vst [vmem:[#allocation2 + $0x20] sm:$0xff] %v2986_v32  ;;  %v2859_v20 = vpop.f32.mrf.mxu1  ;;  %v2877_v39 = vpop.f32.mrf.mxu2  ;;  %3656 = vmatpush.bf16.msrb.mxu2 %v6943_v12  ;;  %v9523_v21 = vor.u32 %v3220_v1, %v9478_v2  ;;  %v8242_v12 = vld [vmem:[#allocation8 + $0x54] sm:$0xf0]  ;;  %v7234_v2 = vld [vmem:[#allocation8 + $0xe0] sm:$0xf] }
 0x2d5   : > { %3001 = vst [vmem:[#allocation2 + $0x10] sm:$0xff] %v9508_v63  ;;  %v2924_v59 = vadd.f32 %v2911_v18, %v2360_v35  ;;  %v2878_v58 = vadd.f32 %v2877_v39, %v2859_v20  ;;  %v3093_v36 = vld [vmem:[#allocation2 + $0x8] sm:$0xfe]  ;;  %3669 = vmatpush.bf16.msrb.mxu3 %v7047_v27  ;;  %v7163_v32 = vor.u32 %v8242_v12, %v7162_v51  ;;  %v8335_v39 = vld [vmem:[#allocation8 + $0x344] sm:$0xf] }
 0x2d6   : > { %v2915_v62 = vpop.f32.mrf.mxu0  ;;  %v9520_v33 = vpack.c.bf16 %v9508_v63, %v3093_v36  ;;  %4025 = vmatpush.bf16.msra.mxu1 %v7171_v29  ;;  %v7108_v18 = vld [vmem:[#allocation8 + $0x3e8] sm:$0xf0]  ;;  %v8260_v20 = vld [vmem:[#allocation8 + $0xe4] sm:$0xf0]  ;;  %v7031_v36 = vor.u32 %v8335_v39, %v7028_v53  ;;  %v8353_v7 = vld [vmem:[#allocation8 + $0x3d4] sm:$0xf] }
 0x2d7   : > { %v2946_v40 = vadd.f32 %v9476_v61, %v2924_v59  ;;  %v2927_v60 = vadd.f32 %v2878_v58, %v9382_v49  ;;  %3621 = vmatpush.bf16.msrb.mxu0 %v7059_v52  ;;  %v7243_v49 = vor.u32 %v8262_v11, %v7242_v43  ;;  %v7111_v15 = vor.u32 %v8355_v17, %v7108_v18  ;;  %v7154_v59 = vld [vmem:[#allocation8 + $0x40] sm:$0xf]  ;;  %v8240_v47 = vld [vmem:[#allocation8 + $0x44] sm:$0xf0]  ;;  %v7100_v25 = vld [vmem:[#allocation8 + $0x3d8] sm:$0xf0] }
 0x2d8   : > { %3657 = vmatpush.bf16.msrb.mxu2 %v6935_v10  ;;  %v7235_v45 = vor.u32 %v8260_v20, %v7234_v2  ;;  %v3223_v58 = vshrl.u32 %v9486_v19, 16  ;;  %v7226_v26 = vld [vmem:[#allocation8 + $0xd0] sm:$0xf]  ;;  %v8258_v27 = vld [vmem:[#allocation8 + $0xd4] sm:$0xf0] }
 0x2d9   : > { %v9516_v50 = vmax.f32 %v2946_v40, 0.0  ;;  %v2949_v42 = vadd.f32 %v9457_v23, %v2927_v60  ;;  %3670 = vmatpush.bf16.msrb.mxu3 %v7039_v3  ;;  %v3197_v40 = vshrl.u32 %v9520_v33, 16  ;;  %v7103_v60 = vor.u32 %v8353_v7, %v7100_v25  ;;  %v8333_v29 = vld [vmem:[#allocation8 + $0x334] sm:$0xf]  ;;  %v7020_v43 = vld [vmem:[#allocation8 + $0x338] sm:$0xf0] }
 0x2da   : > { %v2895_v35 = vpop.f32.mrf.mxu3  ;;  %4026 = vmatpush.bf16.msra.mxu1 %v7163_v32  ;;  %v9539_v13 = vor.u32 %v3223_v58, %v9498_v56  ;;  %v7146_v1 = vld [vmem:[#allocation8 + $0x30] sm:$0xf]  ;;  %v7023_v11 = vor.u32 %v8333_v29, %v7020_v43  ;;  %v8238_v22 = vld [vmem:[#allocation8 + $0x34] sm:$0xf0]  ;;  %v8256_v3 = vld [vmem:[#allocation8 + $0xc4] sm:$0xf0] }
 0x2db   : > { %3002 = vst [vmem:[#allocation2 + $0x38] sm:$0xff] %v9516_v50  ;;  %v2961_v31 = vmax.f32 %v2949_v42, 0.0  ;;  %v2914_v23 = vadd.f32 %v9493_v28, %v2895_v35  ;;  %v3094_v6 = vld [vmem:[#allocation2 + $0x20] sm:$0xfe]  ;;  %3686 = vmatpush.bf16.msra.mxu0 %v7119_v54  ;;  %v3199_v28 = vshll.u32 %v9520_v33, 16  ;;  %v7147_v56 = vor.u32 %v8238_v22, %v7146_v1 }
 0x2dc   : > { %4042 = vmatpush.bf16.msra.mxu2 %v7243_v49  ;;  %v2861_v37 = vpop.f32.mrf.mxu1  ;;  %v2879_v16 = vpop.f32.mrf.mxu2  ;;  %v9535_v10 = vpack.c.bf16 %v9516_v50, %v3094_v6  ;;  %v8351_v42 = vld [vmem:[#allocation8 + $0x3c4] sm:$0xf]  ;;  %v7092_v49 = vld [vmem:[#allocation8 + $0x3c8] sm:$0xf0]  ;;  %v7218_v35 = vld [vmem:[#allocation8 + $0xc0] sm:$0xf] }
 0x2dd   : > { %v2993_v38 = vsel %vm2973_vm12, %v2961_v31, 0.0  ;;  %v2928_v52 = vadd.f32 %v2914_v23, %v9384_v14  ;;  %3573 = vmatmul.bf16.gmra.mxu1 %v9523_v21  ;;  %v7155_v14 = vor.u32 %v8240_v47, %v7154_v59  ;;  %v3201_v44 = vrot.slane %v3199_v28, 1  ;;  %3671 = vmatpush.bf16.msrb.mxu3 %v7031_v36  ;;  %v8331_v17 = vld [vmem:[#allocation8 + $0x324] sm:$0xf]  ;;  %v7012_v31 = vld [vmem:[#allocation8 + $0x328] sm:$0xf0] }
 0x2de   : > { %3005 = vst [vmem:[#allocation2 + $0x58] sm:$0x3f] %v2993_v38  ;;  %v3211_v55 = vshll.u32 %v9535_v10, 16  ;;  %v7095_v51 = vor.u32 %v8351_v42, %v7092_v49  ;;  %v7219_v12 = vor.u32 %v8256_v3, %v7218_v35  ;;  %v7015_v6 = vor.u32 %v8331_v17, %v7012_v31  ;;  %v7138_v32 = vld [vmem:[#allocation8 + $0x20] sm:$0xf] }
 0x2df   : > { %v2950_v62 = vadd.f32 %v9476_v61, %v2928_v52  ;;  %3687 = vmatpush.bf16.msra.mxu0 %v7111_v15  ;;  %v7227_v61 = vor.u32 %v8258_v27, %v7226_v26  ;;  %4027 = vmatpush.bf16.msra.mxu1 %v7155_v14  ;;  %v7139_v37 = vor.u32 %v8236_v5, %v7138_v32  ;;  %v8349_v16 = vld [vmem:[#allocation8 + $0x3b4] sm:$0xf]  ;;  %v7084_v15 = vld [vmem:[#allocation8 + $0x3b8] sm:$0xf0]  ;;  %v7210_v2 = vld [vmem:[#allocation8 + $0xb0] sm:$0xf] }
 0x2e0   : > { %4043 = vmatpush.bf16.msra.mxu2 %v7235_v45  ;;  %v7087_v20 = vor.u32 %v8349_v16, %v7084_v15  ;;  %v8254_v39 = vld [vmem:[#allocation8 + $0xb4] sm:$0xf0]  ;;  %v8329_v38 = vld [vmem:[#allocation8 + $0x314] sm:$0xf]  ;;  %v7004_v52 = vld [vmem:[#allocation8 + $0x318] sm:$0xf0]  ;;  %v3202_v58 = vor.u32 %v3201_v44, %v3197_v40 }
 0x2e1   : > { %v2962_v19 = vmax.f32 %v2950_v62, 0.0  ;;  %3672 = vmatpush.bf16.msrb.mxu3 %v7023_v11  ;;  %v7211_v45 = vor.u32 %v8254_v39, %v7210_v2  ;;  %v7130_v53 = vld [vmem:[#allocation8 + $0x10] sm:$0xf]  ;;  %v8234_v59 = vld [vmem:[#allocation8 + $0x14] sm:$0xf0]  ;;  %v3213_v7 = vrot.slane %v3211_v55, 1  ;;  %v7007_v25 = vor.u32 %v8329_v38, %v7004_v52 }
 0x2e2   : > { %v2897_v54 = vpop.f32.mrf.mxu3  ;;  %v8347_v36 = vld [vmem:[#allocation8 + $0x3a4] sm:$0xf]  ;;  %v7076_v47 = vld [vmem:[#allocation8 + $0x3a8] sm:$0xf0]  ;;  %v7202_v62 = vld [vmem:[#allocation8 + $0xa0] sm:$0xf]  ;;  %v7131_v26 = vor.u32 %v8234_v59, %v7130_v53 }
 0x2e3   : > { %v2994_v33 = vsel %vm2973_vm12, %v2962_v19, 0.0  ;;  %3591 = vmatmul.bf16.gmra.mxu2 %v9539_v13  ;;  %3688 = vmatpush.bf16.msra.mxu0 %v7103_v60  ;;  %v8252_v60 = vld [vmem:[#allocation8 + $0xa4] sm:$0xf0]  ;;  %v8327_v27 = vld [vmem:[#allocation8 + $0x304] sm:$0xf]  ;;  %v7079_v19 = vor.u32 %v8347_v36, %v7076_v47  ;;  %v3209_v55 = vshrl.u32 %v9535_v10, 16 }
 0x2e4   : > { %3006 = vst [vmem:[#allocation2 + $0x30] sm:$0x3f] %v2994_v33  ;;  %4044 = vmatpush.bf16.msra.mxu2 %v7227_v61  ;;  %4028 = vmatpush.bf16.msra.mxu1 %v7147_v56  ;;  %v6996_v61 = vld [vmem:[#allocation8 + $0x308] sm:$0xf0]  ;;  %v7122_v43 = vld [vmem:[#allocation8] sm:$0xf]  ;;  %v7203_v1 = vor.u32 %v8252_v60, %v7202_v62 }
 0x2e5   : > { %v3097_v23 = vld [vmem:[#allocation2 + $0x58] sm:$0x1f]  ;;  %3673 = vmatpush.bf16.msrb.mxu3 %v7015_v6  ;;  %v8232_v54 = vld [vmem:[#allocation8 + $0x4] sm:$0xf0]  ;;  %v8345_v11 = vld [vmem:[#allocation8 + $0x394] sm:$0xf]  ;;  %v3214_v31 = vor.u32 %v3213_v7, %v3209_v55 }
 0x2e6   : > { %v9545_v18 = vpack.c.bf16 %v3097_v23, %v3097_v23  ;;  %v7068_v22 = vld [vmem:[#allocation8 + $0x398] sm:$0xf0]  ;;  %v7194_v42 = vld [vmem:[#allocation8 + $0x90] sm:$0xf]  ;;  %v8250_v49 = vld [vmem:[#allocation8 + $0x94] sm:$0xf0]  ;;  %v7123_v35 = vor.u32 %v8232_v54, %v7122_v43 }
 0x2e7   : > { %3689 = vmatpush.bf16.msra.mxu0 %v7095_v51  ;;  %v7306_v33 = vld [vmem:[#allocation8 + $0x170] sm:$0xf]  ;;  %v6999_v51 = vor.u32 %v8327_v27, %v6996_v61  ;;  %v8278_v3 = vld [vmem:[#allocation8 + $0x174] sm:$0xf0]  ;;  %v7180_v17 = vld [vmem:[#allocation8 + $0x78] sm:$0xf0]  ;;  %v7195_v6 = vor.u32 %v8250_v49, %v7194_v42 }
 0x2e8   : > { %v3204_v28 = vshll.u32 %v9545_v18, 16  ;;  %4045 = vmatpush.bf16.msra.mxu2 %v7219_v12  ;;  %4029 = vmatpush.bf16.msra.mxu1 %v7139_v37  ;;  %v8245_v12 = vld [vmem:[#allocation8 + $0x74] sm:$0xf]  ;;  %v8343_v32 = vld [vmem:[#allocation8 + $0x384] sm:$0xf]  ;;  %v7307_v37 = vor.u32 %v8278_v3, %v7306_v33 }
 0x2e9   : > { %3674 = vmatpush.bf16.msrb.mxu3 %v7007_v25  ;;  %v7060_v5 = vld [vmem:[#allocation8 + $0x388] sm:$0xf0]  ;;  %v7183_v10 = vor.u32 %v8245_v12, %v7180_v17  ;;  %v7186_v16 = vld [vmem:[#allocation8 + $0x80] sm:$0xf]  ;;  %v8248_v15 = vld [vmem:[#allocation8 + $0x84] sm:$0xf0] }
 0x2ea   : > { %v9548_v14 = vrot.slane %v3204_v28, 1  ;;  %v7298_v2 = vld [vmem:[#allocation8 + $0x160] sm:$0xf]  ;;  %v8276_v39 = vld [vmem:[#allocation8 + $0x164] sm:$0xf0]  ;;  %v7063_v59 = vor.u32 %v8343_v32, %v7060_v5 }
 0x2eb   : > { %v3098_v29 = vld [vmem:[#allocation2 + $0x30] sm:$0x1f]  ;;  %3690 = vmatpush.bf16.msra.mxu0 %v7087_v20  ;;  %v8243_v38 = vld [vmem:[#allocation8 + $0x64] sm:$0xf]  ;;  %v7172_v52 = vld [vmem:[#allocation8 + $0x68] sm:$0xf0]  ;;  %v7299_v47 = vor.u32 %v8276_v39, %v7298_v2 }
 0x2ec   : > { %v9552_v40 = vsel %vm806_vm5, %v3202_v58, %v9548_v14  ;;  %v9554_v44 = vpack.c.bf16 %v3098_v29, %v3098_v29  ;;  %4046 = vmatpush.bf16.msra.mxu2 %v7211_v45  ;;  %4030 = vmatpush.bf16.msra.mxu1 %v7131_v26  ;;  %v7370_v28 = vld [vmem:[#allocation8 + $0x1f0] sm:$0xf]  ;;  %v8294_v45 = vld [vmem:[#allocation8 + $0x1f4] sm:$0xf0]  ;;  %v8261_v53 = vld [vmem:[#allocation8 + $0xf4] sm:$0xf]  ;;  %v7187_v58 = vor.u32 %v8248_v15, %v7186_v16 }
 0x2ed   : > { %3604 = vmatmul.bf16.vlgmr.msra.gmra.mxu3 %v9552_v40  ;;  %3640 = vmatmul.bf16.vlgmr.msrb.gmra.mxu1 %v9484_v41  ;;  %v7071_v41 = vor.u32 %v8345_v11, %v7068_v22  ;;  %v7244_v36 = vld [vmem:[#allocation8 + $0xf8] sm:$0xf0]  ;;  %v7175_v62 = vor.u32 %v8243_v38, %v7172_v52  ;;  %v7371_v7 = vor.u32 %v8294_v45, %v7370_v28  ;;  %v7290_v26 = vld [vmem:[#allocation8 + $0x150] sm:$0xf]  ;;  %v8274_v60 = vld [vmem:[#allocation8 + $0x154] sm:$0xf0] }
 0x2ee   : > { %v3216_v56 = vshll.u32 %v9554_v44, 16  ;;  %3675 = vmatpush.bf16.msrb.mxu3 %v6999_v51  ;;  %v7247_v25 = vor.u32 %v8261_v53, %v7244_v36  ;;  %v8241_v27 = vld [vmem:[#allocation8 + $0x54] sm:$0xf]  ;;  %v7164_v29 = vld [vmem:[#allocation8 + $0x58] sm:$0xf0]  ;;  %v7291_v54 = vor.u32 %v8274_v60, %v7290_v26  ;;  %v3229_v17 = vshrl.u32 %v9554_v44, 16 }
 0x2ef   : > { %3691 = vmatpush.bf16.msra.mxu0 %v7079_v19  ;;  %v7362_v19 = vld [vmem:[#allocation8 + $0x1e0] sm:$0xf]  ;;  %v8259_v61 = vld [vmem:[#allocation8 + $0xe4] sm:$0xf]  ;;  %v7236_v43 = vld [vmem:[#allocation8 + $0xe8] sm:$0xf0]  ;;  %v7167_v11 = vor.u32 %v8241_v27, %v7164_v29 }
 0x2f0   : > { %v9560_v23 = vrot.slane %v3216_v56, 1  ;;  %4047 = vmatpush.bf16.msra.mxu2 %v7203_v1  ;;  %4031 = vmatpush.bf16.msra.mxu1 %v7123_v35  ;;  %v3226_v1 = vshrl.u32 %v9545_v18, 16  ;;  %v7282_v22 = vld [vmem:[#allocation8 + $0x140] sm:$0xf]  ;;  %v7239_v33 = vor.u32 %v8259_v61, %v7236_v43  ;;  %v8272_v55 = vld [vmem:[#allocation8 + $0x144] sm:$0xf0] }
 0x2f1   : > { %v8239_v56 = vld [vmem:[#allocation8 + $0x44] sm:$0xf]  ;;  %v7156_v51 = vld [vmem:[#allocation8 + $0x48] sm:$0xf0]  ;;  %v7354_v35 = vld [vmem:[#allocation8 + $0x1d0] sm:$0xf] }
 0x2f2   : > { %v9564_v20 = vsel %vm806_vm5, %v3214_v31, %v9560_v23  ;;  %4060 = vmatpush.bf16.msra.mxu3 %v7307_v37  ;;  %v9570_v42 = vor.u32 %v3226_v1, %v9548_v14  ;;  %v8290_v18 = vld [vmem:[#allocation8 + $0x1d4] sm:$0xf0]  ;;  %v8257_v3 = vld [vmem:[#allocation8 + $0xd4] sm:$0xf]  ;;  %v7228_v12 = vld [vmem:[#allocation8 + $0xd8] sm:$0xf0]  ;;  %v7283_v31 = vor.u32 %v8272_v55, %v7282_v22  ;;  %v7159_v14 = vor.u32 %v8239_v56, %v7156_v51 }
 0x2f3   : > { %3622 = vmatmul.bf16.vlgmr.msrb.gmra.mxu0 %v9564_v20  ;;  %3658 = vmatmul.bf16.vlgmr.msrb.gmra.mxu2 %v9504_v9  ;;  %v8292_v9 = vld [vmem:[#allocation8 + $0x1e4] sm:$0xf0]  ;;  %v8237_v32 = vld [vmem:[#allocation8 + $0x34] sm:$0xf]  ;;  %v7148_v5 = vld [vmem:[#allocation8 + $0x38] sm:$0xf0]  ;;  %v7355_v37 = vor.u32 %v8290_v18, %v7354_v35 }
 0x2f4   : > { %3692 = vmatpush.bf16.msra.mxu0 %v7071_v41  ;;  %4048 = vmatpush.bf16.msra.mxu2 %v7195_v6  ;;  %v7363_v49 = vor.u32 %v8292_v9, %v7362_v19  ;;  %v7274_v41 = vld [vmem:[#allocation8 + $0x130] sm:$0xf]  ;;  %v8270_v6 = vld [vmem:[#allocation8 + $0x134] sm:$0xf0]  ;;  %v7346_v16 = vld [vmem:[#allocation8 + $0x1c0] sm:$0xf]  ;;  %v7151_v38 = vor.u32 %v8237_v32, %v7148_v5 }
 0x2f5   : > { %4096 = vmatpush.bf16.msrb.mxu1 %v7183_v10  ;;  %v7231_v10 = vor.u32 %v8257_v3, %v7228_v12  ;;  %v8288_v15 = vld [vmem:[#allocation8 + $0x1c4] sm:$0xf0]  ;;  %v8255_v2 = vld [vmem:[#allocation8 + $0xc4] sm:$0xf]  ;;  %v7220_v39 = vld [vmem:[#allocation8 + $0xc8] sm:$0xf0]  ;;  %v7275_v44 = vor.u32 %v8270_v6, %v7274_v41  ;;  %v9591_v12 = vpack.c.bf16 %v9430_v4, %v2951_v30 }
 0x2f6   : > { %4061 = vmatpush.bf16.msra.mxu3 %v7299_v47  ;;  %v7266_v52 = vld [vmem:[#allocation8 + $0x120] sm:$0xf]  ;;  %v8268_v28 = vld [vmem:[#allocation8 + $0x124] sm:$0xf0]  ;;  %v8235_v45 = vld [vmem:[#allocation8 + $0x24] sm:$0xf] }
 0x2f7   : > { %v7140_v53 = vld [vmem:[#allocation8 + $0x28] sm:$0xf0]  ;;  %v8286_v36 = vld [vmem:[#allocation8 + $0x1b4] sm:$0xf0]  ;;  %v8253_v47 = vld [vmem:[#allocation8 + $0xb4] sm:$0xf] }
 0x2f8   : > { %3693 = vmatpush.bf16.msra.mxu0 %v7063_v59  ;;  %4049 = vmatpush.bf16.msra.mxu2 %v7187_v58  ;;  %v7347_v59 = vor.u32 %v8288_v15, %v7346_v16  ;;  %v7338_v58 = vld [vmem:[#allocation8 + $0x1b0] sm:$0xf]  ;;  %v8266_v60 = vld [vmem:[#allocation8 + $0x114] sm:$0xf0]  ;;  %v8233_v27 = vld [vmem:[#allocation8 + $0x14] sm:$0xf] }
 0x2f9   : > { %4097 = vmatpush.bf16.msrb.mxu1 %v7175_v62  ;;  %v7212_v62 = vld [vmem:[#allocation8 + $0xb8] sm:$0xf0]  ;;  %v7258_v26 = vld [vmem:[#allocation8 + $0x110] sm:$0xf]  ;;  %v7330_v9 = vld [vmem:[#allocation8 + $0x1a0] sm:$0xf] }
 0x2fa   : > { %4062 = vmatpush.bf16.msra.mxu3 %v7291_v54  ;;  %v7132_v29 = vld [vmem:[#allocation8 + $0x18] sm:$0xf0]  ;;  %v7215_v19 = vor.u32 %v8253_v47, %v7212_v62  ;;  %v8284_v61 = vld [vmem:[#allocation8 + $0x1a4] sm:$0xf0]  ;;  %v8251_v43 = vld [vmem:[#allocation8 + $0xa4] sm:$0xf]  ;;  %v7259_v54 = vor.u32 %v8266_v60, %v7258_v26 }
 0x2fb   : > { %v7204_v1 = vld [vmem:[#allocation8 + $0xa8] sm:$0xf0]  ;;  %v7250_v22 = vld [vmem:[#allocation8 + $0x100] sm:$0xf]  ;;  %v7331_v56 = vor.u32 %v8284_v61, %v7330_v9  ;;  %v7322_v35 = vld [vmem:[#allocation8 + $0x190] sm:$0xf] }
 0x2fc   : > { %4078 = vmatpush.bf16.msrb.mxu0 %v7371_v7  ;;  %4114 = vmatpush.bf16.msrb.mxu2 %v7247_v25  ;;  %v7267_v7 = vor.u32 %v8268_v28, %v7266_v52  ;;  %v7143_v25 = vor.u32 %v8235_v45, %v7140_v53  ;;  %v7124_v55 = vld [vmem:[#allocation8 + $0x8] sm:$0xf0]  ;;  %v7207_v51 = vor.u32 %v8251_v43, %v7204_v1  ;;  %v8282_v18 = vld [vmem:[#allocation8 + $0x194] sm:$0xf0]  ;;  %v7308_v41 = vld [vmem:[#allocation8 + $0x178] sm:$0xf0] }
 0x2fd   : > { %3609 = vmatmul.bf16.gmra.mxu3 %v9570_v42  ;;  %3645 = vmatmul.bf16.gmra.mxu1 %v9523_v21  ;;  %v9576_v21 = vor.u32 %v3229_v17, %v9560_v23  ;;  %v7223_v23 = vor.u32 %v8255_v2, %v7220_v39  ;;  %v8249_v17 = vld [vmem:[#allocation8 + $0x94] sm:$0xf]  ;;  %v7434_v6 = vld [vmem:[#allocation8 + $0x470] sm:$0xf]  ;;  %v8374_v32 = vld [vmem:[#allocation8 + $0x474] sm:$0xf0]  ;;  %v7323_v46 = vor.u32 %v8282_v18, %v7322_v35 }
 0x2fe   : > { %4098 = vmatpush.bf16.msrb.mxu1 %v7167_v11  ;;  %4063 = vmatpush.bf16.msra.mxu3 %v7283_v31  ;;  %v7135_v11 = vor.u32 %v8233_v27, %v7132_v29  ;;  %v7196_v31 = vld [vmem:[#allocation8 + $0x98] sm:$0xf0]  ;;  %v7314_v30 = vld [vmem:[#allocation8 + $0x180] sm:$0xf]  ;;  %v7435_v16 = vor.u32 %v8374_v32, %v7434_v6  ;;  %v8247_v15 = vld [vmem:[#allocation8 + $0x84] sm:$0xf]  ;;  %v9600_v28 = vpack.c.bf16 %v9437_v48, %v2952_v24 }
 0x2ff   : > { %v7199_v5 = vor.u32 %v8249_v17, %v7196_v31  ;;  %v7188_v2 = vld [vmem:[#allocation8 + $0x88] sm:$0xf0]  ;;  %v8275_v39 = vld [vmem:[#allocation8 + $0x164] sm:$0xf]  ;;  %v8372_v52 = vld [vmem:[#allocation8 + $0x464] sm:$0xf0]  ;;  %v9605_v43 = vpack.c.bf16 %v3015_v8, %v3015_v8 }
 0x300   : > { %4079 = vmatpush.bf16.msrb.mxu0 %v7363_v49  ;;  %4115 = vmatpush.bf16.msrb.mxu2 %v7239_v33  ;;  %v8264_v49 = vld [vmem:[#allocation8 + $0x104] sm:$0xf0]  ;;  %v8231_v33 = vld [vmem:[#allocation8 + $0x4] sm:$0xf]  ;;  %v8293_v45 = vld [vmem:[#allocation8 + $0x1f4] sm:$0xf] }
 0x301   : > { %v7251_v0 = vor.u32 %v8264_v49, %v7250_v22  ;;  %v7372_v53 = vld [vmem:[#allocation8 + $0x1f8] sm:$0xf0]  ;;  %v8273_v48 = vld [vmem:[#allocation8 + $0x154] sm:$0xf]  ;;  %v8370_v26 = vld [vmem:[#allocation8 + $0x454] sm:$0xf0] }
 0x302   : > { %4099 = vmatpush.bf16.msrb.mxu1 %v7159_v14  ;;  %4064 = vmatpush.bf16.msra.mxu3 %v7275_v44  ;;  %v8277_v14 = vld [vmem:[#allocation8 + $0x174] sm:$0xf]  ;;  %v7300_v44 = vld [vmem:[#allocation8 + $0x168] sm:$0xf0]  ;;  %v7375_v62 = vor.u32 %v8293_v45, %v7372_v53  ;;  %v8291_v60 = vld [vmem:[#allocation8 + $0x1e4] sm:$0xf] }
 0x303   : > { %3627 = vmatmul.bf16.gmra.mxu0 %v9576_v21  ;;  %3663 = vmatmul.bf16.gmra.mxu2 %v9539_v13  ;;  %v7339_v13 = vor.u32 %v8286_v36, %v7338_v58  ;;  %v7191_v58 = vor.u32 %v8247_v15, %v7188_v2  ;;  %v8390_v36 = vld [vmem:[#allocation8 + $0x4f4] sm:$0xf0]  ;;  %v7364_v27 = vld [vmem:[#allocation8 + $0x1e8] sm:$0xf0]  ;;  %v7490_v29 = vld [vmem:[#allocation8 + $0x4e0] sm:$0xf] }
 0x304   : > { %4080 = vmatpush.bf16.msrb.mxu0 %v7355_v37  ;;  %4116 = vmatpush.bf16.msrb.mxu2 %v7231_v10  ;;  %v8280_v37 = vld [vmem:[#allocation8 + $0x184] sm:$0xf0]  ;;  %v7311_v10 = vor.u32 %v8277_v14, %v7308_v41  ;;  %v8271_v61 = vld [vmem:[#allocation8 + $0x144] sm:$0xf]  ;;  %v7367_v1 = vor.u32 %v8291_v60, %v7364_v27  ;;  %v7410_v22 = vld [vmem:[#allocation8 + $0x440] sm:$0xf] }
 0x305   : > { %v8368_v49 = vld [vmem:[#allocation8 + $0x444] sm:$0xf0]  ;;  %v3016_v35 = vld [vmem:[#allocation2 + $0x40] sm:$0xf]  ;;  %v8269_v31 = vld [vmem:[#allocation8 + $0x134] sm:$0xf] }
 0x306   : > { %4100 = vmatpush.bf16.msrb.mxu1 %v7151_v38  ;;  %4065 = vmatpush.bf16.msra.mxu3 %v7267_v7  ;;  %v7426_v38 = vld [vmem:[#allocation8 + $0x460] sm:$0xf]  ;;  %v7292_v7 = vld [vmem:[#allocation8 + $0x158] sm:$0xf0]  ;;  %v7411_v17 = vor.u32 %v8368_v49, %v7410_v22  ;;  %v8287_v32 = vld [vmem:[#allocation8 + $0x1c4] sm:$0xf] }
 0x307   : > { %v7427_v47 = vor.u32 %v8372_v52, %v7426_v38  ;;  %v7276_v14 = vld [vmem:[#allocation8 + $0x138] sm:$0xf0]  ;;  %v7268_v15 = vld [vmem:[#allocation8 + $0x128] sm:$0xf0]  ;;  %v7394_v2 = vld [vmem:[#allocation8 + $0x420] sm:$0xf] }
 0x308   : > { %4081 = vmatpush.bf16.msrb.mxu0 %v7347_v59  ;;  %4117 = vmatpush.bf16.msrb.mxu2 %v7223_v23  ;;  %v7498_v59 = vld [vmem:[#allocation8 + $0x4f0] sm:$0xf]  ;;  %v7315_v23 = vor.u32 %v8280_v37, %v7314_v30  ;;  %v8384_v30 = vld [vmem:[#allocation8 + $0x4c4] sm:$0xf0]  ;;  %v7279_v37 = vor.u32 %v8269_v31, %v7276_v14  ;;  %v8285_v52 = vld [vmem:[#allocation8 + $0x1b4] sm:$0xf] }
 0x309   : > { %v7499_v24 = vor.u32 %v8390_v36, %v7498_v59  ;;  %v7340_v45 = vld [vmem:[#allocation8 + $0x1b8] sm:$0xf0]  ;;  %v7466_v53 = vld [vmem:[#allocation8 + $0x4b0] sm:$0xf]  ;;  %v8382_v59 = vld [vmem:[#allocation8 + $0x4b4] sm:$0xf0] }
 0x30a   : > { %4101 = vmatpush.bf16.msrb.mxu1 %v7143_v25  ;;  %4066 = vmatpush.bf16.msra.mxu3 %v7259_v54  ;;  %v7418_v25 = vld [vmem:[#allocation8 + $0x450] sm:$0xf]  ;;  %v8265_v36 = vld [vmem:[#allocation8 + $0x114] sm:$0xf]  ;;  %v3009_v8 = vld [vmem:[#allocation2 + $0x8] sm:$0xff] }
 0x30b   : > { %v7419_v9 = vor.u32 %v8370_v26, %v7418_v25  ;;  %v7458_v25 = vld [vmem:[#allocation8 + $0x4a0] sm:$0xf]  ;;  %v8380_v26 = vld [vmem:[#allocation8 + $0x4a4] sm:$0xf0]  ;;  %v8281_v22 = vld [vmem:[#allocation8 + $0x194] sm:$0xf] }
 0x30c   : > { %4082 = vmatpush.bf16.msrb.mxu0 %v7339_v13  ;;  %4118 = vmatpush.bf16.msrb.mxu2 %v7215_v19  ;;  %v8388_v13 = vld [vmem:[#allocation8 + $0x4e4] sm:$0xf0]  ;;  %v7295_v19 = vor.u32 %v8273_v48, %v7292_v7  ;;  %v8283_v48 = vld [vmem:[#allocation8 + $0x1a4] sm:$0xf]  ;;  %v7332_v7 = vld [vmem:[#allocation8 + $0x1a8] sm:$0xf0] }
 0x30d   : > { %3676 = vmatmul.bf16.vlgmr.msrb.gmra.mxu3 %v9552_v40  ;;  %8645 = vmatmul.msk.bf16.vlgmr.msra.gmra.mxu1 %vm9584_vm13, %v9591_v12  ;;  %v7127_v40 = vor.u32 %v8231_v33, %v7124_v55  ;;  %v7491_v54 = vor.u32 %v8388_v13, %v7490_v29  ;;  %v8289_v33 = vld [vmem:[#allocation8 + $0x1d4] sm:$0xf]  ;;  %v7356_v55 = vld [vmem:[#allocation8 + $0x1d8] sm:$0xf0]  ;;  %v8263_v29 = vld [vmem:[#allocation8 + $0x104] sm:$0xf]  ;;  %v9614_v13 = vpack.c.bf16 %v9508_v63, %v3009_v8 }
 0x30e   : > { %4102 = vmatpush.bf16.msrb.mxu1 %v7135_v11  ;;  %4067 = vmatpush.bf16.msra.mxu3 %v7251_v0  ;;  %v7284_v11 = vld [vmem:[#allocation8 + $0x148] sm:$0xf0]  ;;  %v7402_v0 = vld [vmem:[#allocation8 + $0x430] sm:$0xf]  ;;  %v7359_v41 = vor.u32 %v8289_v33, %v7356_v55  ;;  %v7324_v49 = vld [vmem:[#allocation8 + $0x198] sm:$0xf0] }
 0x30f   : > { %v7287_v18 = vor.u32 %v8271_v61, %v7284_v11  ;;  %v8360_v61 = vld [vmem:[#allocation8 + $0x404] sm:$0xf0]  ;;  %v7459_v11 = vor.u32 %v8380_v26, %v7458_v25  ;;  %v7450_v33 = vld [vmem:[#allocation8 + $0x490] sm:$0xf]  ;;  %v8378_v55 = vld [vmem:[#allocation8 + $0x494] sm:$0xf0]  ;;  %v7327_v31 = vor.u32 %v8281_v22, %v7324_v49 }
 0x310   : > { %4083 = vmatpush.bf16.msrb.mxu0 %v7331_v56  ;;  %4119 = vmatpush.bf16.msrb.mxu2 %v7207_v51  ;;  %v7482_v56 = vld [vmem:[#allocation8 + $0x4d0] sm:$0xf]  ;;  %v8386_v51 = vld [vmem:[#allocation8 + $0x4d4] sm:$0xf0]  ;;  %v7451_v14 = vor.u32 %v8378_v55, %v7450_v33  ;;  %v7420_v3 = vld [vmem:[#allocation8 + $0x458] sm:$0xf0] }
 0x311   : > { %v7483_v6 = vor.u32 %v8386_v51, %v7482_v56  ;;  %v7562_v63 = vld [vmem:[#allocation8 + $0x570] sm:$0xf]  ;;  %v8400_v26 = vld [vmem:[#allocation8 + $0x544] sm:$0xf0]  ;;  %v8398_v49 = vld [vmem:[#allocation8 + $0x534] sm:$0xf0] }
 0x312   : > { %4103 = vmatpush.bf16.msrb.mxu1 %v7127_v40  ;;  %4132 = vmatpush.bf16.msrb.mxu3 %v7311_v10  ;;  %v8366_v40 = vld [vmem:[#allocation8 + $0x434] sm:$0xf0]  ;;  %v7530_v22 = vld [vmem:[#allocation8 + $0x530] sm:$0xf]  ;;  %v8365_v33 = vld [vmem:[#allocation8 + $0x434] sm:$0xf] }
 0x313   : > { %3694 = vmatmul.bf16.vlgmr.msra.gmra.mxu0 %v9564_v20  ;;  %8648 = vmatmul.msk.bf16.vlgmr.msra.gmra.mxu2 %vm9584_vm13, %v9600_v28  ;;  %v7303_v20 = vor.u32 %v8275_v39, %v7300_v44  ;;  %v7403_v10 = vor.u32 %v8366_v40, %v7402_v0  ;;  %v8364_v39 = vld [vmem:[#allocation8 + $0x424] sm:$0xf0]  ;;  %v8279_v0 = vld [vmem:[#allocation8 + $0x184] sm:$0xf]  ;;  %v7316_v40 = vld [vmem:[#allocation8 + $0x188] sm:$0xf0] }
 0x314   : > { %4084 = vmatpush.bf16.msrb.mxu0 %v7323_v46  ;;  %4120 = vmatpush.bf16.msrb.mxu2 %v7199_v5  ;;  %v7348_v46 = vld [vmem:[#allocation8 + $0x1c8] sm:$0xf0]  ;;  %v7474_v5 = vld [vmem:[#allocation8 + $0x4c0] sm:$0xf]  ;;  %v7404_v55 = vld [vmem:[#allocation8 + $0x438] sm:$0xf0] }
 0x315   : > { %v7351_v44 = vor.u32 %v8287_v32, %v7348_v46  ;;  %v7475_v38 = vor.u32 %v8384_v30, %v7474_v5  ;;  %v7442_v32 = vld [vmem:[#allocation8 + $0x480] sm:$0xf]  ;;  %v8376_v46 = vld [vmem:[#allocation8 + $0x484] sm:$0xf0] }
 0x316   : > { %4597 = vmatpush.bf16.msra.mxu1 %v7435_v16  ;;  %4133 = vmatpush.bf16.msrb.mxu3 %v7303_v20  ;;  %v8267_v16 = vld [vmem:[#allocation8 + $0x124] sm:$0xf]  ;;  %v7260_v20 = vld [vmem:[#allocation8 + $0x118] sm:$0xf0]  ;;  %v7554_v5 = vld [vmem:[#allocation8 + $0x560] sm:$0xf] }
 0x317   : > { %v7263_v60 = vor.u32 %v8265_v36, %v7260_v20  ;;  %v8404_v30 = vld [vmem:[#allocation8 + $0x564] sm:$0xf0]  ;;  %v8369_v36 = vld [vmem:[#allocation8 + $0x454] sm:$0xf] }
 0x318   : > { %4085 = vmatpush.bf16.msrb.mxu0 %v7315_v23  ;;  %4121 = vmatpush.bf16.msrb.mxu2 %v7191_v58  ;;  %v7271_v23 = vor.u32 %v8267_v16, %v7268_v15  ;;  %v7395_v58 = vor.u32 %v8364_v39, %v7394_v2  ;;  %v7626_v16 = vld [vmem:[#allocation8 + $0x5f0] sm:$0xf]  ;;  %v8422_v15 = vld [vmem:[#allocation8 + $0x5f4] sm:$0xf0]  ;;  %v7319_v2 = vor.u32 %v8279_v0, %v7316_v40  ;;  %v8420_v20 = vld [vmem:[#allocation8 + $0x5e4] sm:$0xf0] }
 0x319   : > { %v7443_v39 = vor.u32 %v8376_v46, %v7442_v32  ;;  %v7531_v0 = vor.u32 %v8398_v49, %v7530_v22  ;;  %v7407_v40 = vor.u32 %v8365_v33, %v7404_v55  ;;  %v8363_v32 = vld [vmem:[#allocation8 + $0x424] sm:$0xf]  ;;  %v7396_v46 = vld [vmem:[#allocation8 + $0x428] sm:$0xf0]  ;;  %v7452_v22 = vld [vmem:[#allocation8 + $0x498] sm:$0xf0] }
 0x31a   : > { %4598 = vmatpush.bf16.msra.mxu1 %v7427_v47  ;;  %4134 = vmatpush.bf16.msrb.mxu3 %v7295_v19  ;;  %v8362_v47 = vld [vmem:[#allocation8 + $0x414] sm:$0xf0]  ;;  %v7252_v19 = vld [vmem:[#allocation8 + $0x108] sm:$0xf0] }
 0x31b   : > { %v7255_v56 = vor.u32 %v8263_v29, %v7252_v19  ;;  %v7610_v29 = vld [vmem:[#allocation8 + $0x5d0] sm:$0xf]  ;;  %v8418_v19 = vld [vmem:[#allocation8 + $0x5d4] sm:$0xf0] }
 0x31c   : > { %4150 = vmatpush.bf16.msra.mxu0 %v7375_v62  ;;  %4615 = vmatpush.bf16.msra.mxu2 %v7499_v24  ;;  %v7343_v62 = vor.u32 %v8285_v52, %v7340_v45  ;;  %v7467_v24 = vor.u32 %v8382_v59, %v7466_v53  ;;  %v3017_v45 = vld [vmem:[#allocation2 + $0x58] sm:$0xf]  ;;  %v7627_v53 = vor.u32 %v8422_v15, %v7626_v16  ;;  %v8381_v15 = vld [vmem:[#allocation8 + $0x4b4] sm:$0xf] }
 0x31d   : > { %3681 = vmatmul.bf16.gmra.mxu3 %v9570_v42  ;;  %4037 = vmatmul.bf16.gmra.mxu1 %v9605_v43  ;;  %v9609_v42 = vpack.c.bf16 %v3016_v35, %v3016_v35  ;;  %v8406_v35 = vld [vmem:[#allocation8 + $0x574] sm:$0xf0] }
 0x31e   : > { %4599 = vmatpush.bf16.msra.mxu1 %v7419_v9  ;;  %4135 = vmatpush.bf16.msrb.mxu3 %v7287_v18  ;;  %v7378_v9 = vld [vmem:[#allocation8 + $0x400] sm:$0xf]  ;;  %v8373_v18 = vld [vmem:[#allocation8 + $0x474] sm:$0xf]  ;;  %v8414_v16 = vld [vmem:[#allocation8 + $0x5b4] sm:$0xf0] }
 0x31f   : > { %v7379_v51 = vor.u32 %v8360_v61, %v7378_v9  ;;  %v8385_v9 = vld [vmem:[#allocation8 + $0x4d4] sm:$0xf]  ;;  %v7484_v61 = vld [vmem:[#allocation8 + $0x4d8] sm:$0xf0] }
 0x320   : > { %4151 = vmatpush.bf16.msra.mxu0 %v7367_v1  ;;  %4616 = vmatpush.bf16.msra.mxu2 %v7491_v54  ;;  %v3010_v1 = vld [vmem:[#allocation2 + $0x20] sm:$0xff]  ;;  %v7335_v54 = vor.u32 %v8283_v48, %v7332_v7  ;;  %v9627_v48 = vpack.c.bf16 %v3017_v45, %v3017_v45  ;;  %v8361_v45 = vld [vmem:[#allocation8 + $0x414] sm:$0xf] }
 0x322   : > { %4600 = vmatpush.bf16.msra.mxu1 %v7411_v17  ;;  %4136 = vmatpush.bf16.msrb.mxu3 %v7279_v37  ;;  %v7436_v17 = vld [vmem:[#allocation8 + $0x478] sm:$0xf0]  ;;  %v8371_v37 = vld [vmem:[#allocation8 + $0x464] sm:$0xf] }
 0x323   : > { %3699 = vmatmul.bf16.gmra.mxu0 %v9576_v21  ;;  %4055 = vmatmul.bf16.gmra.mxu2 %v9609_v42  ;;  %v7386_v21 = vld [vmem:[#allocation8 + $0x410] sm:$0xf] }
 0x324   : > { %4152 = vmatpush.bf16.msra.mxu0 %v7359_v41  ;;  %4617 = vmatpush.bf16.msra.mxu2 %v7483_v6  ;;  %v7387_v27 = vor.u32 %v8362_v47, %v7386_v21  ;;  %v9621_v41 = vpack.c.bf16 %v9516_v50, %v3010_v1  ;;  %v7439_v6 = vor.u32 %v8373_v18, %v7436_v17  ;;  %v8389_v50 = vld [vmem:[#allocation8 + $0x4f4] sm:$0xf]  ;;  %v8387_v21 = vld [vmem:[#allocation8 + $0x4e4] sm:$0xf]  ;;  %v7492_v47 = vld [vmem:[#allocation8 + $0x4e8] sm:$0xf0] }
 0x325   : > { %v7495_v25 = vor.u32 %v8387_v21, %v7492_v47  ;;  %v3018_v1 = vld [vmem:[#allocation2 + $0x30] sm:$0xf]  ;;  %v8383_v17 = vld [vmem:[#allocation8 + $0x4c4] sm:$0xf] }
 0x326   : > { %4601 = vmatpush.bf16.msra.mxu1 %v7403_v10  ;;  %4137 = vmatpush.bf16.msrb.mxu3 %v7271_v23  ;;  %v7428_v10 = vld [vmem:[#allocation8 + $0x468] sm:$0xf0]  ;;  %v7546_v23 = vld [vmem:[#allocation8 + $0x550] sm:$0xf]  ;;  %v9631_v18 = vpack.c.bf16 %v3018_v1, %v3018_v1 }
 0x327   : > { %v7431_v52 = vor.u32 %v8371_v37, %v7428_v10  ;;  %v7594_v10 = vld [vmem:[#allocation8 + $0x5b0] sm:$0xf] }
 0x328   : > { %4153 = vmatpush.bf16.msra.mxu0 %v7351_v44  ;;  %4618 = vmatpush.bf16.msra.mxu2 %v7475_v38  ;;  %v7500_v44 = vld [vmem:[#allocation8 + $0x4f8] sm:$0xf0]  ;;  %v7555_v38 = vor.u32 %v8404_v30, %v7554_v5  ;;  %v7578_v1 = vld [vmem:[#allocation8 + $0x590] sm:$0xf] }
 0x329   : > { %v7503_v59 = vor.u32 %v8389_v50, %v7500_v44  ;;  %v7468_v50 = vld [vmem:[#allocation8 + $0x4b8] sm:$0xf0] }
 0x32a   : > { %4602 = vmatpush.bf16.msra.mxu1 %v7395_v58  ;;  %4138 = vmatpush.bf16.msrb.mxu3 %v7263_v60  ;;  %v8402_v58 = vld [vmem:[#allocation8 + $0x554] sm:$0xf0]  ;;  %v8367_v60 = vld [vmem:[#allocation8 + $0x444] sm:$0xf] }
 0x32b   : > { %v7547_v8 = vor.u32 %v8402_v58, %v7546_v23  ;;  %v4169_v23 = vld [vmem:[#allocation2 + $0x48] sm:$0xfc]  ;;  %v7595_v58 = vor.u32 %v8414_v16, %v7594_v10  ;;  %v7628_v10 = vld [vmem:[#allocation8 + $0x5f8] sm:$0xf0] }
 0x32c   : > { %4154 = vmatpush.bf16.msra.mxu0 %v7343_v62  ;;  %4619 = vmatpush.bf16.msra.mxu2 %v7467_v24  ;;  %v7423_v62 = vor.u32 %v8369_v36, %v7420_v3  ;;  %v7538_v24 = vld [vmem:[#allocation8 + $0x540] sm:$0xf]  ;;  %v7471_v36 = vor.u32 %v8381_v15, %v7468_v50 }
 0x32d   : > { %4068 = vmatmul.bf16.vlgmr.msra.gmra.mxu3 %v9614_v13  ;;  %8651 = vmatmul.msk.bf16.vlgmr.msrb.gmra.mxu1 %vm9584_vm13, %v9591_v12  ;;  %v7563_v12 = vor.u32 %v8406_v35, %v7562_v63  ;;  %v4172_v63 = vld [vmem:[#allocation2 + $0x50] sm:$0x3f]  ;;  %v7602_v35 = vld [vmem:[#allocation8 + $0x5c0] sm:$0xf] }
 0x32e   : > { %4603 = vmatpush.bf16.msra.mxu1 %v7387_v27  ;;  %4139 = vmatpush.bf16.msrb.mxu3 %v7255_v56  ;;  %v7412_v27 = vld [vmem:[#allocation8 + $0x448] sm:$0xf0]  ;;  %v7611_v56 = vor.u32 %v8418_v19, %v7610_v29  ;;  %v4180_v5 = vpack.c.bf16 %v4172_v63, %v4172_v63  ;;  %v7586_v3 = vld [vmem:[#allocation8 + $0x5a0] sm:$0xf]  ;;  %v8405_v63 = vld [vmem:[#allocation8 + $0x574] sm:$0xf] }
 0x32f   : > { %v7380_v29 = vld [vmem:[#allocation8 + $0x408] sm:$0xf0] }
 0x330   : > { %4155 = vmatpush.bf16.msra.mxu0 %v7335_v54  ;;  %4620 = vmatpush.bf16.msra.mxu2 %v7459_v11  ;;  %v7539_v54 = vor.u32 %v8400_v26, %v7538_v24  ;;  %v7415_v11 = vor.u32 %v8367_v60, %v7412_v27  ;;  %v8392_v60 = vld [vmem:[#allocation8 + $0x504] sm:$0xf0]  ;;  %v8359_v27 = vld [vmem:[#allocation8 + $0x404] sm:$0xf] }
 0x331   : > { %v7383_v55 = vor.u32 %v8359_v27, %v7380_v29  ;;  %v8413_v27 = vld [vmem:[#allocation8 + $0x5b4] sm:$0xf]  ;;  %v7596_v29 = vld [vmem:[#allocation8 + $0x5b8] sm:$0xf0] }
 0x332   : > { %4604 = vmatpush.bf16.msra.mxu1 %v7379_v51  ;;  %4633 = vmatpush.bf16.msra.mxu3 %v7563_v12  ;;  %v7487_v51 = vor.u32 %v8385_v9, %v7484_v61  ;;  %v7522_v12 = vld [vmem:[#allocation8 + $0x520] sm:$0xf] }
 0x333   : > { %4086 = vmatmul.bf16.vlgmr.msrb.gmra.mxu0 %v9621_v41  ;;  %8654 = vmatmul.msk.bf16.vlgmr.msrb.gmra.mxu2 %vm9584_vm13, %v9600_v28  ;;  %v7618_v28 = vld [vmem:[#allocation8 + $0x5e0] sm:$0xf] }
 0x334   : > { %4156 = vmatpush.bf16.msra.mxu0 %v7327_v31  ;;  %4621 = vmatpush.bf16.msra.mxu2 %v7451_v14  ;;  %v7619_v7 = vor.u32 %v8420_v20, %v7618_v28  ;;  %v7476_v31 = vld [vmem:[#allocation8 + $0x4c8] sm:$0xf0]  ;;  %v4168_v14 = vld [vmem:[#allocation2 + $0x18] sm:$0xfc]  ;;  %v8412_v28 = vld [vmem:[#allocation8 + $0x5a4] sm:$0xf0] }
 0x335   : > { %v7479_v37 = vor.u32 %v8383_v17, %v7476_v31  ;;  %v8379_v20 = vld [vmem:[#allocation8 + $0x4a4] sm:$0xf]  ;;  %v7587_v9 = vor.u32 %v8412_v28, %v7586_v3 }
 0x336   : > { %4669 = vmatpush.bf16.msrb.mxu1 %v7439_v6  ;;  %4634 = vmatpush.bf16.msra.mxu3 %v7555_v38  ;;  %v8396_v6 = vld [vmem:[#allocation8 + $0x524] sm:$0xf0]  ;;  %v7399_v38 = vor.u32 %v8363_v32, %v7396_v46  ;;  %v8403_v32 = vld [vmem:[#allocation8 + $0x564] sm:$0xf]  ;;  %v7556_v46 = vld [vmem:[#allocation8 + $0x568] sm:$0xf0] }
 0x337   : > { %v7523_v44 = vor.u32 %v8396_v6, %v7522_v12  ;;  %v7444_v6 = vld [vmem:[#allocation8 + $0x488] sm:$0xf0] }
 0x338   : > { %4157 = vmatpush.bf16.msra.mxu0 %v7319_v2  ;;  %4622 = vmatpush.bf16.msra.mxu2 %v7443_v39  ;;  %v4176_v2 = vpack.c.bf16 %v9430_v4, %v4168_v14  ;;  %v4173_v39 = vld [vmem:[#allocation2 + $0x40] sm:$0x3f]  ;;  %v7460_v4 = vld [vmem:[#allocation8 + $0x4a8] sm:$0xf0] }
 0x339   : > { %v7463_v61 = vor.u32 %v8379_v20, %v7460_v4  ;;  %v7570_v14 = vld [vmem:[#allocation8 + $0x580] sm:$0xf]  ;;  %v8397_v20 = vld [vmem:[#allocation8 + $0x534] sm:$0xf]  ;;  %v7532_v4 = vld [vmem:[#allocation8 + $0x538] sm:$0xf0] }
 0x33a   : > { %4670 = vmatpush.bf16.msrb.mxu1 %v7431_v52  ;;  %4635 = vmatpush.bf16.msra.mxu3 %v7547_v8  ;;  %v8394_v52 = vld [vmem:[#allocation8 + $0x514] sm:$0xf0]  ;;  %v4257_v47 = vrot.slane %v4176_v2, 1  ;;  %v4181_v8 = vpack.c.bf16 %v4173_v39, %v4173_v39  ;;  %v7548_v2 = vld [vmem:[#allocation8 + $0x558] sm:$0xf0] }
 0x33c   : > { %4651 = vmatpush.bf16.msrb.mxu0 %v7627_v53  ;;  %4687 = vmatpush.bf16.msrb.mxu2 %v7503_v59  ;;  %v7388_v53 = vld [vmem:[#allocation8 + $0x418] sm:$0xf0]  ;;  %v9636_v59 = vrot.slane %v4180_v5, 1  ;;  %v9644_v49 = vrot.slane %v4181_v8, 1  ;;  %v4170_v8 = vld [vmem:[#allocation2 + $0x8] sm:$0xfc] }
 0x33d   : > { %4073 = vmatmul.bf16.gmra.mxu3 %v9627_v48  ;;  %4109 = vmatmul.bf16.gmra.mxu1 %v9605_v43  ;;  %v8416_v43 = vld [vmem:[#allocation8 + $0x5c4] sm:$0xf0]  ;;  %v7391_v24 = vor.u32 %v8361_v45, %v7388_v53  ;;  %v7540_v53 = vld [vmem:[#allocation8 + $0x548] sm:$0xf0] }
 0x33e   : > { %4671 = vmatpush.bf16.msrb.mxu1 %v7423_v62  ;;  %4636 = vmatpush.bf16.msra.mxu3 %v7539_v54  ;;  %v7603_v30 = vor.u32 %v8416_v43, %v7602_v35  ;;  %v9640_v19 = vsel %vm1079_vm7, %v4257_v47, %v9636_v59  ;;  %v8410_v54 = vld [vmem:[#allocation8 + $0x594] sm:$0xf0] }
 0x33f   : > { %v7579_v35 = vor.u32 %v8410_v54, %v7578_v1 }
 0x340   : > { %4652 = vmatpush.bf16.msrb.mxu0 %v7619_v7  ;;  %4688 = vmatpush.bf16.msrb.mxu2 %v7495_v25  ;;  %v7506_v7 = vld [vmem:[#allocation8 + $0x500] sm:$0xf]  ;;  %v8604_v25 = vld [vmem:[#allocation2 + $0x28] sm:$0xff] }
 0x341   : > { %v4177_v26 = vpack.c.bf16 %v8604_v25, %v4169_v23  ;;  %v7507_v33 = vor.u32 %v8392_v60, %v7506_v7  ;;  %v8417_v23 = vld [vmem:[#allocation8 + $0x5d4] sm:$0xf]  ;;  %v8395_v7 = vld [vmem:[#allocation8 + $0x524] sm:$0xf]  ;;  %v7524_v60 = vld [vmem:[#allocation8 + $0x528] sm:$0xf0] }
 0x342   : > { %4672 = vmatpush.bf16.msrb.mxu1 %v7415_v11  ;;  %4637 = vmatpush.bf16.msra.mxu3 %v7531_v0  ;;  %v8377_v11 = vld [vmem:[#allocation8 + $0x494] sm:$0xf]  ;;  %v8408_v0 = vld [vmem:[#allocation8 + $0x584] sm:$0xf0]  ;;  %v7527_v54 = vor.u32 %v8395_v7, %v7524_v60 }
 0x343   : > { %4091 = vmatmul.bf16.gmra.mxu0 %v9631_v18  ;;  %4127 = vmatmul.bf16.gmra.mxu2 %v9609_v42  ;;  %v7514_v42 = vld [vmem:[#allocation8 + $0x510] sm:$0xf]  ;;  %v7455_v43 = vor.u32 %v8377_v11, %v7452_v22  ;;  %v7571_v12 = vor.u32 %v8408_v0, %v7570_v14  ;;  %v7599_v11 = vor.u32 %v8413_v27, %v7596_v29 }
 0x344   : > { %4653 = vmatpush.bf16.msrb.mxu0 %v7611_v56  ;;  %4689 = vmatpush.bf16.msrb.mxu2 %v7487_v51  ;;  %v7515_v62 = vor.u32 %v8394_v52, %v7514_v42  ;;  %v7564_v56 = vld [vmem:[#allocation8 + $0x578] sm:$0xf0]  ;;  %v4260_v51 = vrot.slane %v4177_v26, 1  ;;  %v7620_v42 = vld [vmem:[#allocation8 + $0x5e8] sm:$0xf0] }
 0x345   : > { %v7567_v17 = vor.u32 %v8405_v63, %v7564_v56  ;;  %v8399_v52 = vld [vmem:[#allocation8 + $0x544] sm:$0xf] }
 0x346   : > { %4673 = vmatpush.bf16.msrb.mxu1 %v7407_v40  ;;  %4638 = vmatpush.bf16.msra.mxu3 %v7523_v44  ;;  %v9650_v31 = vsel %vm1079_vm7, %v4260_v51, %v9644_v49  ;;  %v8375_v40 = vld [vmem:[#allocation8 + $0x484] sm:$0xf]  ;;  %v7543_v3 = vor.u32 %v8399_v52, %v7540_v53  ;;  %v7588_v51 = vld [vmem:[#allocation8 + $0x5a8] sm:$0xf0] }
 0x347   : > { %v7447_v5 = vor.u32 %v8375_v40, %v7444_v6  ;;  %v8411_v56 = vld [vmem:[#allocation8 + $0x5a4] sm:$0xf]  ;;  %v7508_v6 = vld [vmem:[#allocation8 + $0x508] sm:$0xf0] }
 0x348   : > { %4654 = vmatpush.bf16.msrb.mxu0 %v7603_v30  ;;  %4690 = vmatpush.bf16.msrb.mxu2 %v7479_v37  ;;  %v7559_v30 = vor.u32 %v8403_v32, %v7556_v46  ;;  %v8421_v37 = vld [vmem:[#allocation8 + $0x5f4] sm:$0xf]  ;;  %v7591_v40 = vor.u32 %v8411_v56, %v7588_v51  ;;  %v7580_v46 = vld [vmem:[#allocation8 + $0x598] sm:$0xf0]  ;;  %v7572_v53 = vld [vmem:[#allocation8 + $0x588] sm:$0xf0] }
 0x349   : > { %v7631_v15 = vor.u32 %v8421_v37, %v7628_v10  ;;  %v8409_v32 = vld [vmem:[#allocation8 + $0x594] sm:$0xf] }
 0x34a   : > { %v3569_v21 = vpop.f32.mrf.mxu1  ;;  %4674 = vmatpush.bf16.msrb.mxu1 %v7399_v38  ;;  %4639 = vmatpush.bf16.msra.mxu3 %v7515_v62  ;;  %v8419_v38 = vld [vmem:[#allocation8 + $0x5e4] sm:$0xf]  ;;  %v7535_v62 = vor.u32 %v8397_v20, %v7532_v4 }
 0x34b   : > { %v7623_v45 = vor.u32 %v8419_v38, %v7620_v42 }
 0x34c   : > { %4655 = vmatpush.bf16.msrb.mxu0 %v7595_v58  ;;  %4691 = vmatpush.bf16.msrb.mxu2 %v7471_v36  ;;  %v7612_v58 = vld [vmem:[#allocation8 + $0x5d8] sm:$0xf0] }
 0x34d   : > { %4140 = vmatmul.bf16.vlgmr.msrb.gmra.mxu3 %v9614_v13  ;;  %4605 = vmatmul.bf16.vlgmr.msra.gmra.mxu1 %v9640_v19  ;;  %v7615_v28 = vor.u32 %v8417_v23, %v7612_v58 }
 0x34e   : > { %4675 = vmatpush.bf16.msrb.mxu1 %v7391_v24  ;;  %4640 = vmatpush.bf16.msra.mxu3 %v7507_v33  ;;  %v7604_v24 = vld [vmem:[#allocation8 + $0x5c8] sm:$0xf0]  ;;  %v4175_v33 = vld [vmem:[#allocation2 + $0x30] sm:$0x3f] }
 0x34f   : > { %v4183_v14 = vpack.c.bf16 %v4175_v33, %v4175_v33 }
 0x350   : > { %4656 = vmatpush.bf16.msrb.mxu0 %v7587_v9  ;;  %4692 = vmatpush.bf16.msrb.mxu2 %v7463_v61  ;;  %v8605_v61 = vld [vmem:[#allocation2 + $0x10] sm:$0xff] }
 0x351   : > { %v4178_v1 = vpack.c.bf16 %v8605_v61, %v4170_v8 }
 0x352   : > { %v9646_v13 = vpop.f32.mrf.mxu1  ;;  %4676 = vmatpush.bf16.msrb.mxu1 %v7383_v55  ;;  %4705 = vmatpush.bf16.msrb.mxu3 %v7567_v17  ;;  %v7516_v55 = vld [vmem:[#allocation8 + $0x518] sm:$0xf0] }
 0x353   : > { %4158 = vmatmul.bf16.vlgmr.msra.gmra.mxu0 %v9621_v41  ;;  %4623 = vmatmul.bf16.vlgmr.msra.gmra.mxu2 %v9650_v31  ;;  %v8401_v41 = vld [vmem:[#allocation8 + $0x554] sm:$0xf]  ;;  %v4263_v17 = vrot.slane %v4178_v1, 1 }
 0x354   : > { %4657 = vmatpush.bf16.msrb.mxu0 %v7579_v35  ;;  %4693 = vmatpush.bf16.msrb.mxu2 %v7455_v43  ;;  %v7551_v44 = vor.u32 %v8401_v41, %v7548_v2  ;;  %v4171_v35 = vld [vmem:[#allocation2 + $0x20] sm:$0xfc]  ;;  %v7583_v41 = vor.u32 %v8409_v32, %v7580_v46 }
 0x356   : > { %v3587_v16 = vpop.f32.mrf.mxu2  ;;  %4706 = vmatpush.bf16.msrb.mxu3 %v7559_v30  ;;  %v8606_v30 = vld [vmem:[#allocation2 + $0x38] sm:$0xff] }
 0x357   : > { %v9654_v50 = vadd.f32 %v3587_v16, %v3569_v21  ;;  %v4174_v21 = vld [vmem:[#allocation2 + $0x58] sm:$0x3f]  ;;  %v4179_v37 = vpack.c.bf16 %v8606_v30, %v4171_v35  ;;  %v4267_v16 = vrot.slane %v4183_v14, 1 }
 0x358   : > { %4658 = vmatpush.bf16.msrb.mxu0 %v7571_v12  ;;  %4694 = vmatpush.bf16.msrb.mxu2 %v7447_v5  ;;  %v4182_v25 = vpack.c.bf16 %v4174_v21, %v4174_v21  ;;  %v8391_v12 = vld [vmem:[#allocation8 + $0x504] sm:$0xf] }
 0x35a   : > { %v3574_v39 = vpop.f32.mrf.mxu1  ;;  %4707 = vmatpush.bf16.msrb.mxu3 %v7551_v44  ;;  %v9662_v63 = vrot.slane %v4182_v25, 1  ;;  %v4266_v44 = vrot.slane %v4179_v37, 1 }
 0x35c   : > { %4723 = vmatpush.bf16.msra.mxu0 %v7631_v15  ;;  %v4265_v5 = vsel %vm1079_vm7, %v4263_v17, %v9662_v63  ;;  %v7511_v15 = vor.u32 %v8391_v12, %v7508_v6  ;;  %v4268_v52 = vsel %vm1079_vm7, %v4266_v44, %v4267_v16 }
 0x35d   : > { %4145 = vmatmul.bf16.gmra.mxu3 %v9627_v48  ;;  %4610 = vmatmul.bf16.gmra.mxu1 %v9636_v59  ;;  %v8415_v48 = vld [vmem:[#allocation8 + $0x5c4] sm:$0xf] }
 0x35e   : > { %v9658_v36 = vpop.f32.mrf.mxu2  ;;  %4708 = vmatpush.bf16.msrb.mxu3 %v7543_v3  ;;  %v7607_v26 = vor.u32 %v8415_v48, %v7604_v24 }
 0x35f   : > { %v3590_v46 = vadd.f32 %v9658_v36, %v9646_v13 }
 0x360   : > { %4724 = vmatpush.bf16.msra.mxu0 %v7623_v45 }
 0x362   : > { %v3576_v47 = vpop.f32.mrf.mxu1  ;;  %4709 = vmatpush.bf16.msrb.mxu3 %v7535_v62 }
 0x363   : > { %4163 = vmatmul.bf16.gmra.mxu0 %v9631_v18  ;;  %4628 = vmatmul.bf16.gmra.mxu2 %v9644_v49  ;;  %v8393_v18 = vld [vmem:[#allocation8 + $0x514] sm:$0xf] }
 0x364   : > { %4725 = vmatpush.bf16.msra.mxu0 %v7615_v28  ;;  %v7519_v0 = vor.u32 %v8393_v18, %v7516_v55 }
 0x366   : > { %v3592_v9 = vpop.f32.mrf.mxu2  ;;  %4710 = vmatpush.bf16.msrb.mxu3 %v7527_v54 }
 0x367   : > { %v3593_v22 = vadd.f32 %v3592_v9, %v3574_v39 }
 0x368   : > { %4726 = vmatpush.bf16.msra.mxu0 %v7607_v26 }
 0x36a   : > { %v3641_v43 = vpop.f32.mrf.mxu1  ;;  %4711 = vmatpush.bf16.msrb.mxu3 %v7519_v0 }
 0x36c   : > { %4727 = vmatpush.bf16.msra.mxu0 %v7599_v11 }
 0x36d   : > { %4641 = vmatmul.bf16.vlgmr.msra.gmra.mxu3 %v4265_v5  ;;  %4677 = vmatmul.bf16.vlgmr.msrb.gmra.mxu1 %v9640_v19  ;;  %v8407_v19 = vld [vmem:[#allocation8 + $0x584] sm:$0xf] }
 0x36e   : > { %v3594_v10 = vpop.f32.mrf.mxu2  ;;  %4712 = vmatpush.bf16.msrb.mxu3 %v7511_v15  ;;  %v7575_v23 = vor.u32 %v8407_v19, %v7572_v53 }
 0x370   : > { %4728 = vmatpush.bf16.msra.mxu0 %v7591_v40  ;;  %v3605_v2 = vpop.f32.mrf.mxu3  ;;  %v3623_v39 = vpop.f32.mrf.mxu0 }
 0x371   : > { %v3606_v38 = vadd.f32 %v3605_v2, %v9654_v50 }
 0x372   : > { %v9668_v42 = vpop.f32.mrf.mxu1 }
 0x373   : > { %v3624_v45 = vadd.f32 %v3623_v39, %v3606_v38  ;;  %4659 = vmatmul.bf16.vlgmr.msrb.gmra.mxu0 %v4268_v52  ;;  %4695 = vmatmul.bf16.vlgmr.msrb.gmra.mxu2 %v9650_v31 }
 0x374   : > { %4729 = vmatpush.bf16.msra.mxu0 %v7583_v41 }
 0x376   : > { %v3659_v58 = vpop.f32.mrf.mxu2 }
 0x377   : > { %v3660_v3 = vadd.f32 %v3659_v58, %v3641_v43 }
 0x378   : > { %4730 = vmatpush.bf16.msra.mxu0 %v7575_v23  ;;  %v3607_v28 = vpop.f32.mrf.mxu3  ;;  %v3625_v20 = vpop.f32.mrf.mxu0 }
 0x379   : > { %v3608_v30 = vadd.f32 %v3607_v28, %v3590_v46 }
 0x37a   : > { %v3646_v4 = vpop.f32.mrf.mxu1 }
 0x37b   : > { %v3626_v41 = vadd.f32 %v3625_v20, %v3608_v30  ;;  %v8425_v30 = vld [vmem:[%s9947_s5 + $0x10] sm:$0xff] }
 0x37d   : > { %4646 = vmatmul.bf16.gmra.mxu3 %v9662_v63  ;;  %4682 = vmatmul.bf16.gmra.mxu1 %v9636_v59 }
 0x37e   : > { %v3661_v50 = vpop.f32.mrf.mxu2 }
 0x380   : > { %v3610_v21 = vpop.f32.mrf.mxu3  ;;  %v3628_v47 = vpop.f32.mrf.mxu0 }
 0x381   : > { %v3611_v8 = vadd.f32 %v3610_v21, %v3593_v22 }
 0x382   : > { %v3648_v62 = vpop.f32.mrf.mxu1 }
 0x383   : > { %v3629_v48 = vadd.f32 %v3628_v47, %v3611_v8  ;;  %4664 = vmatmul.bf16.gmra.mxu0 %v4267_v16  ;;  %4700 = vmatmul.bf16.gmra.mxu2 %v9644_v49 }
 0x386   : > { %v3664_v31 = vpop.f32.mrf.mxu2 }
 0x387   : > { %v3665_v24 = vadd.f32 %v3664_v31, %v3646_v4 }
 0x388   : > { %v3612_v7 = vpop.f32.mrf.mxu3  ;;  %v3630_v25 = vpop.f32.mrf.mxu0 }
 0x38a   : > { %v4033_v26 = vpop.f32.mrf.mxu1 }
 0x38b   : > { %v4034_v60 = vadd.f32 %v4033_v26, %v3624_v45  ;;  %v8430_v26 = vld [vmem:[%s9947_s5 + $0x38] sm:$0xff] }
 0x38c   : > { %5142 = vmatpush.bf16.msra.mxu3 %v8430_v26  ;;  %v8440_v26 = vld [vmem:[%s9947_s5 + $0x88] sm:$0xff] }
 0x38d   : > { %4713 = vmatmul.bf16.vlgmr.msrb.gmra.mxu3 %v4265_v5 }
 0x38e   : > { %v3666_v27 = vpop.f32.mrf.mxu2 }
 0x390   : > { %v3677_v29 = vpop.f32.mrf.mxu3  ;;  %v3695_v9 = vpop.f32.mrf.mxu0 }
 0x391   : > { %v3678_v59 = vadd.f32 %v3677_v29, %v3660_v3 }
 0x392   : > { %v4035_v61 = vpop.f32.mrf.mxu1 }
 0x393   : > { %v3696_v1 = vadd.f32 %v3695_v9, %v3678_v59  ;;  %4731 = vmatmul.bf16.vlgmr.msra.gmra.mxu0 %v4268_v52  ;;  %v4036_v39 = vadd.f32 %v4035_v61, %v3626_v41 }
 0x396   : > { %v4051_v54 = vpop.f32.mrf.mxu2 }
 0x397   : > { %v4052_v11 = vadd.f32 %v4051_v54, %v4034_v60 }
 0x398   : > { %v3679_v22 = vpop.f32.mrf.mxu3  ;;  %v3697_v33 = vpop.f32.mrf.mxu0 }
 0x39a   : > { %v4038_v18 = vpop.f32.mrf.mxu1 }
 0x39b   : > { %v4039_v49 = vadd.f32 %v4038_v18, %v3629_v48  ;;  %v8429_v18 = vld [vmem:[%s9947_s5 + $0x30] sm:$0xff] }
 0x39c   : > { %5143 = vmatpush.bf16.msra.mxu3 %v8429_v18  ;;  %v8439_v18 = vld [vmem:[%s9947_s5 + $0x80] sm:$0xff] }
 0x39d   : > { %4718 = vmatmul.bf16.gmra.mxu3 %v9662_v63 }
 0x39e   : > { %v4053_v55 = vpop.f32.mrf.mxu2 }
 0x39f   : > { %v4054_v52 = vadd.f32 %v4053_v55, %v4036_v39  ;;  %v8428_v55 = vld [vmem:[%s9947_s5 + $0x28] sm:$0xff] }
 0x3a0   : > { %v3682_v56 = vpop.f32.mrf.mxu3  ;;  %v3700_v51 = vpop.f32.mrf.mxu0  ;;  %5144 = vmatpush.bf16.msra.mxu3 %v8428_v55  ;;  %v8454_v55 = vld [vmem:[%s9947_s5 + $0xf8] sm:$0xff] }
 0x3a1   : > { %v3683_v35 = vadd.f32 %v3682_v56, %v3665_v24  ;;  %5028 = vmatpush.bf16.msra.mxu2 %v8454_v55  ;;  %v8456_v55 = vld [vmem:[%s9947_s5 + $0x108] sm:$0xff] }
 0x3a2   : > { %v4040_v43 = vpop.f32.mrf.mxu1 }
 0x3a3   : > { %v3701_v17 = vadd.f32 %v3700_v51, %v3683_v35  ;;  %4736 = vmatmul.bf16.gmra.mxu0 %v4267_v16  ;;  %v3662_v16 = vadd.f32 %v3661_v50, %v9668_v42 }
 0x3a5   : > { %v3680_v38 = vadd.f32 %v3679_v22, %v3662_v16 }
 0x3a6   : > { %v4056_v14 = vpop.f32.mrf.mxu2 }
 0x3a7   : > { %v4057_v0 = vadd.f32 %v4056_v14, %v4039_v49  ;;  %v3698_v36 = vadd.f32 %v3697_v33, %v3680_v38  ;;  %v8427_v14 = vld [vmem:[%s9947_s5 + $0x20] sm:$0xff] }
 0x3a8   : > { %v3684_v40 = vpop.f32.mrf.mxu3  ;;  %v3702_v12 = vpop.f32.mrf.mxu0  ;;  %5145 = vmatpush.bf16.msra.mxu3 %v8427_v14 }
 0x3a9   : > { %v8426_v12 = vld [vmem:[%s9947_s5 + $0x18] sm:$0xff] }
 0x3aa   : > { %v4105_v6 = vpop.f32.mrf.mxu1 }
 0x3ab   : > { %v4106_v32 = vadd.f32 %v4105_v6, %v3696_v1 }
 0x3ac   : > { %5146 = vmatpush.bf16.msra.mxu3 %v8426_v12 }
 0x3ae   : > { %v4058_v5 = vpop.f32.mrf.mxu2 }
 0x3af   : > { %v8445_v5 = vld [vmem:[%s9947_s5 + $0xb0] sm:$0xff] }
 0x3b0   : > { %v4069_v37 = vpop.f32.mrf.mxu3  ;;  %v4087_v63 = vpop.f32.mrf.mxu0  ;;  %5147 = vmatpush.bf16.msra.mxu3 %v8425_v30 }
 0x3b1   : > { %v4070_v10 = vadd.f32 %v4069_v37, %v4052_v11 }
 0x3b2   : > { %v4107_v15 = vpop.f32.mrf.mxu1 }
 0x3b3   : > { %v9678_v2 = vadd.f32 %v4087_v63, %v4070_v10  ;;  %v4108_v28 = vadd.f32 %v4107_v15, %v3698_v36  ;;  %v8444_v63 = vld [vmem:[%s9947_s5 + $0xa8] sm:$0xff]  ;;  %v8438_v15 = vld [vmem:[%s9947_s5 + $0x78] sm:$0xff] }
 0x3b4   : > { %v8424_v10 = vld [vmem:[%s9947_s5 + $0x8] sm:$0xff]  ;;  %5160 = vmatpush.bf16.msrb.mxu0 %v8438_v15 }
 0x3b5   : > { %5148 = vmatpush.bf16.msra.mxu3 %v8424_v10  ;;  %v8433_v10 = vld [vmem:[%s9947_s5 + $0x50] sm:$0xff]  ;;  %v8452_v15 = vld [vmem:[%s9947_s5 + $0xe8] sm:$0xff] }
 0x3b6   : > { %v4123_v44 = vpop.f32.mrf.mxu2 }
 0x3b7   : > { %v4124_v45 = vadd.f32 %v4123_v44, %v4106_v32  ;;  %v9731_v44 = vld [vmem:[%s9952_s10] sm:$0x3] }
 0x3b8   : > { %v4071_v19 = vpop.f32.mrf.mxu3  ;;  %v4089_v53 = vpop.f32.mrf.mxu0 }
 0x3b9   : > { %v4072_v23 = vadd.f32 %v4071_v19, %v4054_v52  ;;  %v8423_v19 = vld [vmem:[%s9947_s5] sm:$0xff] }
 0x3ba   : > { %v4110_v13 = vpop.f32.mrf.mxu1  ;;  %5149 = vmatpush.bf16.msra.mxu3 %v8423_v19 }
 0x3bb   : > { %v9681_v58 = vadd.f32 %v4089_v53, %v4072_v23  ;;  %v4111_v3 = vadd.f32 %v4110_v13, %v3701_v17  ;;  %v4749_v23 = vperm.slane %v9731_v44, 0  ;;  %v9743_v13 = vadd.s32 4294967294, %v9112_v57 }
 0x3bd   : > { %vm4770_vm14 = vcmp.ge.s32.totalorder %v9743_v13, 0 }
 0x3be   : > { %v4125_v4 = vpop.f32.mrf.mxu2  ;;  %vm9793_vm15 = vmpackc.low %vm8928_vm2, %vm4770_vm14 }
 0x3bf   : > { %v4126_v20 = vadd.f32 %v4125_v4, %v4108_v28  ;;  %v8442_v28 = vld [vmem:[%s9947_s5 + $0x98] sm:$0xff] }
 0x3c0   : > { %v4074_v21 = vpop.f32.mrf.mxu3  ;;  %v4092_v47 = vpop.f32.mrf.mxu0 }
 0x3c1   : > { %v4075_v8 = vadd.f32 %v4074_v21, %v4057_v0  ;;  %v8446_v0 = vld [vmem:[%s9947_s5 + $0xb8] sm:$0xff] }
 0x3c2   : > { %v4112_v42 = vpop.f32.mrf.mxu1  ;;  %5010 = vmatpush.bf16.msra.mxu1 %v8446_v0 }
 0x3c3   : > { %v9683_v50 = vadd.f32 %v4092_v47, %v4075_v8 }
 0x3c6   : > { %v4128_v62 = vpop.f32.mrf.mxu2  ;;  %5011 = vmatpush.bf16.msra.mxu1 %v8445_v5 }
 0x3c7   : > { %v4129_v48 = vadd.f32 %v4128_v62, %v4111_v3 }
 0x3c8   : > { %v4076_v31 = vpop.f32.mrf.mxu3  ;;  %v4094_v24 = vpop.f32.mrf.mxu0 }
 0x3c9   : > { %v8441_v31 = vld [vmem:[%s9947_s5 + $0x90] sm:$0xff] }
 0x3ca   : > { %v4606_v7 = vpop.f32.mrf.mxu1  ;;  %5012 = vmatpush.bf16.msra.mxu1 %v8444_v63  ;;  %v8437_v24 = vld [vmem:[%s9947_s5 + $0x70] sm:$0xff] }
 0x3cb   : > { %5161 = vmatpush.bf16.msrb.mxu0 %v8437_v24  ;;  %v8461_v63 = vld [vmem:[%s9947_s5 + $0x130] sm:$0xff] }
 0x3ce   : > { %v4130_v25 = vpop.f32.mrf.mxu2 }
 0x3d0   : > { %v4141_v60 = vpop.f32.mrf.mxu3  ;;  %v4159_v27 = vpop.f32.mrf.mxu0 }
 0x3d1   : > { %v4142_v29 = vadd.f32 %v4141_v60, %v4124_v45  ;;  %v8443_v45 = vld [vmem:[%s9947_s5 + $0xa0] sm:$0xff]  ;;  %v8436_v60 = vld [vmem:[%s9947_s5 + $0x68] sm:$0xff] }
 0x3d2   : > { %v4608_v9 = vpop.f32.mrf.mxu1  ;;  %5013 = vmatpush.bf16.msra.mxu1 %v8443_v45  ;;  %5162 = vmatpush.bf16.msrb.mxu0 %v8436_v60  ;;  %v8451_v45 = vld [vmem:[%s9947_s5 + $0xe0] sm:$0xff]  ;;  %v8449_v60 = vld [vmem:[%s9947_s5 + $0xd0] sm:$0xff] }
 0x3d3   : > { %v9688_v59 = vadd.f32 %v4159_v27, %v4142_v29 }
 0x3d6   : > { %v4624_v61 = vpop.f32.mrf.mxu2  ;;  %5014 = vmatpush.bf16.msra.mxu1 %v8442_v28  ;;  %v8459_v28 = vld [vmem:[%s9947_s5 + $0x120] sm:$0xff] }
 0x3d7   : > { %v4625_v41 = vadd.f32 %v4624_v61, %v4606_v7 }
 0x3d8   : > { %v4143_v1 = vpop.f32.mrf.mxu3  ;;  %v4161_v54 = vpop.f32.mrf.mxu0 }
 0x3d9   : > { %v4144_v11 = vadd.f32 %v4143_v1, %v4126_v20 }
 0x3da   : > { %v9690_v22 = vpop.f32.mrf.mxu1  ;;  %5015 = vmatpush.bf16.msra.mxu1 %v8441_v31 }
 0x3db   : > { %v9692_v33 = vadd.f32 %v4161_v54, %v4144_v11 }
 0x3de   : > { %v4626_v49 = vpop.f32.mrf.mxu2  ;;  %5016 = vmatpush.bf16.msra.mxu1 %v8440_v26 }
 0x3df   : > { %v4627_v4 = vadd.f32 %v4626_v49, %v4608_v9  ;;  %v8435_v49 = vld [vmem:[%s9947_s5 + $0x60] sm:$0xff] }
 0x3e0   : > { %v4146_v56 = vpop.f32.mrf.mxu3  ;;  %v4164_v51 = vpop.f32.mrf.mxu0  ;;  %5163 = vmatpush.bf16.msrb.mxu0 %v8435_v49 }
 0x3e1   : > { %v4147_v35 = vadd.f32 %v4146_v56, %v4129_v48  ;;  %v8462_v56 = vld [vmem:[%s9947_s5 + $0x138] sm:$0xff] }
 0x3e2   : > { %v4613_v43 = vpop.f32.mrf.mxu1  ;;  %5017 = vmatpush.bf16.msra.mxu1 %v8439_v18  ;;  %v8448_v18 = vld [vmem:[%s9947_s5 + $0xc8] sm:$0xff] }
 0x3e3   : > { %v9700_v17 = vadd.f32 %v4164_v51, %v4147_v35 }
 0x3e6   : > { %v4629_v40 = vpop.f32.mrf.mxu2  ;;  %5329 = vmatpush.bf16.msrb.mxu1 %v8462_v56 }
 0x3e7   : > { %v4630_v27 = vadd.f32 %v4629_v40, %v9690_v22  ;;  %v9781_v22 = vadd.s32 4294967294, %v9125_v34  ;;  %v8453_v40 = vld [vmem:[%s9947_s5 + $0xf0] sm:$0xff] }
 0x3e8   : > { %v4148_v6 = vpop.f32.mrf.mxu3  ;;  %v4166_v32 = vpop.f32.mrf.mxu0  ;;  %5029 = vmatpush.bf16.msra.mxu2 %v8453_v40 }
 0x3e9   : > { %vm4775_vm0 = vcmp.lt.s32.totalorder %v9781_v22, 16 }
 0x3ea   : > { %v9711_v46 = vpop.f32.mrf.mxu1  ;;  %5330 = vmatpush.bf16.msrb.mxu1 %v8461_v63 }
 0x3ec   : > { %5030 = vmatpush.bf16.msra.mxu2 %v8452_v15 }
 0x3ee   : > { %v4631_v37 = vpop.f32.mrf.mxu2 }
 0x3f0   : > { %v4642_v16 = vpop.f32.mrf.mxu3  ;;  %v4660_v39 = vpop.f32.mrf.mxu0  ;;  %5031 = vmatpush.bf16.msra.mxu2 %v8451_v45 }
 0x3f1   : > { %v4643_v38 = vadd.f32 %v4642_v16, %v4625_v41  ;;  %v8460_v16 = vld [vmem:[%s9947_s5 + $0x128] sm:$0xff] }
 0x3f2   : > { %v9733_v52 = vpop.f32.mrf.mxu1  ;;  %5331 = vmatpush.bf16.msrb.mxu1 %v8460_v16 }
 0x3f3   : > { %v4661_v53 = vadd.f32 %v4660_v39, %v4643_v38  ;;  %v8432_v39 = vld [vmem:[%s9947_s5 + $0x48] sm:$0xff] }
 0x3f5   : > { %v4741_v36 = vadd.f32 %v4661_v53, %v9678_v2 }
 0x3f6   : > { %v9746_v3 = vpop.f32.mrf.mxu2  ;;  %5332 = vmatpush.bf16.msrb.mxu1 %v8459_v28 }
 0x3f7   : > { %v4753_v20 = vadd.f32 %v4749_v23, %v4741_v36  ;;  %v4697_v38 = vadd.f32 %v9746_v3, %v9711_v46  ;;  %v4750_v3 = vperm.slane %v9731_v44, 1  ;;  %v8458_v44 = vld [vmem:[%s9947_s5 + $0x118] sm:$0xff] }
 0x3f8   : > { %v4644_v21 = vpop.f32.mrf.mxu3  ;;  %v4662_v47 = vpop.f32.mrf.mxu0 }
 0x3f9   : > { %v4759_v8 = vmax.f32 %v4753_v20, 0.0  ;;  %v4645_v42 = vadd.f32 %v4644_v21, %v4627_v4  ;;  %v8431_v4 = vld [vmem:[%s9947_s5 + $0x40] sm:$0xff] }
 0x3fa   : > { %v9752_v62 = vpop.f32.mrf.mxu1  ;;  %5333 = vmatpush.bf16.msrb.mxu1 %v8458_v44  ;;  %v8463_v44 = vld [vmem:[%s9947_s5 + $0x140] sm:$0xff] }
 0x3fb   : > { %v4785_v2 = vsel %vm4770_vm14, %v4759_v8, 0.0  ;;  %v4663_v48 = vadd.f32 %v4662_v47, %v4645_v42  ;;  %v8450_v47 = vld [vmem:[%s9947_s5 + $0xd8] sm:$0xff] }
 0x3fc   : > { %4791 = vst [vmem:[#allocation3] sm:$0xff] %v4785_v2  ;;  %5032 = vmatpush.bf16.msra.mxu2 %v8450_v47 }
 0x3fd   : > { %v4743_v7 = vadd.f32 %v4663_v48, %v9681_v58 }
 0x3fe   : > { %v9763_v25 = vpop.f32.mrf.mxu2 }
 0x3ff   : > { %v4755_v29 = vadd.f32 %v4749_v23, %v4743_v7  ;;  %v4699_v7 = vadd.f32 %v9763_v25, %v9733_v52  ;;  %v8457_v52 = vld [vmem:[%s9947_s5 + $0x110] sm:$0xff] }
 0x400   : > { %v4647_v9 = vpop.f32.mrf.mxu3  ;;  %v4665_v61 = vpop.f32.mrf.mxu0  ;;  %5033 = vmatpush.bf16.msra.mxu2 %v8449_v60  ;;  %5334 = vmatpush.bf16.msrb.mxu1 %v8457_v52 }
 0x401   : > { %v9772_v1 = vmax.f32 %v4755_v29, 0.0  ;;  %v4648_v58 = vadd.f32 %v4647_v9, %v4630_v27 }
 0x402   : > { %v4685_v54 = vpop.f32.mrf.mxu1 }
 0x403   : > { %v4666_v11 = vadd.f32 %v4665_v61, %v4648_v58  ;;  %v8656_v43 = vpack.c.bf16 %v9772_v1, %v4759_v8  ;;  %v4839_v5 = vld [vmem:[#allocation3] sm:$0xfe] }
 0x404   : > { %v4843_v37 = vpack.c.bf16 %v9772_v1, %v4839_v5  ;;  %5034 = vmatpush.bf16.msra.mxu2 %v8448_v18  ;;  %5335 = vmatpush.bf16.msrb.mxu1 %v8456_v55 }
 0x405   : > { %v4745_v51 = vadd.f32 %v4666_v11, %v9683_v50  ;;  %8657 = vmatmul.msk.bf16.vlgmr.msra.gmra.mxu3 %vm9793_vm15, %v8656_v43  ;;  %v8434_v50 = vld [vmem:[%s9947_s5 + $0x58] sm:$0xff] }
 0x406   : > { %v9800_v14 = vpop.f32.mrf.mxu2  ;;  %5164 = vmatpush.bf16.msrb.mxu0 %v8434_v50  ;;  %v4881_v31 = vshrl.u32 %v4843_v37, 16 }
 0x407   : > { %v4757_v0 = vadd.f32 %v4749_v23, %v4745_v51  ;;  %v4883_v23 = vshll.u32 %v4843_v37, 16  ;;  %v4702_v56 = vadd.f32 %v9800_v14, %v9752_v62  ;;  %v8447_v51 = vld [vmem:[%s9947_s5 + $0xc0] sm:$0xff] }
 0x408   : > { %v4649_v12 = vpop.f32.mrf.mxu3  ;;  %v4667_v6 = vpop.f32.mrf.mxu0  ;;  %v8455_v62 = vld [vmem:[%s9947_s5 + $0x100] sm:$0xff]  ;;  %5035 = vmatpush.bf16.msra.mxu2 %v8447_v51 }
 0x409   : > { %v4763_v32 = vmax.f32 %v4757_v0, 0.0  ;;  %v4885_v42 = vrot.slane %v4883_v23, 1  ;;  %v8469_v12 = vld [vmem:[%s9947_s5 + $0x170] sm:$0xff]  ;;  %5336 = vmatpush.bf16.msrb.mxu1 %v8455_v62 }
 0x40a   : > { %5165 = vmatpush.bf16.msrb.mxu0 %v8433_v10  ;;  %v8468_v10 = vld [vmem:[%s9947_s5 + $0x168] sm:$0xff] }
 0x40b   : > { %v4789_v30 = vsel %vm4775_vm0, %v4763_v32, 0.0  ;;  %v4886_v29 = vor.u32 %v4885_v42, %v4881_v31  ;;  %v8464_v31 = vld [vmem:[%s9947_s5 + $0x148] sm:$0xff] }
 0x40c   : > { %4795 = vst [vmem:[#allocation3 + $0x10] sm:$0xf] %v4789_v30 }
 0x40e   : > { %v4703_v41 = vpop.f32.mrf.mxu2  ;;  %5166 = vmatpush.bf16.msrb.mxu0 %v8432_v39  ;;  %v8467_v39 = vld [vmem:[%s9947_s5 + $0x160] sm:$0xff] }
 0x410   : > { %v4714_v19 = vpop.f32.mrf.mxu3  ;;  %v4732_v53 = vpop.f32.mrf.mxu0 }
 0x411   : > { %v4715_v36 = vadd.f32 %v4714_v19, %v4697_v38  ;;  %v8466_v19 = vld [vmem:[%s9947_s5 + $0x158] sm:$0xff] }
 0x412   : > { %5167 = vmatpush.bf16.msrb.mxu0 %v8431_v4 }
 0x413   : > { %v4733_v46 = vadd.f32 %v4732_v53, %v4715_v36  ;;  %v4841_v20 = vld [vmem:[#allocation3 + $0x10] sm:$0x7]  ;;  %v5178_v53 = vld [vmem:[#allocation3] sm:$0xfc] }
 0x414   : > { %v4801_v21 = vld [vmem:[#allocation3 + $0x10] sm:$0x3]  ;;  %v4845_v8 = vpack.c.bf16 %v4841_v20, %v4841_v20 }
 0x415   : > { %v4805_v2 = vpack.c.bf16 %v4801_v21, %v4801_v21  ;;  %v4742_v48 = vadd.f32 %v4733_v46, %v9688_v59  ;;  %v5180_v38 = vld [vmem:[#allocation3 + $0x10] sm:$0xf]  ;;  %v5182_v46 = vpack.c.bf16 %v9772_v1, %v5178_v53 }
 0x416   : > { %v4888_v24 = vshll.u32 %v4845_v8, 16  ;;  %v4904_v30 = vshrl.u32 %v4845_v8, 16  ;;  %v5184_v23 = vpack.c.bf16 %v5180_v38, %v5180_v38  ;;  %v8465_v20 = vld [vmem:[%s9947_s5 + $0x150] sm:$0xff] }
 0x417   : > { %5155 = vmatmul.bf16.gmra.mxu3 %v4805_v2  ;;  %v4754_v26 = vadd.f32 %v4750_v3, %v4742_v48  ;;  %v5223_v48 = vrot.slane %v5182_v46, 1  ;;  %v8493_v38 = vld [vmem:[#allocation9 + $0xb0] sm:$0xff]  ;;  %v8483_v46 = vld [vmem:[#allocation9 + $0x60] sm:$0xff] }
 0x418   : > { %v4716_v27 = vpop.f32.mrf.mxu3  ;;  %v4734_v59 = vpop.f32.mrf.mxu0  ;;  %v4890_v9 = vrot.slane %v4888_v24, 1  ;;  %v5224_v8 = vrot.slane %v5184_v23, 1  ;;  %v8473_v23 = vld [vmem:[#allocation9 + $0x10] sm:$0xff] }
 0x419   : > { %v4760_v61 = vmax.f32 %v4754_v26, 0.0  ;;  %v4717_v58 = vadd.f32 %v4716_v27, %v4699_v7 }
 0x41a   : > { %v4891_v54 = vsel %vm806_vm5, %v4886_v29, %v4890_v9  ;;  %v4906_v41 = vor.u32 %v4904_v30, %v4890_v9  ;;  %v5225_v24 = vsel %vm1079_vm7, %v5223_v48, %v5224_v8  ;;  %v8477_v30 = vld [vmem:[#allocation9 + $0x30] sm:$0xff]  ;;  %v5380_v48 = vadd.s32 4294967295, %v9112_v57 }
 0x41b   : > { %v4786_v25 = vsel %vm4770_vm14, %v4760_v61, 0.0  ;;  %v4735_v11 = vadd.f32 %v4734_v59, %v4717_v58  ;;  %5018 = vmatmul.bf16.vlgmr.msra.gmra.mxu1 %v4891_v54 }
 0x41c   : > { %4792 = vst [vmem:[#allocation3 + $0x8] sm:$0xff] %v4786_v25  ;;  %vm5383_vm1 = vcmp.ge.s32.totalorder %v5380_v48, 0 }
 0x41d   : > { %v4744_v49 = vadd.f32 %v4735_v11, %v9692_v33  ;;  %v8470_v33 = vld [vmem:[%s9947_s5 + $0x178] sm:$0xff]  ;;  %vm8661_vm3 = vmpackc.low %vm8928_vm2, %vm5383_vm1 }
 0x41e   : > { %5347 = vmatpush.bf16.msrb.mxu2 %v8470_v33 }
 0x41f   : > { %v4756_v13 = vadd.f32 %v4750_v3, %v4744_v49 }
 0x420   : > { %v4719_v43 = vpop.f32.mrf.mxu3  ;;  %v4737_v50 = vpop.f32.mrf.mxu0 }
 0x421   : > { %v9872_v0 = vmax.f32 %v4756_v13, 0.0  ;;  %v4720_v40 = vadd.f32 %v4719_v43, %v4702_v56 }
 0x422   : > { %5348 = vmatpush.bf16.msrb.mxu2 %v8469_v12 }
 0x423   : > { %v4738_v14 = vadd.f32 %v4737_v50, %v4720_v40  ;;  %v8659_v32 = vpack.c.bf16 %v9872_v0, %v4760_v61  ;;  %v4840_v16 = vld [vmem:[#allocation3 + $0x8] sm:$0xfe]  ;;  %v8478_v50 = vld [vmem:[#allocation9 + $0x38] sm:$0xff] }
 0x424   : > { %v4844_v35 = vpack.c.bf16 %v9872_v0, %v4840_v16  ;;  %v5179_v27 = vld [vmem:[#allocation3 + $0x8] sm:$0xfc]  ;;  %5567 = vmatpush.bf16.msra.mxu0 %v8478_v50  ;;  %v8494_v16 = vld [vmem:[#allocation9 + $0xb8] sm:$0xff] }
 0x425   : > { %v4746_v6 = vadd.f32 %v4738_v14, %v9700_v17  ;;  %8660 = vmatmul.msk.bf16.vlgmr.msrb.gmra.mxu0 %vm9793_vm15, %v8659_v32  ;;  %v5183_v29 = vpack.c.bf16 %v9872_v0, %v5179_v27  ;;  %5656 = vmatpush.bf16.msra.mxu1 %v8494_v16 }
 0x426   : > { %5349 = vmatpush.bf16.msrb.mxu2 %v8468_v10  ;;  %v4895_v45 = vshll.u32 %v4844_v35, 16  ;;  %v4893_v21 = vshrl.u32 %v4844_v35, 16 }
 0x427   : > { %v4758_v5 = vadd.f32 %v4750_v3, %v4746_v6  ;;  %v5226_v61 = vrot.slane %v5183_v29, 1 }
 0x428   : > { %v4721_v37 = vpop.f32.mrf.mxu3  ;;  %v4739_v63 = vpop.f32.mrf.mxu0  ;;  %v4897_v4 = vrot.slane %v4895_v45, 1  ;;  %5568 = vmatpush.bf16.msra.mxu0 %v8477_v30  ;;  %v8485_v45 = vld [vmem:[#allocation9 + $0x70] sm:$0xff] }
 0x429   : > { %v4764_v15 = vmax.f32 %v4758_v5, 0.0  ;;  %v8476_v63 = vld [vmem:[#allocation9 + $0x28] sm:$0xff]  ;;  %5657 = vmatpush.bf16.msra.mxu1 %v8493_v38 }
 0x42a   : > { %5350 = vmatpush.bf16.msrb.mxu2 %v8467_v39  ;;  %v4898_v42 = vor.u32 %v4897_v4, %v4893_v21  ;;  %v8491_v4 = vld [vmem:[#allocation9 + $0xa0] sm:$0xff]  ;;  %v8490_v21 = vld [vmem:[#allocation9 + $0x98] sm:$0xff] }
 0x42b   : > { %v4790_v17 = vsel %vm4775_vm0, %v4764_v15, 0.0  ;;  %5023 = vmatmul.bf16.gmra.mxu1 %v4906_v41  ;;  %v8475_v41 = vld [vmem:[#allocation9 + $0x20] sm:$0xff] }
 0x42c   : > { %4796 = vst [vmem:[#allocation3 + $0x28] sm:$0xf] %v4790_v17  ;;  %5569 = vmatpush.bf16.msra.mxu0 %v8476_v63  ;;  %v8486_v17 = vld [vmem:[#allocation9 + $0x78] sm:$0xff] }
 0x42d   : > { %5505 = vmatpush.bf16.msrb.mxu3 %v8486_v17 }
 0x42e   : > { %5351 = vmatpush.bf16.msrb.mxu2 %v8466_v19  ;;  %v8474_v19 = vld [vmem:[#allocation9 + $0x18] sm:$0xff] }
 0x430   : > { %5570 = vmatpush.bf16.msra.mxu0 %v8475_v41 }
 0x431   : > { %5506 = vmatpush.bf16.msrb.mxu3 %v8485_v45 }
 0x432   : > { %5352 = vmatpush.bf16.msrb.mxu2 %v8465_v20  ;;  %v8471_v20 = vld [vmem:[#allocation9] sm:$0xff] }
 0x433   : > { %v4842_v22 = vld [vmem:[#allocation3 + $0x28] sm:$0x7] }
 0x434   : > { %v4802_v36 = vld [vmem:[#allocation3 + $0x28] sm:$0x3]  ;;  %v4846_v28 = vpack.c.bf16 %v4842_v22, %v4842_v22  ;;  %5571 = vmatpush.bf16.msra.mxu0 %v8474_v19  ;;  %v8599_v19 = vld [vmem:[%s9973_s27] ss:$0 sm:$0xff] }
 0x435   : > { %v4806_v3 = vpack.c.bf16 %v4802_v36, %v4802_v36  ;;  %v5181_v60 = vld [vmem:[#allocation3 + $0x28] sm:$0xf] }
 0x436   : > { %v4900_v47 = vshll.u32 %v4846_v28, 16  ;;  %5353 = vmatpush.bf16.msrb.mxu2 %v8464_v31  ;;  %v4907_v7 = vshrl.u32 %v4846_v28, 16  ;;  %v5185_v59 = vpack.c.bf16 %v5181_v60, %v5181_v60  ;;  %v8492_v22 = vld [vmem:[#allocation9 + $0xa8] sm:$0xff] }
 0x437   : > { %5173 = vmatmul.bf16.gmra.mxu0 %v4806_v3  ;;  %v8484_v36 = vld [vmem:[#allocation9 + $0x68] sm:$0xff]  ;;  %5658 = vmatpush.bf16.msra.mxu1 %v8492_v22 }
 0x438   : > { %v4902_v2 = vrot.slane %v4900_v47, 1  ;;  %v5227_v9 = vrot.slane %v5185_v59, 1  ;;  %5572 = vmatpush.bf16.msra.mxu0 %v8473_v23  ;;  %v8472_v28 = vld [vmem:[#allocation9 + $0x8] sm:$0xff]  ;;  %5507 = vmatpush.bf16.msrb.mxu3 %v8484_v36 }
 0x439   : > { %v8488_v60 = vld [vmem:[#allocation9 + $0x88] sm:$0xff] }
 0x43a   : > { %v4903_v1 = vsel %vm806_vm5, %v4898_v42, %v4902_v2  ;;  %5354 = vmatpush.bf16.msrb.mxu2 %v8463_v44  ;;  %v4909_v26 = vor.u32 %v4907_v7, %v4902_v2  ;;  %v5228_v58 = vsel %vm1079_vm7, %v5226_v61, %v5227_v9  ;;  %v8598_v42 = vld [vmem:[#allocation14] ss:$0 sm:$0xff]  ;;  %v8482_v2 = vld [vmem:[#allocation9 + $0x58] sm:$0xff]  ;;  %v8481_v44 = vld [vmem:[#allocation9 + $0x50] sm:$0xff] }
 0x43b   : > { %5036 = vmatmul.bf16.vlgmr.msra.gmra.mxu2 %v4903_v1  ;;  %5337 = vmatmul.bf16.vlgmr.msrb.gmra.mxu1 %v5225_v24  ;;  %v8489_v1 = vld [vmem:[#allocation9 + $0x90] sm:$0xff]  ;;  %v8487_v61 = vld [vmem:[#allocation9 + $0x80] sm:$0xff] }
 0x43c   : > { %5573 = vmatpush.bf16.msra.mxu0 %v8472_v28  ;;  %5659 = vmatpush.bf16.msra.mxu1 %v8491_v4 }
 0x43d   : > { %5508 = vmatpush.bf16.msrb.mxu3 %v8483_v46 }
 0x440   : > { %5574 = vmatpush.bf16.msra.mxu0 %v8471_v20  ;;  %5660 = vmatpush.bf16.msra.mxu1 %v8490_v21 }
 0x441   : > { %5509 = vmatpush.bf16.msrb.mxu3 %v8482_v2 }
 0x444   : > { %5661 = vmatpush.bf16.msra.mxu1 %v8489_v1 }
 0x445   : > { %5510 = vmatpush.bf16.msrb.mxu3 %v8481_v44 }
 0x448   : > { %5662 = vmatpush.bf16.msra.mxu1 %v8488_v60 }
 0x44b   : > { %5041 = vmatmul.bf16.gmra.mxu2 %v4909_v26  ;;  %5342 = vmatmul.bf16.gmra.mxu1 %v5224_v8 }
 0x44c   : > { %5663 = vmatpush.bf16.msra.mxu1 %v8487_v61 }
 0x45b   : > { %5355 = vmatmul.bf16.vlgmr.msrb.gmra.mxu2 %v5228_v58 }
 0x46b   : > { %5360 = vmatmul.bf16.gmra.mxu2 %v5227_v9  ;;  %v8480_v9 = vld [vmem:[#allocation9 + $0x48] sm:$0xff] }
 0x46c   : > { %5511 = vmatpush.bf16.msrb.mxu3 %v8480_v9 }
 0x488   : > { %v5151_v54 = vpop.f32.mrf.mxu3 }
 0x490   : > { %v5153_v52 = vpop.f32.mrf.mxu3 }
 0x498   : > { %v5019_v25 = vpop.f32.mrf.mxu1 }
 0x49a   : > { %v5156_v11 = vpop.f32.mrf.mxu3 }
 0x4a0   : > { %v5021_v18 = vpop.f32.mrf.mxu1 }
 0x4a2   : > { %v5158_v49 = vpop.f32.mrf.mxu3  ;;  %v5169_v55 = vpop.f32.mrf.mxu0 }
 0x4a3   : > { %v5382_v49 = vadd.s32 4294967295, %v9125_v34 }
 0x4a5   : > { %vm5388_vm4 = vcmp.lt.s32.totalorder %v5382_v49, 16 }
 0x4a8   : > { %v5024_v56 = vpop.f32.mrf.mxu1 }
 0x4aa   : > { %v9910_v13 = vpop.f32.mrf.mxu0 }
 0x4b0   : > { %v5026_v51 = vpop.f32.mrf.mxu1 }
 0x4b4   : > { %v9912_v43 = vpop.f32.mrf.mxu0 }
 0x4b8   : > { %v5338_v33 = vpop.f32.mrf.mxu1 }
 0x4bc   : > { %v5176_v0 = vpop.f32.mrf.mxu0 }
 0x4be   : > { %v5037_v40 = vpop.f32.mrf.mxu2 }
 0x4bf   : > { %v5038_v62 = vadd.f32 %v5037_v40, %v5019_v25 }
 0x4c0   : > { %v5340_v14 = vpop.f32.mrf.mxu1 }
 0x4c1   : > { %v5152_v12 = vadd.f32 %v5151_v54, %v5038_v62  ;;  %v8479_v54 = vld [vmem:[#allocation9 + $0x40] sm:$0xff] }
 0x4c2   : > { %5512 = vmatpush.bf16.msrb.mxu3 %v8479_v54 }
 0x4c3   : > { %v5170_v47 = vadd.f32 %v5169_v55, %v5152_v12 }
 0x4c6   : > { %v5039_v6 = vpop.f32.mrf.mxu2 }
 0x4c7   : > { %v5040_v32 = vadd.f32 %v5039_v6, %v5021_v18 }
 0x4c8   : > { %v9914_v5 = vpop.f32.mrf.mxu1 }
 0x4c9   : > { %v5154_v37 = vadd.f32 %v5153_v52, %v5040_v32 }
 0x4cb   : > { %v5172_v59 = vadd.f32 %v9910_v13, %v5154_v37 }
 0x4ce   : > { %v5042_v10 = vpop.f32.mrf.mxu2 }
 0x4cf   : > { %v5043_v15 = vadd.f32 %v5042_v10, %v5024_v56 }
 0x4d0   : > { %v5345_v35 = vpop.f32.mrf.mxu1 }
 0x4d1   : > { %v5157_v39 = vadd.f32 %v5156_v11, %v5043_v15 }
 0x4d3   : > { %v5175_v11 = vadd.f32 %v9912_v43, %v5157_v39 }
 0x4d6   : > { %v5044_v53 = vpop.f32.mrf.mxu2 }
 0x4de   : > { %v5356_v3 = vpop.f32.mrf.mxu2 }
 0x4df   : > { %v5357_v8 = vadd.f32 %v5356_v3, %v5338_v33 }
 0x4e1   : > { %v5365_v31 = vadd.f32 %v5357_v8, %v5170_v47 }
 0x4e3   : > { %v5372_v24 = vadd.f32 %v8598_v42, %v5365_v31 }
 0x4e5   : > { %v5375_v7 = vmax.f32 %v5372_v24, 0.0 }
 0x4e6   : > { %v5358_v26 = vpop.f32.mrf.mxu2 }
 0x4e7   : > { %v5398_v27 = vsel %vm5383_vm1, %v5375_v7, 0.0  ;;  %v5359_v29 = vadd.f32 %v5358_v26, %v5340_v14 }
 0x4e8   : > { %5401 = vst [vmem:[#allocation2 + $0x18] sm:$0xff] %v5398_v27 }
 0x4e9   : > { %v5366_v57 = vadd.f32 %v5359_v29, %v5172_v59 }
 0x4eb   : > { %v5373_v58 = vadd.f32 %v8598_v42, %v5366_v57 }
 0x4ed   : > { %v5376_v52 = vmax.f32 %v5373_v58, 0.0 }
 0x4ee   : > { %v5361_v25 = vpop.f32.mrf.mxu2 }
 0x4ef   : > { %v5362_v18 = vadd.f32 %v5361_v25, %v9914_v5  ;;  %v8662_v56 = vpack.c.bf16 %v5376_v52, %v5375_v7  ;;  %v5423_v50 = vld [vmem:[#allocation2 + $0x18] sm:$0xfe] }
 0x4f0   : > { %v5425_v40 = vpack.c.bf16 %v5376_v52, %v5423_v50  ;;  %v5581_v43 = vld [vmem:[#allocation2 + $0x18] sm:$0xfc] }
 0x4f1   : > { %v5367_v55 = vadd.f32 %v5362_v18, %v5175_v11  ;;  %8663 = vmatmul.msk.bf16.vlgmr.msra.gmra.mxu0 %vm8661_vm3, %v8662_v56  ;;  %v5583_v14 = vpack.c.bf16 %v5376_v52, %v5581_v43 }
 0x4f2   : > { %v5447_v62 = vshll.u32 %v5425_v40, 16  ;;  %v5445_v63 = vshrl.u32 %v5425_v40, 16 }
 0x4f3   : > { %v5374_v13 = vadd.f32 %v8598_v42, %v5367_v55  ;;  %v5604_v30 = vrot.slane %v5583_v14, 1 }
 0x4f4   : > { %v5449_v5 = vrot.slane %v5447_v62, 1 }
 0x4f5   : > { %v5377_v51 = vmax.f32 %v5374_v13, 0.0 }
 0x4f6   : > { %v5363_v33 = vpop.f32.mrf.mxu2  ;;  %v5450_v41 = vor.u32 %v5449_v5, %v5445_v63 }
 0x4f7   : > { %v5400_v0 = vsel %vm5388_vm4, %v5377_v51, 0.0 }
 0x4f8   : > { %5403 = vst [vmem:[#allocation2 + $0x50] sm:$0x3] %v5400_v0 }
 0x4ff   : > { %v5582_v12 = vld [vmem:[#allocation2 + $0x50] sm:$0x3] }
 0x500   : > { %v5424_v6 = vld [vmem:[#allocation2 + $0x50] sm:$0x1]  ;;  %v5584_v34 = vpack.c.bf16 %v5582_v12, %v5582_v12 }
 0x501   : > { %v5426_v32 = vpack.c.bf16 %v5424_v6, %v5424_v6 }
 0x502   : > { %v5605_v37 = vrot.slane %v5584_v34, 1 }
 0x503   : > { %v5452_v10 = vshll.u32 %v5426_v32, 16 }
 0x504   : > { %v5606_v15 = vsel %vm1079_vm7, %v5604_v30, %v5605_v37 }
 0x505   : > { %v5454_v16 = vrot.slane %v5452_v10, 1  ;;  %5664 = vmatmul.bf16.vlgmr.msra.gmra.mxu1 %v5606_v15 }
 0x507   : > { %v5455_v17 = vsel %vm806_vm5, %v5450_v41, %v5454_v16 }
 0x508   : > { %5513 = vmatmul.bf16.vlgmr.msrb.gmra.mxu3 %v5455_v17 }
 0x56e   : > { %v5576_v35 = vpop.f32.mrf.mxu0 }
 0x576   : > { %v5578_v22 = vpop.f32.mrf.mxu0 }
 0x582   : > { %v5665_v39 = vpop.f32.mrf.mxu1 }
 0x58a   : > { %v5667_v4 = vpop.f32.mrf.mxu1 }
 0x58b   : > { %v5514_v38 = vpop.f32.mrf.mxu3 }
 0x58c   : > { %v5577_v45 = vadd.f32 %v5576_v35, %v5514_v38 }
 0x58e   : > { %v5670_v53 = vadd.f32 %v5665_v39, %v5577_v45 }
 0x590   : > { %v5676_v23 = vadd.f32 %v8599_v19, %v5670_v53 }
 0x592   : > { %8600 = vtanh.f32 %v5676_v23 }
 0x593   : > { %v5516_v36 = vpop.f32.mrf.mxu3 }
 0x594   : > { %v5579_v28 = vadd.f32 %v5578_v22, %v5516_v36 }
 0x596   : > { %v5671_v46 = vadd.f32 %v5667_v4, %v5579_v28 }
 0x598   : > { %v8601_v3 = vpop.eup %8600  ;;  %v5677_v20 = vadd.f32 %v8599_v19, %v5671_v46 }
 0x599   : > { %5695 = vst [vmem:[%s586_s14] sm:$0xff] %v8601_v3 }
 0x59a   : > { %8602 = vtanh.f32 %v5677_v20 }
 0x5a0   : > { %v8603_v21 = vpop.eup %8602 }
 0x5a1   : > { %5696 = vst [vmem:[%s586_s14 + $0x8] sm:$0xff] %v8603_v21 }
 0x5a2 PF: > { %s9975_s17 = sld [smem:[#allocation19_spill]]  ;;  %s9976_s25 = smov %s8908_s26 }
 0x5a3   : > { %s9977_s26 = smov %s9979_s23 }
 0x5a8   : > { %s27_s27 = sadd.s32 1, %s9975_s17  }
 0x5a9   : > { %p24_p8 = scmp.ge.s32.totalorder %s27_s27, 4  }
 0x5ab   :  { %26 = sbr.rel (!%p24_p8) target bundleno = 10 (0xa), region = 143 }
 0x5b0   :  { %5726 = vsyncpa [#allocation5], 1 }
 0x5b1   :  { %5728 = vsyncpa [#allocation5 + $0x1], 1 }
 0x5b2   :  { %5729 = vsyncpa [#allocation7], 1 }
 0x5b3   :  { %5730 = vsyncpa [#allocation10], 1 }
 0x5b4   :  { %5731 = vsyncpa [#allocation13], 1 }

</bundles_post_ra>
